<compile_context>
chip_gen: v7x
topology: tpu7x:2x2x1
jax: 0.10.0
libtpu: 0.0.40
codegen_flags: <defaults>
</compile_context>

<pallas_src>
import jax
import jax.numpy as jnp
from jax.experimental import pallas as pl
from jax.experimental.pallas import tpu as pltpu

NUM_CLASSES_P = 5
NUM_CLASSES_S = 4
IN_CHANNELS = 1024
PAD_OUT = 128  # lane-dense padded output width (>= P + S = 9)


def vspp_head_kernel(x_ref, w_ref, out_ref, acc_ref):
    """One grid step: acc += (block_n, block_k) @ (block_k, PAD_OUT) on the MXU.

    x_ref  : (block_n, block_k)  streamed tile of flattened (C*T) features
    w_ref  : (block_k, PAD_OUT)  fused head weight block (bf16 by default)
    out_ref: (block_n, PAD_OUT)  written on the last K step only
    acc_ref: (block_n, PAD_OUT)  f32 accumulator scratch (resident across K)
    """
    k = pl.program_id(1)

    @pl.when(k == 0)
    def _():
        acc_ref[...] = jnp.zeros_like(acc_ref)

    # Cast the tile to the weight dtype IN-KERNEL (VPU, hidden under the DMA):
    # bf16 operands, f32 accumulation on the MXU.  No wrapper-side cast pass.
    acc_ref[...] += jnp.dot(
        x_ref[...].astype(w_ref.dtype),
        w_ref[...],
        preferred_element_type=jnp.float32,
    )

    @pl.when(k == pl.num_programs(1) - 1)
    def _():
        out_ref[...] = acc_ref[...].astype(out_ref.dtype)


def make_fused_weight(w_p, w_s, t, dtype=jnp.bfloat16):
    """Fuse both 1x1x1 conv heads + the temporal mean into one (C*T, 128) matrix.

    Build this ONCE (the head weights are frozen at inference time) and reuse it
    for every vspp_head call; do NOT rebuild it per call.
    """
    c = w_p.shape[1]
    w = jnp.zeros((c, PAD_OUT), jnp.float32)
    w = w.at[:, :NUM_CLASSES_P].set(jnp.asarray(w_p, jnp.float32).T)
    w = w.at[:, NUM_CLASSES_P:NUM_CLASSES_P + NUM_CLASSES_S].set(
        jnp.asarray(w_s, jnp.float32).T)
    # Row order c*T + t matches the contiguous reshape of (N, C, T, 1, 1).
    w_big = jnp.repeat(w, t, axis=0) * (1.0 / t)        # (C*T, PAD_OUT)
    return w_big.astype(dtype)


def _chip_budget():
    """Returns (vmem_limit_bytes, target x-tile bytes, streamed weight-block cap)."""
    try:
        kind = jax.devices()[0].device_kind.lower()
    except Exception:  # pragma: no cover - defensive, keep the kernel runnable
        kind = ""
    if ("v5" in kind) or ("v6" in kind):
        # 128 MiB physical VMEM: bigger tiles amortize the ~0.35 us/step cost.
        return 96 * 1024 * 1024, 24 * 1024 * 1024, 4 * 1024 * 1024
    # v7x (64 MiB physical VMEM) or unknown chip: conservative budget.
    return 48 * 1024 * 1024, 12 * 1024 * 1024, 4 * 1024 * 1024


@jax.jit
def vspp_head(x_ncdhw, w_big, b_p, b_s):
    """x_ncdhw: (N, 1024, T, 1, 1) I3D features, in whatever dtype they arrive
    (f32 or bf16 -- no wrapper cast is performed).
    w_big: (1024*T, 128) fused weight from make_fused_weight (built once).
    Returns (l_p, l_s) of shapes (N, P) and (N, S), matching VSPP.forward
    (dropout = identity in eval mode).
    """
    n, c, t = x_ncdhw.shape[0], x_ncdhw.shape[1], x_ncdhw.shape[2]
    ct = c * t
    assert c == IN_CHANNELS
    assert w_big.shape == (ct, PAD_OUT)

    # Squeeze 1x1 spatial dims + flatten (C, T): contiguous reshape of the
    # NCDHW tensor -> no HBM transpose, no copy, no dtype cast.
    x_flat = x_ncdhw.reshape(n, ct)

    vmem_limit, x_tile_target, w_block_cap = _chip_budget()
    x_item = x_flat.dtype.itemsize
    w_item = w_big.dtype.itemsize

    # K (= C*T) tiling: keep the streamed weight block <= ~4 MiB per buffer.
    # For T <= 16 (bf16 weight) this is a single K step; large T (long clips)
    # splits the contraction so the weight can never blow v7x's VMEM.
    block_k = ct
    while block_k * PAD_OUT * w_item > w_block_cap and block_k % 256 == 0:
        block_k //= 2
    grid_k = ct // block_k

    # N tiling: target ~x_tile_target bytes per streamed tile, multiple of 8.
    block_n = max(8, (x_tile_target // (block_k * x_item)) // 8 * 8)
    if n > 8:
        # Cap at ~ceil(n/2) rows so grid_n >= 2 and both v7x TCs get a tile.
        half = (n + 1) // 2
        block_n = min(block_n, ((half + 7) // 8) * 8)
    if n <= block_n:
        block_n = n                       # full-dim block satisfies (8,128) rule
    grid_n = pl.cdiv(n, block_n)

    out = pl.pallas_call(
        vspp_head_kernel,
        out_shape=jax.ShapeDtypeStruct((n, PAD_OUT), jnp.float32),
        grid=(grid_n, grid_k),
        in_specs=[
            # Streamed x tile (double-buffered by the pipeline).
            pl.BlockSpec((block_n, block_k), lambda i, k: (i, k)),
            # Fused weight block: constant index along i, so it is only
            # re-fetched when k changes (once per core per call when grid_k=1).
            pl.BlockSpec((block_k, PAD_OUT), lambda i, k: (k, 0)),
        ],
        out_specs=pl.BlockSpec((block_n, PAD_OUT), lambda i, k: (i, 0)),
        scratch_shapes=[pltpu.VMEM((block_n, PAD_OUT), jnp.float32)],
        compiler_params=pltpu.CompilerParams(
            dimension_semantics=("parallel", "arbitrary"),
            vmem_limit_bytes=vmem_limit,
        ),
    )(x_flat, w_big)

    # Bias add + slicing on the tiny (N, 128) result are free in the wrapper
    # (bias is constant over time, so adding it after the mean is exact).
    l_p = out[:, :NUM_CLASSES_P] + jnp.asarray(b_p, jnp.float32)
    l_s = out[:, NUM_CLASSES_P:NUM_CLASSES_P + NUM_CLASSES_S] + jnp.asarray(
        b_s, jnp.float32)
    return l_p, l_s


if __name__ == "__main__":
    # Small, deterministic example: batch=2, T=8 temporal steps, 1024 channels
    # (channel count fixed by the module: Unit3Dpy(in_channels=1024, ...)).
    N, T = 2, 8
    key = jax.random.PRNGKey(0)
    kx, kwp, kbp, kws, kbs = jax.random.split(key, 5)

    x = jax.random.normal(kx, (N, IN_CHANNELS, T, 1, 1), dtype=jnp.float32)

    # Torch conv weight shape (out, in, 1, 1, 1) with kernel dims squeezed.
    w_p = jax.random.normal(kwp, (NUM_CLASSES_P, IN_CHANNELS), jnp.float32) * 0.02
    b_p = jax.random.normal(kbp, (NUM_CLASSES_P,), jnp.float32) * 0.02
    w_s = jax.random.normal(kws, (NUM_CLASSES_S, IN_CHANNELS), jnp.float32) * 0.02
    b_s = jax.random.normal(kbs, (NUM_CLASSES_S,), jnp.float32) * 0.02

    # Fused head weights are built ONCE (frozen params) and reused per call.
    w_big_f32 = make_fused_weight(w_p, w_s, T, dtype=jnp.float32)    # parity path
    w_big_bf16 = make_fused_weight(w_p, w_s, T, dtype=jnp.bfloat16)  # perf path

    # Pure-JAX reference: per-timestep 1x1x1 conv + bias, then temporal mean.
    x_sq = x[:, :, :, 0, 0]                                   # (N, C, T)
    ref_p = jnp.mean(jnp.einsum("nct,pc->ntp", x_sq, w_p) + b_p, axis=1)
    ref_s = jnp.mean(jnp.einsum("nct,sc->nts", x_sq, w_s) + b_s, axis=1)

    # 1) f32 parity path (matches the fp32 PyTorch reference).
    l_p, l_s = vspp_head(x, w_big_f32, b_p, b_s)
    jax.block_until_ready((l_p, l_s))
    assert l_p.shape == (N, NUM_CLASSES_P) and l_s.shape == (N, NUM_CLASSES_S)
    assert jnp.allclose(l_p, ref_p, rtol=1e-4, atol=1e-4), "logits_p mismatch (f32)"
    assert jnp.allclose(l_s, ref_s, rtol=1e-4, atol=1e-4), "logits_s mismatch (f32)"

    # 2) bf16-MXU perf path (in-kernel cast, f32 accumulation over K=C*T=8192):
    #    looser tolerance is expected and acceptable for a 9-logit head.
    l_p16, l_s16 = vspp_head(x, w_big_bf16, b_p, b_s)
    jax.block_until_ready((l_p16, l_s16))
    assert jnp.allclose(l_p16, ref_p, rtol=2e-2, atol=2e-2), "logits_p mismatch (bf16)"
    assert jnp.allclose(l_s16, ref_s, rtol=2e-2, atol=2e-2), "logits_s mismatch (bf16)"

    print("KERNEL_OK")
</pallas_src>

<mosaic_0001>
module attributes {stable_mosaic.version = 11 : i64} {
  func.func @vspp_head_kernel(%arg0: i32, %arg1: i32, %arg2: memref<2x8192xf32, #tpu.memory_space<vmem>>, %arg3: memref<8192x128xf32, #tpu.memory_space<vmem>>, %arg4: memref<2x128xf32, #tpu.memory_space<vmem>>, %arg5: memref<2x128xf32, #tpu.memory_space<vmem>>) attributes {dimension_semantics = [#tpu.dimension_semantics<parallel>, #tpu.dimension_semantics<arbitrary>], iteration_bounds = array<i64: 1, 1>, scalar_prefetch = 0 : i64, scratch_operands = 1 : i64, tpu.core_type = #tpu.core_type<tc>, window_params = [{transform_indices = @transform_0, window_bounds = array<i64: 2, 8192>}, {transform_indices = @transform_1, window_bounds = array<i64: 8192, 128>}, {transform_indices = @transform_2, window_bounds = array<i64: 2, 128>}]} {
    %c0_i32 = arith.constant 0 : i32
    %0 = arith.cmpi eq, %arg1, %c0_i32 : i32
    %1 = arith.extui %0 : i1 to i32
    %c0_i32_0 = arith.constant 0 : i32
    %2 = arith.cmpi ne, %1, %c0_i32_0 : i32
    scf.if %2 {
      %cst_10 = arith.constant 0.000000e+00 : f32
      %12 = vector.broadcast %cst_10 : f32 to vector<2x128xf32>
      %c0_11 = arith.constant 0 : index
      %c0_12 = arith.constant 0 : index
      %13 = vector.load %arg5[%c0_11, %c0_12] : memref<2x128xf32, #tpu.memory_space<vmem>>, vector<2x128xf32>
      tpu.vector_store %arg5[%c0_11, %c0_12], %12 {strides = array<i32>} : memref<2x128xf32, #tpu.memory_space<vmem>>, vector<2x128xf32>,
    } else {
    }
    %c0 = arith.constant 0 : index
    %c0_1 = arith.constant 0 : index
    %3 = vector.load %arg5[%c0, %c0_1] : memref<2x128xf32, #tpu.memory_space<vmem>>, vector<2x128xf32>
    %c0_2 = arith.constant 0 : index
    %c0_3 = arith.constant 0 : index
    %4 = vector.load %arg2[%c0_2, %c0_3] : memref<2x8192xf32, #tpu.memory_space<vmem>>, vector<2x8192xf32>
    %c0_4 = arith.constant 0 : index
    %c0_5 = arith.constant 0 : index
    %5 = vector.load %arg3[%c0_4, %c0_5] : memref<8192x128xf32, #tpu.memory_space<vmem>>, vector<8192x128xf32>
    %cst = arith.constant dense<0.000000e+00> : vector<2x128xf32>
    %6 = tpu.matmul %4, %5, %cst {dimension_numbers = #tpu.dot_dimension_numbers<[1], [0], [0], [1], [0, 0, 1, 1], [], []>} : vector<2x8192xf32>, vector<8192x128xf32>, vector<2x128xf32> -> vector<2x128xf32>
    %7 = arith.addf %3, %6 : vector<2x128xf32>
    %c0_6 = arith.constant 0 : index
    %c0_7 = arith.constant 0 : index
    %8 = vector.load %arg5[%c0_6, %c0_7] : memref<2x128xf32, #tpu.memory_space<vmem>>, vector<2x128xf32>
    tpu.vector_store %arg5[%c0_6, %c0_7], %7 {strides = array<i32>} : memref<2x128xf32, #tpu.memory_space<vmem>>, vector<2x128xf32>,
    %c0_i32_8 = arith.constant 0 : i32
    %9 = arith.cmpi eq, %arg1, %c0_i32_8 : i32
    %10 = arith.extui %9 : i1 to i32
    %c0_i32_9 = arith.constant 0 : i32
    %11 = arith.cmpi ne, %10, %c0_i32_9 : i32
    scf.if %11 {
      %c0_10 = arith.constant 0 : index
      %c0_11 = arith.constant 0 : index
      %12 = vector.load %arg5[%c0_10, %c0_11] : memref<2x128xf32, #tpu.memory_space<vmem>>, vector<2x128xf32>
      %c0_12 = arith.constant 0 : index
      %c0_13 = arith.constant 0 : index
      %13 = vector.load %arg4[%c0_12, %c0_13] : memref<2x128xf32, #tpu.memory_space<vmem>>, vector<2x128xf32>
      tpu.vector_store %arg4[%c0_12, %c0_13], %12 {strides = array<i32>} : memref<2x128xf32, #tpu.memory_space<vmem>>, vector<2x128xf32>,
    } else {
    }
    return
  }
  func.func @transform_0(%arg0: i32, %arg1: i32) -> (i32, i32) {
    %c0_i32 = arith.constant 0 : i32
    return %arg0, %arg1 : i32, i32
  }
  func.func @transform_1(%arg0: i32, %arg1: i32) -> (i32, i32) {
    %c0_i32 = arith.constant 0 : i32
    %c0_i32_0 = arith.constant 0 : i32
    return %arg1, %c0_i32 : i32, i32
  }
  func.func @transform_2(%arg0: i32, %arg1: i32) -> (i32, i32) {
    %c0_i32 = arith.constant 0 : i32
    %c0_i32_0 = arith.constant 0 : i32
    return %arg0, %c0_i32 : i32, i32
  }
}

</mosaic_0001>

<bundles_post_ra>
// kernel: vspp_head.1
= control target key start
LH: loop header
LB: loop body
LE: loop exit
PB: predicated region body
PF: predicated region fallthrough
CT: control target
= control target key end

     0   :  { %7 = vsyncpa [#allocation4], 0  ;;  %s5864_s9 = smov [#allocation3]   ;;  %s6155_s0 = inlined_call_operand.vmem [shape: f32[2,8192], index: 0, kind: input, shape index: {}]   ;;  %s6156_s1 = inlined_call_operand.hbm [shape: f32[8192,128], index: 1, kind: input, shape index: {}]   ;;  %s6157_s2 = inlined_call_operand.vmem [shape: f32[2,128], index: 2, kind: output, shape index: {}]  }
   0x1   :  { %s15_s10 = sshll.u32 %s5864_s9, 4  ;;  %s5840_s13 = scalar_lea.hbm %s6156_s1, 131072  ;;  %s16_s10 = int_to_ptr.vmem [resolvable:$true] %s15_s10 }
   0x2   :  { %p5841_p0 = scmp.ne.s32.totalorder %s6156_s1, %s5840_s13  ;;  %p5844_p1 = scmp.lt.u32.totalorder %s5840_s13, %s6156_s1 }
   0x4   :  { %p5846_p2 = pnand %p5844_p1, %p5841_p0 }
   0x6   :  { %5849 = shalt.err (!%p5846_p2)
}
   0x7   :  { %s5850_s18 = scalar_lea.vmem %s16_s10, 131072  ;;  %p5855_p4 = scmp.lt.s32.totalorder %s16_s10, %s16_s10 }
   0x8   :  { %p5851_p3 = scmp.ne.s32.totalorder %s16_s10, %s5850_s18  ;;  %p5856_p5 = scmp.lt.s32.totalorder %s5850_s18, %s5850_s18 }
   0xa   :  { %p5857_p6 = por %p5856_p5, %p5855_p4 }
   0xc   :  { %p5858_p7 = pnand %p5857_p6, %p5851_p3 }
   0xe   :  { %5861 = shalt.err (!%p5858_p7)
}
   0xf   :  { %s5865_s19 = smov 128   ;;  %s5866_s20 = smov 8  }
  0x10   :  { %21 = dma.hbm_to_vmem [thread:$0]  %s6156_s1, 131072, %s16_s10, [#allocation4], %s5865_s19, %s5865_s19, %s5866_s20  }
  0x11   :  { %5862 = dma.done.wait [#allocation4], 131072  }
  0x12   :  { %5863 = vsyncadd [#allocation4], 4294836224  ;;  %v63_v0 = vld [vmem:[#allocation3 + $0x80] sm:$0xff]  ;;  %v64_v1 = vld [vmem:[#allocation3 + $0x88] sm:$0xff]  ;;  %v5867_v47 = vmov 1983009808   ;;  %v1091_v49 = vlaneseq }
  0x13   :  { %v95_v2 = vld [vmem:[#allocation3 + $0x180] sm:$0xff]  ;;  %v4795_v3 = vpack.c.bf16 %v64_v1, %v63_v0  ;;  %v96_v4 = vld [vmem:[#allocation3 + $0x188] sm:$0xff]  ;;  %v65_v11 = vld [vmem:[#allocation3 + $0x90] sm:$0xff]  ;;  %v1089_v48 = vunpack.c.l.s4 %v5867_v47 }
  0x14   :  { %v47_v5 = vld [vmem:[#allocation3] sm:$0xff]  ;;  %v48_v6 = vld [vmem:[#allocation3 + $0x8] sm:$0xff]  ;;  %v4827_v7 = vpack.c.bf16 %v96_v4, %v95_v2  ;;  %v66_v13 = vld [vmem:[#allocation3 + $0x98] sm:$0xff]  ;;  %v1092_v0 = vshrl.u32 %v1091_v49, 7 }
  0x15   :  { %v4797_v8 = vpack.c.bf16 %v48_v6, %v47_v5  ;;  %v79_v9 = vld [vmem:[#allocation3 + $0x100] sm:$0xff]  ;;  %v80_v10 = vld [vmem:[#allocation3 + $0x108] sm:$0xff]  ;;  %4796 = vmatprep.subr.bf16.mxu0 %v4795_v3  ;;  %v97_v14 = vld [vmem:[#allocation3 + $0x190] sm:$0xff]  ;;  %v4799_v16 = vpack.c.bf16 %v66_v13, %v65_v11  ;;  %v1090_v63 = vunpack.c.0.s8 %v1089_v48 }
  0x16   :  { %v4829_v12 = vpack.c.bf16 %v80_v10, %v79_v9  ;;  %v98_v15 = vld [vmem:[#allocation3 + $0x198] sm:$0xff]  ;;  %4828 = vmatprep.subr.bf16.mxu1 %v4827_v7  ;;  %v49_v18 = vld [vmem:[#allocation3 + $0x10] sm:$0xff]  ;;  %v67_v23 = vld [vmem:[#allocation3 + $0xa0] sm:$0xff] }
  0x17   :  { %4798 = vmatpush3.bf16.msra.mxu0 %v4797_v8  ;;  %v4831_v17 = vpack.c.bf16 %v98_v15, %v97_v14  ;;  %v50_v19 = vld [vmem:[#allocation3 + $0x18] sm:$0xff]  ;;  %v81_v20 = vld [vmem:[#allocation3 + $0x110] sm:$0xff]  ;;  %v68_v24 = vld [vmem:[#allocation3 + $0xa8] sm:$0xff]  ;;  %v5896_v13 = vsub.s32 %v1090_v63, %v1092_v0 }
  0x18   :  { %4830 = vmatpush3.bf16.msra.mxu1 %v4829_v12  ;;  %v4801_v21 = vpack.c.bf16 %v50_v19, %v49_v18  ;;  %v82_v22 = vld [vmem:[#allocation3 + $0x118] sm:$0xff]  ;;  %4800 = vmatprep.subr.bf16.mxu0 %v4799_v16  ;;  %v4803_v26 = vpack.c.bf16 %v68_v24, %v67_v23  ;;  %v99_v27 = vld [vmem:[#allocation3 + $0x1a0] sm:$0xff]  ;;  %v100_v28 = vld [vmem:[#allocation3 + $0x1a8] sm:$0xff] }
  0x19   :  { %4832 = vmatprep.subr.bf16.mxu1 %v4831_v17  ;;  %v4833_v25 = vpack.c.bf16 %v82_v22, %v81_v20  ;;  %v51_v29 = vld [vmem:[#allocation3 + $0x20] sm:$0xff]  ;;  %v4835_v30 = vpack.c.bf16 %v100_v28, %v99_v27  ;;  %v52_v31 = vld [vmem:[#allocation3 + $0x28] sm:$0xff]  ;;  %v69_v35 = vld [vmem:[#allocation3 + $0xb0] sm:$0xff] }
  0x1a   :  { %v83_v32 = vld [vmem:[#allocation3 + $0x120] sm:$0xff]  ;;  %v84_v33 = vld [vmem:[#allocation3 + $0x128] sm:$0xff]  ;;  %v4805_v34 = vpack.c.bf16 %v52_v31, %v51_v29  ;;  %v70_v36 = vld [vmem:[#allocation3 + $0xb8] sm:$0xff] }
  0x1b   :  { %4802 = vmatpush3.bf16.msra.mxu0 %v4801_v21  ;;  %v101_v37 = vld [vmem:[#allocation3 + $0x1b0] sm:$0xff]  ;;  %v4837_v38 = vpack.c.bf16 %v84_v33, %v83_v32  ;;  %v4807_v39 = vpack.c.bf16 %v70_v36, %v69_v35  ;;  %v102_v40 = vld [vmem:[#allocation3 + $0x1b8] sm:$0xff]  ;;  %v71_v46 = vld [vmem:[#allocation3 + $0xc0] sm:$0xff] }
  0x1c   :  { %4834 = vmatpush3.bf16.msra.mxu1 %v4833_v25  ;;  %4804 = vmatprep.subr.bf16.mxu0 %v4803_v26  ;;  %v53_v41 = vld [vmem:[#allocation3 + $0x30] sm:$0xff]  ;;  %v54_v42 = vld [vmem:[#allocation3 + $0x38] sm:$0xff]  ;;  %v4839_v43 = vpack.c.bf16 %v102_v40, %v101_v37  ;;  %v72_v50 = vld [vmem:[#allocation3 + $0xc8] sm:$0xff] }
  0x1d   :  { %4836 = vmatprep.subr.bf16.mxu1 %v4835_v30  ;;  %v85_v44 = vld [vmem:[#allocation3 + $0x130] sm:$0xff]  ;;  %v86_v45 = vld [vmem:[#allocation3 + $0x138] sm:$0xff]  ;;  %v103_v51 = vld [vmem:[#allocation3 + $0x1c0] sm:$0xff]  ;;  %v4809_v53 = vpack.c.bf16 %v54_v42, %v53_v41  ;;  %v4811_v55 = vpack.c.bf16 %v72_v50, %v71_v46 }
  0x1e   :  { %v104_v52 = vld [vmem:[#allocation3 + $0x1c8] sm:$0xff]  ;;  %v4841_v54 = vpack.c.bf16 %v86_v45, %v85_v44  ;;  %v55_v56 = vld [vmem:[#allocation3 + $0x40] sm:$0xff]  ;;  %v73_v61 = vld [vmem:[#allocation3 + $0xd0] sm:$0xff] }
  0x1f   :  { %4806 = vmatpush3.bf16.msra.mxu0 %v4805_v34  ;;  %v56_v57 = vld [vmem:[#allocation3 + $0x48] sm:$0xff]  ;;  %v87_v58 = vld [vmem:[#allocation3 + $0x140] sm:$0xff]  ;;  %v4843_v59 = vpack.c.bf16 %v104_v52, %v103_v51  ;;  %v74_v62 = vld [vmem:[#allocation3 + $0xd8] sm:$0xff] }
  0x20   :  { %4838 = vmatpush3.bf16.msra.mxu1 %v4837_v38  ;;  %4808 = vmatprep.subr.bf16.mxu0 %v4807_v39  ;;  %v88_v60 = vld [vmem:[#allocation3 + $0x148] sm:$0xff]  ;;  %v105_v1 = vld [vmem:[#allocation3 + $0x1d0] sm:$0xff]  ;;  %v106_v2 = vld [vmem:[#allocation3 + $0x1d8] sm:$0xff]  ;;  %v4813_v3 = vpack.c.bf16 %v56_v57, %v55_v56  ;;  %v4815_v5 = vpack.c.bf16 %v74_v62, %v73_v61 }
  0x21   :  { %4840 = vmatprep.subr.bf16.mxu1 %v4839_v43  ;;  %v4845_v4 = vpack.c.bf16 %v88_v60, %v87_v58  ;;  %v57_v6 = vld [vmem:[#allocation3 + $0x50] sm:$0xff]  ;;  %v58_v7 = vld [vmem:[#allocation3 + $0x58] sm:$0xff]  ;;  %v4847_v9 = vpack.c.bf16 %v106_v2, %v105_v1  ;;  %v75_v11 = vld [vmem:[#allocation3 + $0xe0] sm:$0xff] }
  0x22   :  { %v89_v8 = vld [vmem:[#allocation3 + $0x150] sm:$0xff]  ;;  %v90_v10 = vld [vmem:[#allocation3 + $0x158] sm:$0xff]  ;;  %v76_v12 = vld [vmem:[#allocation3 + $0xe8] sm:$0xff]  ;;  %v4817_v16 = vpack.c.bf16 %v58_v7, %v57_v6 }
  0x23   :  { %4810 = vmatpush3.bf16.msra.mxu0 %v4809_v53  ;;  %v107_v14 = vld [vmem:[#allocation3 + $0x1e0] sm:$0xff]  ;;  %v108_v15 = vld [vmem:[#allocation3 + $0x1e8] sm:$0xff]  ;;  %v4849_v18 = vpack.c.bf16 %v90_v10, %v89_v8  ;;  %v4819_v19 = vpack.c.bf16 %v76_v12, %v75_v11  ;;  %v77_v25 = vld [vmem:[#allocation3 + $0xf0] sm:$0xff] }
  0x24   :  { %4842 = vmatpush3.bf16.msra.mxu1 %v4841_v54  ;;  %4812 = vmatprep.subr.bf16.mxu0 %v4811_v55  ;;  %v59_v17 = vld [vmem:[#allocation3 + $0x60] sm:$0xff]  ;;  %v60_v20 = vld [vmem:[#allocation3 + $0x68] sm:$0xff]  ;;  %v4851_v23 = vpack.c.bf16 %v108_v15, %v107_v14  ;;  %v78_v26 = vld [vmem:[#allocation3 + $0xf8] sm:$0xff] }
  0x25   :  { %4844 = vmatprep.subr.bf16.mxu1 %v4843_v59  ;;  %v91_v21 = vld [vmem:[#allocation3 + $0x160] sm:$0xff]  ;;  %v92_v24 = vld [vmem:[#allocation3 + $0x168] sm:$0xff]  ;;  %v109_v29 = vld [vmem:[#allocation3 + $0x1f0] sm:$0xff]  ;;  %v4821_v31 = vpack.c.bf16 %v60_v20, %v59_v17  ;;  %v4823_v35 = vpack.c.bf16 %v78_v26, %v77_v25 }
  0x26   :  { %v31_v22 = vld [vmem:[%s6155_s0] sm:$0xff]  ;;  %v4853_v34 = vpack.c.bf16 %v92_v24, %v91_v21  ;;  %v61_v36 = vld [vmem:[#allocation3 + $0x70] sm:$0xff]  ;;  %v128_v43 = vld [vmem:[#allocation3 + $0x288] sm:$0xff] }
  0x27   :  { %4814 = vmatpush3.bf16.msra.mxu0 %v4813_v3  ;;  %v1094_v27 = vrot.slane %v31_v22, %v5896_v13  ;;  %v1087_v28 = vcombine.high %v31_v22, %v31_v22  ;;  %v110_v30 = vld [vmem:[#allocation3 + $0x1f8] sm:$0xff]  ;;  %v93_v38 = vld [vmem:[#allocation3 + $0x170] sm:$0xff]  ;;  %v127_v42 = vld [vmem:[#allocation3 + $0x280] sm:$0xff] }
  0x28   :  { %4846 = vmatpush3.bf16.msra.mxu1 %v4845_v4  ;;  %4816 = vmatprep.subr.bf16.mxu0 %v4815_v5  ;;  %v62_v37 = vld [vmem:[#allocation3 + $0x78] sm:$0xff]  ;;  %v4855_v39 = vpack.c.bf16 %v110_v30, %v109_v29  ;;  %v159_v44 = vld [vmem:[#allocation3 + $0x380] sm:$0xff]  ;;  %v160_v45 = vld [vmem:[#allocation3 + $0x388] sm:$0xff]  ;;  %v4859_v48 = vpack.c.bf16 %v128_v43, %v127_v42 }
  0x29   :  { %4848 = vmatprep.subr.bf16.mxu1 %v4847_v9  ;;  %v1102_v32 = vcombine.high %v1094_v27, %v1094_v27  ;;  %v1101_v33 = vrot.slane %v1087_v28, %v5896_v13  ;;  %v94_v40 = vld [vmem:[#allocation3 + $0x178] sm:$0xff]  ;;  %v4825_v46 = vpack.c.bf16 %v62_v37, %v61_v36  ;;  %v111_v49 = vld [vmem:[#allocation3 + $0x200] sm:$0xff]  ;;  %v112_v50 = vld [vmem:[#allocation3 + $0x208] sm:$0xff]  ;;  %v4891_v52 = vpack.c.bf16 %v160_v45, %v159_v44 }
  0x2a   :  { %v4857_v47 = vpack.c.bf16 %v94_v40, %v93_v38  ;;  %v143_v51 = vld [vmem:[#allocation3 + $0x300] sm:$0xff]  ;;  %v144_v53 = vld [vmem:[#allocation3 + $0x308] sm:$0xff]  ;;  %v129_v54 = vld [vmem:[#allocation3 + $0x290] sm:$0xff]  ;;  %v4861_v58 = vpack.c.bf16 %v112_v50, %v111_v49 }
  0x2b   :  { %4818 = vmatpush3.bf16.msra.mxu0 %v4817_v16  ;;  %1487 = vmatprep.mubr.f32.mxu0 %v1102_v32  ;;  %v1103_v41 = vcombine.high %v1101_v33, %v1101_v33  ;;  %v130_v55 = vld [vmem:[#allocation3 + $0x298] sm:$0xff]  ;;  %v161_v56 = vld [vmem:[#allocation3 + $0x390] sm:$0xff]  ;;  %v4893_v59 = vpack.c.bf16 %v144_v53, %v143_v51  ;;  %v131_v2 = vld [vmem:[#allocation3 + $0x2a0] sm:$0xff] }
  0x2c   :  { %4850 = vmatpush3.bf16.msra.mxu1 %v4849_v18  ;;  %4820 = vmatprep.subr.bf16.mxu0 %v4819_v19  ;;  %v162_v57 = vld [vmem:[#allocation3 + $0x398] sm:$0xff]  ;;  %v4863_v60 = vpack.c.bf16 %v130_v55, %v129_v54  ;;  %v113_v61 = vld [vmem:[#allocation3 + $0x210] sm:$0xff]  ;;  %v132_v3 = vld [vmem:[#allocation3 + $0x2a8] sm:$0xff] }
  0x2d   :  { %4852 = vmatprep.subr.bf16.mxu1 %v4851_v23  ;;  %1557 = vmatprep.mubr.f32.mxu1 %v1103_v41  ;;  %v114_v62 = vld [vmem:[#allocation3 + $0x218] sm:$0xff]  ;;  %v145_v63 = vld [vmem:[#allocation3 + $0x310] sm:$0xff]  ;;  %v4895_v0 = vpack.c.bf16 %v162_v57, %v161_v56  ;;  %v163_v4 = vld [vmem:[#allocation3 + $0x3a0] sm:$0xff]  ;;  %v4867_v8 = vpack.c.bf16 %v132_v3, %v131_v2 }
  0x2e   :  { %v146_v1 = vld [vmem:[#allocation3 + $0x318] sm:$0xff]  ;;  %v164_v5 = vld [vmem:[#allocation3 + $0x3a8] sm:$0xff]  ;;  %v4865_v6 = vpack.c.bf16 %v114_v62, %v113_v61  ;;  %v115_v9 = vld [vmem:[#allocation3 + $0x220] sm:$0xff] }
  0x2f   :  { %4822 = vmatpush3.bf16.msra.mxu0 %v4821_v31  ;;  %v4897_v7 = vpack.c.bf16 %v146_v1, %v145_v63  ;;  %v116_v10 = vld [vmem:[#allocation3 + $0x228] sm:$0xff]  ;;  %v147_v11 = vld [vmem:[#allocation3 + $0x320] sm:$0xff]  ;;  %v4899_v12 = vpack.c.bf16 %v164_v5, %v163_v4  ;;  %v133_v15 = vld [vmem:[#allocation3 + $0x2b0] sm:$0xff] }
  0x30   :  { %4854 = vmatpush3.bf16.msra.mxu1 %v4853_v34  ;;  %4824 = vmatprep.subr.bf16.mxu0 %v4823_v35  ;;  %v148_v14 = vld [vmem:[#allocation3 + $0x328] sm:$0xff]  ;;  %v134_v16 = vld [vmem:[#allocation3 + $0x2b8] sm:$0xff]  ;;  %v165_v17 = vld [vmem:[#allocation3 + $0x3b0] sm:$0xff]  ;;  %v4869_v19 = vpack.c.bf16 %v116_v10, %v115_v9 }
  0x31   :  { %4856 = vmatprep.subr.bf16.mxu1 %v4855_v39  ;;  %v166_v18 = vld [vmem:[#allocation3 + $0x3b8] sm:$0xff]  ;;  %v4901_v20 = vpack.c.bf16 %v148_v14, %v147_v11  ;;  %v4871_v21 = vpack.c.bf16 %v134_v16, %v133_v15  ;;  %v117_v22 = vld [vmem:[#allocation3 + $0x230] sm:$0xff]  ;;  %v136_v28 = vld [vmem:[#allocation3 + $0x2c8] sm:$0xff] }
  0x32   :  { %v118_v23 = vld [vmem:[#allocation3 + $0x238] sm:$0xff]  ;;  %v149_v24 = vld [vmem:[#allocation3 + $0x330] sm:$0xff]  ;;  %v4903_v25 = vpack.c.bf16 %v166_v18, %v165_v17  ;;  %v167_v29 = vld [vmem:[#allocation3 + $0x3c0] sm:$0xff] }
  0x33   :  { %4826 = vmatpush3.bf16.msra.mxu0 %v4825_v46  ;;  %v150_v26 = vld [vmem:[#allocation3 + $0x338] sm:$0xff]  ;;  %v168_v30 = vld [vmem:[#allocation3 + $0x3c8] sm:$0xff]  ;;  %v4873_v32 = vpack.c.bf16 %v118_v23, %v117_v22  ;;  %v119_v37 = vld [vmem:[#allocation3 + $0x240] sm:$0xff] }
  0x34   :  { %4858 = vmatpush3.bf16.msra.mxu1 %v4857_v47  ;;  %4860 = vmatprep.subr.bf16.mxu0 %v4859_v48  ;;  %v32_v31 = vld [vmem:[%s6155_s0 + $0x8] sm:$0xff]  ;;  %v4905_v35 = vpack.c.bf16 %v150_v26, %v149_v24  ;;  %v4907_v40 = vpack.c.bf16 %v168_v30, %v167_v29  ;;  %v137_v42 = vld [vmem:[#allocation3 + $0x2d0] sm:$0xff]  ;;  %v138_v43 = vld [vmem:[#allocation3 + $0x2d8] sm:$0xff] }
  0x35   :  { %4892 = vmatprep.subr.bf16.mxu1 %v4891_v52  ;;  %v1104_v34 = vcombine.high %v32_v31, %v32_v31  ;;  %v120_v38 = vld [vmem:[#allocation3 + $0x248] sm:$0xff]  ;;  %v151_v39 = vld [vmem:[#allocation3 + $0x340] sm:$0xff]  ;;  %v169_v46 = vld [vmem:[#allocation3 + $0x3d0] sm:$0xff]  ;;  %v4879_v51 = vpack.c.bf16 %v138_v43, %v137_v42 }
  0x36   :  { %1488 = vmatmul.mubr.f32.vlgmr.msra.gmra.mrb[0].mxu0 %v1094_v27  ;;  %v135_v27 = vld [vmem:[#allocation3 + $0x2c0] sm:$0xff]  ;;  %v152_v41 = vld [vmem:[#allocation3 + $0x348] sm:$0xff]  ;;  %v170_v47 = vld [vmem:[#allocation3 + $0x3d8] sm:$0xff]  ;;  %v4877_v48 = vpack.c.bf16 %v120_v38, %v119_v37 }
  0x37   :  { %1558 = vmatmul.mubr.f32.vlgmr.msra.gmra.mrb[0].mxu1 %v1101_v33  ;;  %4862 = vmatpush3.bf16.msra.mxu0 %v4861_v58  ;;  %v5907_v33 = vrot.slane %v32_v31, %v5896_v13  ;;  %v4875_v36 = vpack.c.bf16 %v136_v28, %v135_v27  ;;  %v5912_v45 = vrot.slane %v1104_v34, %v5896_v13  ;;  %v121_v52 = vld [vmem:[#allocation3 + $0x250] sm:$0xff]  ;;  %v122_v53 = vld [vmem:[#allocation3 + $0x258] sm:$0xff]  ;;  %v139_v57 = vld [vmem:[#allocation3 + $0x2e0] sm:$0xff] }
  0x38   :  { %4894 = vmatpush3.bf16.msra.mxu1 %v4893_v59  ;;  %4864 = vmatprep.subr.bf16.mxu0 %v4863_v60  ;;  %v4909_v50 = vpack.c.bf16 %v152_v41, %v151_v39  ;;  %v153_v54 = vld [vmem:[#allocation3 + $0x350] sm:$0xff]  ;;  %v4911_v55 = vpack.c.bf16 %v170_v47, %v169_v46  ;;  %v154_v56 = vld [vmem:[#allocation3 + $0x358] sm:$0xff]  ;;  %v140_v58 = vld [vmem:[#allocation3 + $0x2e8] sm:$0xff]  ;;  %v4881_v61 = vpack.c.bf16 %v122_v53, %v121_v52 }
  0x39   :  { %4896 = vmatprep.subr.bf16.mxu1 %v4895_v0  ;;  %v1119_v44 = vcombine.high %v5907_v33, %v5907_v33  ;;  %v1120_v49 = vcombine.high %v5912_v45, %v5912_v45  ;;  %v171_v59 = vld [vmem:[#allocation3 + $0x3e0] sm:$0xff]  ;;  %v172_v60 = vld [vmem:[#allocation3 + $0x3e8] sm:$0xff]  ;;  %v4913_v62 = vpack.c.bf16 %v154_v56, %v153_v54  ;;  %v4883_v63 = vpack.c.bf16 %v140_v58, %v139_v57  ;;  %v141_v5 = vld [vmem:[#allocation3 + $0x2f0] sm:$0xff] }
  0x3a   :  { %v123_v0 = vld [vmem:[#allocation3 + $0x260] sm:$0xff]  ;;  %v124_v1 = vld [vmem:[#allocation3 + $0x268] sm:$0xff]  ;;  %v4915_v3 = vpack.c.bf16 %v172_v60, %v171_v59  ;;  %v126_v14 = vld [vmem:[#allocation3 + $0x278] sm:$0xff] }
  0x3b   :  { %4866 = vmatpush3.bf16.msra.mxu0 %v4865_v6  ;;  %1627 = vmatprep.mubr.f32.mxu0 %v1119_v44  ;;  %v155_v2 = vld [vmem:[#allocation3 + $0x360] sm:$0xff]  ;;  %v156_v4 = vld [vmem:[#allocation3 + $0x368] sm:$0xff]  ;;  %v142_v6 = vld [vmem:[#allocation3 + $0x2f8] sm:$0xff]  ;;  %v4885_v9 = vpack.c.bf16 %v124_v1, %v123_v0 }
  0x3c   :  { %4898 = vmatpush3.bf16.msra.mxu1 %v4897_v7  ;;  %4868 = vmatprep.subr.bf16.mxu0 %v4867_v8  ;;  %v173_v7 = vld [vmem:[#allocation3 + $0x3f0] sm:$0xff]  ;;  %v174_v8 = vld [vmem:[#allocation3 + $0x3f8] sm:$0xff]  ;;  %v4917_v10 = vpack.c.bf16 %v156_v4, %v155_v2  ;;  %v4887_v11 = vpack.c.bf16 %v142_v6, %v141_v5  ;;  %v191_v18 = vld [vmem:[#allocation3 + $0x480] sm:$0xff] }
  0x3d   :  { %4900 = vmatprep.subr.bf16.mxu1 %v4899_v12  ;;  %1697 = vmatprep.mubr.f32.mxu1 %v1120_v49  ;;  %v125_v12 = vld [vmem:[#allocation3 + $0x270] sm:$0xff]  ;;  %v4919_v16 = vpack.c.bf16 %v174_v8, %v173_v7  ;;  %v158_v17 = vld [vmem:[#allocation3 + $0x378] sm:$0xff]  ;;  %v175_v23 = vld [vmem:[#allocation3 + $0x400] sm:$0xff] }
  0x3e   :  { %v157_v15 = vld [vmem:[#allocation3 + $0x370] sm:$0xff]  ;;  %v4889_v22 = vpack.c.bf16 %v126_v14, %v125_v12  ;;  %v176_v26 = vld [vmem:[#allocation3 + $0x408] sm:$0xff]  ;;  %v207_v27 = vld [vmem:[#allocation3 + $0x500] sm:$0xff] }
  0x3f   :  { %4870 = vmatpush3.bf16.msra.mxu0 %v4869_v19  ;;  %v192_v19 = vld [vmem:[#allocation3 + $0x488] sm:$0xff]  ;;  %v4921_v24 = vpack.c.bf16 %v158_v17, %v157_v15  ;;  %v193_v30 = vld [vmem:[#allocation3 + $0x490] sm:$0xff]  ;;  %v194_v31 = vld [vmem:[#allocation3 + $0x498] sm:$0xff] }
  0x40   :  { %4902 = vmatpush3.bf16.msra.mxu1 %v4901_v20  ;;  %4872 = vmatprep.subr.bf16.mxu0 %v4871_v21  ;;  %v223_v20 = vld [vmem:[#allocation3 + $0x580] sm:$0xff]  ;;  %v224_v21 = vld [vmem:[#allocation3 + $0x588] sm:$0xff]  ;;  %v226_v34 = vld [vmem:[#allocation3 + $0x598] sm:$0xff]  ;;  %v4927_v38 = vpack.c.bf16 %v194_v31, %v193_v30 }
  0x41   :  { %4904 = vmatprep.subr.bf16.mxu1 %v4903_v25  ;;  %v4923_v25 = vpack.c.bf16 %v192_v19, %v191_v18  ;;  %v208_v28 = vld [vmem:[#allocation3 + $0x508] sm:$0xff]  ;;  %v4955_v29 = vpack.c.bf16 %v224_v21, %v223_v20  ;;  %v177_v39 = vld [vmem:[#allocation3 + $0x410] sm:$0xff]  ;;  %v210_v46 = vld [vmem:[#allocation3 + $0x518] sm:$0xff] }
  0x42   :  { %v33_v37 = vld [vmem:[%s6155_s0 + $0x10] sm:$0xff]  ;;  %v195_v47 = vld [vmem:[#allocation3 + $0x4a0] sm:$0xff]  ;;  %v230_v0 = vld [vmem:[#allocation3 + $0x5b8] sm:$0xff] }
  0x43   :  { %4874 = vmatpush3.bf16.msra.mxu0 %v4873_v32  ;;  %v225_v32 = vld [vmem:[#allocation3 + $0x590] sm:$0xff]  ;;  %v5920_v42 = vrot.slane %v33_v37, %v5896_v13  ;;  %v1121_v43 = vcombine.high %v33_v37, %v33_v37  ;;  %v227_v49 = vld [vmem:[#allocation3 + $0x5a0] sm:$0xff]  ;;  %v180_v57 = vld [vmem:[#allocation3 + $0x428] sm:$0xff] }
  0x44   :  { %4906 = vmatpush3.bf16.msra.mxu1 %v4905_v35  ;;  %4876 = vmatprep.subr.bf16.mxu0 %v4875_v36  ;;  %v4925_v35 = vpack.c.bf16 %v176_v26, %v175_v23  ;;  %v4957_v36 = vpack.c.bf16 %v208_v28, %v207_v27  ;;  %v209_v41 = vld [vmem:[#allocation3 + $0x510] sm:$0xff]  ;;  %v4959_v44 = vpack.c.bf16 %v226_v34, %v225_v32  ;;  %v179_v56 = vld [vmem:[#allocation3 + $0x420] sm:$0xff]  ;;  %v212_v60 = vld [vmem:[#allocation3 + $0x528] sm:$0xff] }
  0x45   :  { %4908 = vmatprep.subr.bf16.mxu1 %v4907_v40  ;;  %v178_v40 = vld [vmem:[#allocation3 + $0x418] sm:$0xff]  ;;  %v5926_v52 = vrot.slane %v1121_v43, %v5896_v13  ;;  %v4961_v54 = vpack.c.bf16 %v210_v46, %v209_v41  ;;  %v211_v58 = vld [vmem:[#allocation3 + $0x520] sm:$0xff]  ;;  %v213_v5 = vld [vmem:[#allocation3 + $0x530] sm:$0xff] }
  0x46   :  { %v4929_v53 = vpack.c.bf16 %v178_v40, %v177_v39  ;;  %v4965_v1 = vpack.c.bf16 %v212_v60, %v211_v58  ;;  %v182_v4 = vld [vmem:[#allocation3 + $0x438] sm:$0xff]  ;;  %v199_v8 = vld [vmem:[#allocation3 + $0x4c0] sm:$0xff]  ;;  %v184_v17 = vld [vmem:[#allocation3 + $0x448] sm:$0xff] }
  0x47   :  { %4878 = vmatpush3.bf16.msra.mxu0 %v4877_v48  ;;  %v196_v48 = vld [vmem:[#allocation3 + $0x4a8] sm:$0xff]  ;;  %v214_v7 = vld [vmem:[#allocation3 + $0x538] sm:$0xff]  ;;  %v215_v18 = vld [vmem:[#allocation3 + $0x540] sm:$0xff] }
  0x48   :  { %4910 = vmatpush3.bf16.msra.mxu1 %v4909_v50  ;;  %4880 = vmatprep.subr.bf16.mxu0 %v4879_v51  ;;  %v228_v50 = vld [vmem:[#allocation3 + $0x5a8] sm:$0xff]  ;;  %v1136_v51 = vcombine.high %v5920_v42, %v5920_v42  ;;  %v4969_v14 = vpack.c.bf16 %v214_v7, %v213_v5  ;;  %v201_v21 = vld [vmem:[#allocation3 + $0x4d0] sm:$0xff]  ;;  %v218_v32 = vld [vmem:[#allocation3 + $0x558] sm:$0xff] }
  0x49   :  { %4912 = vmatprep.subr.bf16.mxu1 %v4911_v55  ;;  %v4931_v55 = vpack.c.bf16 %v196_v48, %v195_v47  ;;  %v4963_v59 = vpack.c.bf16 %v228_v50, %v227_v49  ;;  %v216_v20 = vld [vmem:[#allocation3 + $0x548] sm:$0xff]  ;;  %v233_v23 = vld [vmem:[#allocation3 + $0x5d0] sm:$0xff]  ;;  %v203_v34 = vld [vmem:[#allocation3 + $0x4e0] sm:$0xff] }
  0x4a   :  { %v4973_v26 = vpack.c.bf16 %v216_v20, %v215_v18  ;;  %v185_v28 = vld [vmem:[#allocation3 + $0x450] sm:$0xff]  ;;  %v236_v37 = vld [vmem:[#allocation3 + $0x5e8] sm:$0xff]  ;;  %v187_v41 = vld [vmem:[#allocation3 + $0x460] sm:$0xff] }
  0x4b   :  { %4882 = vmatpush3.bf16.msra.mxu0 %v4881_v61  ;;  %v197_v61 = vld [vmem:[#allocation3 + $0x4b0] sm:$0xff]  ;;  %v188_v43 = vld [vmem:[#allocation3 + $0x468] sm:$0xff]  ;;  %v206_v49 = vld [vmem:[#allocation3 + $0x4f8] sm:$0xff] }
  0x4c   :  { %4914 = vmatpush3.bf16.msra.mxu1 %v4913_v62  ;;  %4884 = vmatprep.subr.bf16.mxu0 %v4883_v63  ;;  %v198_v62 = vld [vmem:[#allocation3 + $0x4b8] sm:$0xff]  ;;  %v229_v63 = vld [vmem:[#allocation3 + $0x5b0] sm:$0xff]  ;;  %v220_v47 = vld [vmem:[#allocation3 + $0x568] sm:$0xff] }
  0x4d   :  { %4916 = vmatprep.subr.bf16.mxu1 %v4915_v3  ;;  %v4935_v2 = vpack.c.bf16 %v198_v62, %v197_v61  ;;  %v181_v3 = vld [vmem:[#allocation3 + $0x430] sm:$0xff]  ;;  %v4967_v6 = vpack.c.bf16 %v230_v0, %v229_v63  ;;  %v190_v58 = vld [vmem:[#allocation3 + $0x478] sm:$0xff]  ;;  %v255_v61 = vld [vmem:[#allocation3 + $0x680] sm:$0xff] }
  0x4e   :  { %v4937_v12 = vpack.c.bf16 %v182_v4, %v181_v3  ;;  %v217_v30 = vld [vmem:[#allocation3 + $0x550] sm:$0xff]  ;;  %v222_v60 = vld [vmem:[#allocation3 + $0x578] sm:$0xff]  ;;  %v256_v62 = vld [vmem:[#allocation3 + $0x688] sm:$0xff] }
  0x4f   :  { %4886 = vmatpush3.bf16.msra.mxu0 %v4885_v9  ;;  %v200_v9 = vld [vmem:[#allocation3 + $0x4c8] sm:$0xff]  ;;  %v4977_v39 = vpack.c.bf16 %v218_v32, %v217_v30  ;;  %v205_v48 = vld [vmem:[#allocation3 + $0x4f0] sm:$0xff]  ;;  %v287_v63 = vld [vmem:[#allocation3 + $0x780] sm:$0xff]  ;;  %v4987_v3 = vpack.c.bf16 %v256_v62, %v255_v61 }
  0x50   :  { %4918 = vmatpush3.bf16.msra.mxu1 %v4917_v10  ;;  %4888 = vmatprep.subr.bf16.mxu0 %v4887_v11  ;;  %v231_v10 = vld [vmem:[#allocation3 + $0x5c0] sm:$0xff]  ;;  %v232_v11 = vld [vmem:[#allocation3 + $0x5c8] sm:$0xff]  ;;  %v4939_v15 = vpack.c.bf16 %v200_v9, %v199_v8  ;;  %v237_v50 = vld [vmem:[#allocation3 + $0x5f0] sm:$0xff] }
  0x51   :  { %4920 = vmatprep.subr.bf16.mxu1 %v4919_v16  ;;  %v183_v16 = vld [vmem:[#allocation3 + $0x440] sm:$0xff]  ;;  %v4971_v19 = vpack.c.bf16 %v232_v11, %v231_v10  ;;  %v288_v0 = vld [vmem:[#allocation3 + $0x788] sm:$0xff]  ;;  %v257_v9 = vld [vmem:[#allocation3 + $0x690] sm:$0xff] }
  0x52   :  { %v239_v4 = vld [vmem:[#allocation3 + $0x600] sm:$0xff]  ;;  %v240_v5 = vld [vmem:[#allocation3 + $0x608] sm:$0xff]  ;;  %v5019_v7 = vpack.c.bf16 %v288_v0, %v287_v63  ;;  %v258_v10 = vld [vmem:[#allocation3 + $0x698] sm:$0xff] }
  0x53   :  { %4890 = vmatpush3.bf16.msra.mxu0 %v4889_v22  ;;  %v202_v22 = vld [vmem:[#allocation3 + $0x4d8] sm:$0xff]  ;;  %v272_v8 = vld [vmem:[#allocation3 + $0x708] sm:$0xff]  ;;  %v4991_v18 = vpack.c.bf16 %v258_v10, %v257_v9  ;;  %v265_v63 = vld [vmem:[#allocation3 + $0x6d0] sm:$0xff] }
  0x54   :  { %4922 = vmatpush3.bf16.msra.mxu1 %v4921_v24  ;;  %4924 = vmatprep.subr.bf16.mxu0 %v4923_v25  ;;  %v234_v24 = vld [vmem:[#allocation3 + $0x5d8] sm:$0xff]  ;;  %v4941_v25 = vpack.c.bf16 %v184_v17, %v183_v16  ;;  %v4943_v27 = vpack.c.bf16 %v202_v22, %v201_v21  ;;  %v4989_v16 = vpack.c.bf16 %v240_v5, %v239_v4  ;;  %v273_v21 = vld [vmem:[#allocation3 + $0x710] sm:$0xff]  ;;  %v280_v62 = vld [vmem:[#allocation3 + $0x748] sm:$0xff] }
  0x55   :  { %4956 = vmatprep.subr.bf16.mxu1 %v4955_v29  ;;  %v186_v29 = vld [vmem:[#allocation3 + $0x458] sm:$0xff]  ;;  %v4975_v31 = vpack.c.bf16 %v234_v24, %v233_v23  ;;  %v259_v24 = vld [vmem:[#allocation3 + $0x6a0] sm:$0xff]  ;;  %v249_v5 = vld [vmem:[#allocation3 + $0x650] sm:$0xff] }
  0x56   :  { %1628 = vmatmul.mubr.f32.vlgmr.msra.gmra.mrb[2].mxu0 %v5907_v33  ;;  %v1137_v33 = vcombine.high %v5926_v52, %v5926_v52  ;;  %v242_v20 = vld [vmem:[#allocation3 + $0x618] sm:$0xff]  ;;  %v267_v10 = vld [vmem:[#allocation3 + $0x6e0] sm:$0xff] }
  0x57   :  { %4926 = vmatpush3.bf16.msra.mxu0 %v4925_v35  ;;  %1698 = vmatmul.mubr.f32.vlgmr.msra.gmra.mrb[2].mxu1 %v5912_v45  ;;  %v4933_v45 = vpack.c.bf16 %v180_v57, %v179_v56  ;;  %v204_v35 = vld [vmem:[#allocation3 + $0x4e8] sm:$0xff]  ;;  %v4951_v56 = vpack.c.bf16 %v206_v49, %v205_v48  ;;  %v189_v57 = vld [vmem:[#allocation3 + $0x470] sm:$0xff]  ;;  %v274_v23 = vld [vmem:[#allocation3 + $0x718] sm:$0xff] }
  0x58   :  { %4958 = vmatpush3.bf16.msra.mxu1 %v4957_v36  ;;  %4928 = vmatprep.subr.bf16.mxu0 %v4927_v38  ;;  %v235_v36 = vld [vmem:[#allocation3 + $0x5e0] sm:$0xff]  ;;  %v4945_v38 = vpack.c.bf16 %v186_v29, %v185_v28  ;;  %v4947_v40 = vpack.c.bf16 %v204_v35, %v203_v34  ;;  %v292_v28 = vld [vmem:[#allocation3 + $0x7a8] sm:$0xff]  ;;  %v277_v48 = vld [vmem:[#allocation3 + $0x730] sm:$0xff] }
  0x59   :  { %4960 = vmatprep.subr.bf16.mxu1 %v4959_v44  ;;  %1767 = vmatprep.mubr.f32.mxu0 %v1136_v51  ;;  %v219_v44 = vld [vmem:[#allocation3 + $0x560] sm:$0xff]  ;;  %v4979_v46 = vpack.c.bf16 %v236_v37, %v235_v36  ;;  %v238_v51 = vld [vmem:[#allocation3 + $0x5f8] sm:$0xff]  ;;  %v244_v35 = vld [vmem:[#allocation3 + $0x628] sm:$0xff] }
  0x5a   :  { %1837 = vmatprep.mubr.f32.mxu1 %v1137_v33  ;;  %v221_v33 = vld [vmem:[#allocation3 + $0x570] sm:$0xff]  ;;  %v243_v34 = vld [vmem:[#allocation3 + $0x620] sm:$0xff]  ;;  %v266_v0 = vld [vmem:[#allocation3 + $0x6d8] sm:$0xff] }
  0x5b   :  { %4930 = vmatpush3.bf16.msra.mxu0 %v4929_v53  ;;  %v4949_v53 = vpack.c.bf16 %v188_v43, %v187_v41  ;;  %v275_v36 = vld [vmem:[#allocation3 + $0x720] sm:$0xff]  ;;  %v294_v41 = vld [vmem:[#allocation3 + $0x7b8] sm:$0xff]  ;;  %v4997_v43 = vpack.c.bf16 %v244_v35, %v243_v34  ;;  %v5007_v4 = vpack.c.bf16 %v266_v0, %v265_v63  ;;  %v253_v34 = vld [vmem:[#allocation3 + $0x670] sm:$0xff] }
  0x5c   :  { %4962 = vmatpush3.bf16.msra.mxu1 %v4961_v54  ;;  %4932 = vmatprep.subr.bf16.mxu0 %v4931_v55  ;;  %v34_v54 = vld [vmem:[%s6155_s0 + $0x18] sm:$0xff]  ;;  %v4981_v55 = vpack.c.bf16 %v220_v47, %v219_v44 }
  0x5d   :  { %4964 = vmatprep.subr.bf16.mxu1 %v4963_v59  ;;  %v4983_v59 = vpack.c.bf16 %v238_v51, %v237_v50  ;;  %v5935_v11 = vrot.slane %v34_v54, %v5896_v13  ;;  %v246_v47 = vld [vmem:[#allocation3 + $0x638] sm:$0xff]  ;;  %v263_v51 = vld [vmem:[#allocation3 + $0x6c0] sm:$0xff]  ;;  %v337_v63 = vld [vmem:[#allocation3 + $0x910] sm:$0xff] }
  0x5e   :  { %v278_v50 = vld [vmem:[#allocation3 + $0x738] sm:$0xff] }
  0x5f   :  { %4934 = vmatpush3.bf16.msra.mxu0 %v4933_v45  ;;  %v1138_v45 = vcombine.high %v34_v54, %v34_v54  ;;  %v295_v54 = vld [vmem:[#allocation3 + $0x7c0] sm:$0xff]  ;;  %v282_v9 = vld [vmem:[#allocation3 + $0x758] sm:$0xff] }
  0x60   :  { %4966 = vmatpush3.bf16.msra.mxu1 %v4965_v1  ;;  %4936 = vmatprep.subr.bf16.mxu0 %v4935_v2  ;;  %v4953_v1 = vpack.c.bf16 %v190_v58, %v189_v57  ;;  %v4985_v2 = vpack.c.bf16 %v222_v60, %v221_v33  ;;  %v5033_v57 = vpack.c.bf16 %v278_v50, %v277_v48  ;;  %v247_v33 = vld [vmem:[#allocation3 + $0x640] sm:$0xff]  ;;  %v254_v35 = vld [vmem:[#allocation3 + $0x678] sm:$0xff]  ;;  %v304_v48 = vld [vmem:[#allocation3 + $0x808] sm:$0xff] }
  0x61   :  { %4968 = vmatprep.subr.bf16.mxu1 %v4967_v6  ;;  %v271_v6 = vld [vmem:[#allocation3 + $0x700] sm:$0xff] }
  0x62   :  { %v5021_v17 = vpack.c.bf16 %v272_v8, %v271_v6  ;;  %v279_v60 = vld [vmem:[#allocation3 + $0x740] sm:$0xff]  ;;  %v250_v6 = vld [vmem:[#allocation3 + $0x658] sm:$0xff] }
  0x63   :  { %4938 = vmatpush3.bf16.msra.mxu0 %v4937_v12  ;;  %v289_v12 = vld [vmem:[#allocation3 + $0x790] sm:$0xff] }
  0x64   :  { %4970 = vmatpush3.bf16.msra.mxu1 %v4969_v14  ;;  %4940 = vmatprep.subr.bf16.mxu0 %v4939_v15  ;;  %v290_v14 = vld [vmem:[#allocation3 + $0x798] sm:$0xff]  ;;  %v5938_v15 = vrot.slane %v1138_v45, %v5896_v13  ;;  %v297_v45 = vld [vmem:[#allocation3 + $0x7d0] sm:$0xff] }
  0x65   :  { %4972 = vmatprep.subr.bf16.mxu1 %v4971_v19  ;;  %v241_v19 = vld [vmem:[#allocation3 + $0x610] sm:$0xff]  ;;  %v5023_v22 = vpack.c.bf16 %v290_v14, %v289_v12  ;;  %v268_v12 = vld [vmem:[#allocation3 + $0x6e8] sm:$0xff]  ;;  %v299_v14 = vld [vmem:[#allocation3 + $0x7e0] sm:$0xff] }
  0x66   :  { %v1154_v29 = vcombine.high %v5938_v15, %v5938_v15  ;;  %v4993_v30 = vpack.c.bf16 %v242_v20, %v241_v19  ;;  %v5011_v19 = vpack.c.bf16 %v268_v12, %v267_v10  ;;  %v251_v20 = vld [vmem:[#allocation3 + $0x660] sm:$0xff]  ;;  %v308_v12 = vld [vmem:[#allocation3 + $0x828] sm:$0xff] }
  0x67   :  { %4942 = vmatpush3.bf16.msra.mxu0 %v4941_v25  ;;  %v260_v25 = vld [vmem:[#allocation3 + $0x6a8] sm:$0xff]  ;;  %v307_v10 = vld [vmem:[#allocation3 + $0x820] sm:$0xff] }
  0x68   :  { %4974 = vmatpush3.bf16.msra.mxu1 %v4973_v26  ;;  %4944 = vmatprep.subr.bf16.mxu0 %v4943_v27  ;;  %v1153_v26 = vcombine.high %v5935_v11, %v5935_v11  ;;  %v291_v27 = vld [vmem:[#allocation3 + $0x7a0] sm:$0xff]  ;;  %v4995_v32 = vpack.c.bf16 %v260_v25, %v259_v24  ;;  %v284_v24 = vld [vmem:[#allocation3 + $0x768] sm:$0xff]  ;;  %v269_v25 = vld [vmem:[#allocation3 + $0x6f0] sm:$0xff] }
  0x69   :  { %4976 = vmatprep.subr.bf16.mxu1 %v4975_v31  ;;  %v5025_v31 = vpack.c.bf16 %v274_v23, %v273_v21  ;;  %v5027_v37 = vpack.c.bf16 %v292_v28, %v291_v27  ;;  %v252_v21 = vld [vmem:[#allocation3 + $0x668] sm:$0xff]  ;;  %v301_v27 = vld [vmem:[#allocation3 + $0x7f0] sm:$0xff]  ;;  %v302_v28 = vld [vmem:[#allocation3 + $0x7f8] sm:$0xff] }
  0x6b   :  { %4946 = vmatpush3.bf16.msra.mxu0 %v4945_v38  ;;  %v276_v38 = vld [vmem:[#allocation3 + $0x728] sm:$0xff] }
  0x6c   :  { %4978 = vmatpush3.bf16.msra.mxu1 %v4977_v39  ;;  %4948 = vmatprep.subr.bf16.mxu0 %v4947_v40  ;;  %v262_v39 = vld [vmem:[#allocation3 + $0x6b8] sm:$0xff]  ;;  %v293_v40 = vld [vmem:[#allocation3 + $0x7b0] sm:$0xff] }
  0x6d   :  { %4980 = vmatprep.subr.bf16.mxu1 %v4979_v46  ;;  %v245_v46 = vld [vmem:[#allocation3 + $0x630] sm:$0xff]  ;;  %v5031_v49 = vpack.c.bf16 %v294_v41, %v293_v40  ;;  %v351_v40 = vld [vmem:[#allocation3 + $0x980] sm:$0xff]  ;;  %v352_v41 = vld [vmem:[#allocation3 + $0x988] sm:$0xff] }
  0x6e   :  { %v5083_v50 = vpack.c.bf16 %v352_v41, %v351_v40  ;;  %v329_v40 = vld [vmem:[#allocation3 + $0x8d0] sm:$0xff]  ;;  %v330_v41 = vld [vmem:[#allocation3 + $0x8d8] sm:$0xff] }
  0x6f   :  { %4950 = vmatpush3.bf16.msra.mxu0 %v4949_v53  ;;  %v264_v53 = vld [vmem:[#allocation3 + $0x6c8] sm:$0xff] }
  0x70   :  { %4982 = vmatpush3.bf16.msra.mxu1 %v4981_v55  ;;  %4952 = vmatprep.subr.bf16.mxu0 %v4951_v56  ;;  %v296_v55 = vld [vmem:[#allocation3 + $0x7c8] sm:$0xff]  ;;  %v5001_v56 = vpack.c.bf16 %v246_v47, %v245_v46  ;;  %v5003_v58 = vpack.c.bf16 %v264_v53, %v263_v51  ;;  %v303_v47 = vld [vmem:[#allocation3 + $0x800] sm:$0xff]  ;;  %v321_v53 = vld [vmem:[#allocation3 + $0x890] sm:$0xff] }
  0x71   :  { %4984 = vmatprep.subr.bf16.mxu1 %v4983_v59  ;;  %v248_v59 = vld [vmem:[#allocation3 + $0x648] sm:$0xff]  ;;  %v5035_v61 = vpack.c.bf16 %v296_v55, %v295_v54  ;;  %v322_v54 = vld [vmem:[#allocation3 + $0x898] sm:$0xff] }
  0x72   :  { %v336_v51 = vld [vmem:[#allocation3 + $0x908] sm:$0xff] }
  0x73   :  { %4954 = vmatpush3.bf16.msra.mxu0 %v4953_v1  ;;  %v298_v1 = vld [vmem:[#allocation3 + $0x7d8] sm:$0xff] }
  0x74   :  { %4986 = vmatpush3.bf16.msra.mxu1 %v4985_v2  ;;  %4988 = vmatprep.subr.bf16.mxu0 %v4987_v3  ;;  %v5005_v2 = vpack.c.bf16 %v248_v59, %v247_v33  ;;  %v5037_v3 = vpack.c.bf16 %v280_v62, %v279_v60  ;;  %v5039_v8 = vpack.c.bf16 %v298_v1, %v297_v45  ;;  %v306_v62 = vld [vmem:[#allocation3 + $0x818] sm:$0xff]  ;;  %v323_v1 = vld [vmem:[#allocation3 + $0x8a0] sm:$0xff] }
  0x75   :  { %5020 = vmatprep.subr.bf16.mxu1 %v5019_v7  ;;  %v281_v7 = vld [vmem:[#allocation3 + $0x750] sm:$0xff]  ;;  %v5053_v33 = vpack.c.bf16 %v304_v48, %v303_v47  ;;  %v5055_v60 = vpack.c.bf16 %v322_v54, %v321_v53  ;;  %v338_v45 = vld [vmem:[#allocation3 + $0x918] sm:$0xff]  ;;  %v5071_v47 = vpack.c.bf16 %v330_v41, %v329_v40  ;;  %v331_v54 = vld [vmem:[#allocation3 + $0x8e0] sm:$0xff] }
  0x76   :  { %1768 = vmatmul.mubr.f32.vlgmr.msra.gmra.mrb[4].mxu0 %v5920_v42  ;;  %v261_v42 = vld [vmem:[#allocation3 + $0x6b0] sm:$0xff]  ;;  %v346_v53 = vld [vmem:[#allocation3 + $0x958] sm:$0xff] }
  0x77   :  { %4990 = vmatpush3.bf16.msra.mxu0 %v4989_v16  ;;  %1838 = vmatmul.mubr.f32.vlgmr.msra.gmra.mrb[4].mxu1 %v5926_v52  ;;  %v5029_v52 = vpack.c.bf16 %v276_v38, %v275_v36  ;;  %v4999_v44 = vpack.c.bf16 %v262_v39, %v261_v42  ;;  %v300_v16 = vld [vmem:[#allocation3 + $0x7e8] sm:$0xff]  ;;  %v285_v36 = vld [vmem:[#allocation3 + $0x770] sm:$0xff]  ;;  %v286_v38 = vld [vmem:[#allocation3 + $0x778] sm:$0xff] }
  0x78   :  { %5022 = vmatpush3.bf16.msra.mxu1 %v5021_v17  ;;  %4992 = vmatprep.subr.bf16.mxu0 %v4991_v18  ;;  %v5009_v17 = vpack.c.bf16 %v250_v6, %v249_v5  ;;  %v5041_v18 = vpack.c.bf16 %v282_v9, %v281_v7  ;;  %v5043_v23 = vpack.c.bf16 %v300_v16, %v299_v14  ;;  %v319_v42 = vld [vmem:[#allocation3 + $0x880] sm:$0xff]  ;;  %v320_v39 = vld [vmem:[#allocation3 + $0x888] sm:$0xff]  ;;  %v313_v48 = vld [vmem:[#allocation3 + $0x850] sm:$0xff] }
  0x79   :  { %5024 = vmatprep.subr.bf16.mxu1 %v5023_v22  ;;  %1907 = vmatprep.mubr.f32.mxu0 %v1153_v26  ;;  %v283_v22 = vld [vmem:[#allocation3 + $0x760] sm:$0xff]  ;;  %v270_v26 = vld [vmem:[#allocation3 + $0x6f8] sm:$0xff]  ;;  %v5051_v46 = vpack.c.bf16 %v320_v39, %v319_v42  ;;  %v356_v5 = vld [vmem:[#allocation3 + $0x9a8] sm:$0xff] }
  0x7a   :  { %1977 = vmatprep.mubr.f32.mxu1 %v1154_v29  ;;  %v5013_v29 = vpack.c.bf16 %v252_v21, %v251_v20  ;;  %v339_v14 = vld [vmem:[#allocation3 + $0x920] sm:$0xff]  ;;  %v358_v20 = vld [vmem:[#allocation3 + $0x9b8] sm:$0xff]  ;;  %v5061_v21 = vpack.c.bf16 %v308_v12, %v307_v10  ;;  %v344_v39 = vld [vmem:[#allocation3 + $0x948] sm:$0xff] }
  0x7b   :  { %4994 = vmatpush3.bf16.msra.mxu0 %v4993_v30  ;;  %v35_v30 = vld [vmem:[%s6155_s0 + $0x20] sm:$0xff]  ;;  %v317_v10 = vld [vmem:[#allocation3 + $0x870] sm:$0xff] }
  0x7c   :  { %5026 = vmatpush3.bf16.msra.mxu1 %v5025_v31  ;;  %4996 = vmatprep.subr.bf16.mxu0 %v4995_v32  ;;  %v5045_v31 = vpack.c.bf16 %v284_v24, %v283_v22  ;;  %v5015_v32 = vpack.c.bf16 %v270_v26, %v269_v25  ;;  %v5950_v55 = vrot.slane %v35_v30, %v5896_v13  ;;  %v310_v24 = vld [vmem:[#allocation3 + $0x838] sm:$0xff]  ;;  %v341_v25 = vld [vmem:[#allocation3 + $0x930] sm:$0xff] }
  0x7d   :  { %5028 = vmatprep.subr.bf16.mxu1 %v5027_v37  ;;  %v5047_v37 = vpack.c.bf16 %v302_v28, %v301_v27  ;;  %v342_v27 = vld [vmem:[#allocation3 + $0x938] sm:$0xff]  ;;  %v327_v28 = vld [vmem:[#allocation3 + $0x8c0] sm:$0xff]  ;;  %v401_v40 = vld [vmem:[#allocation3 + $0xb10] sm:$0xff] }
  0x7e   :  { %v318_v12 = vld [vmem:[#allocation3 + $0x878] sm:$0xff] }
  0x7f   :  { %4998 = vmatpush3.bf16.msra.mxu0 %v4997_v43  ;;  %v1155_v43 = vcombine.high %v35_v30, %v35_v30  ;;  %v359_v30 = vld [vmem:[#allocation3 + $0x9c0] sm:$0xff] }
  0x80   :  { %5030 = vmatpush3.bf16.msra.mxu1 %v5029_v52  ;;  %5000 = vmatprep.subr.bf16.mxu0 %v4999_v44  ;;  %v5017_v52 = vpack.c.bf16 %v254_v35, %v253_v34  ;;  %v5049_v44 = vpack.c.bf16 %v286_v38, %v285_v36  ;;  %v5097_v34 = vpack.c.bf16 %v342_v27, %v341_v25  ;;  %v311_v36 = vld [vmem:[#allocation3 + $0x840] sm:$0xff]  ;;  %v368_v25 = vld [vmem:[#allocation3 + $0xa08] sm:$0xff] }
  0x81   :  { %5032 = vmatprep.subr.bf16.mxu1 %v5031_v49  ;;  %v335_v49 = vld [vmem:[#allocation3 + $0x900] sm:$0xff] }
  0x82   :  { %v5085_v59 = vpack.c.bf16 %v336_v51, %v335_v49  ;;  %v343_v38 = vld [vmem:[#allocation3 + $0x940] sm:$0xff]  ;;  %v314_v49 = vld [vmem:[#allocation3 + $0x858] sm:$0xff] }
  0x83   :  { %5002 = vmatpush3.bf16.msra.mxu0 %v5001_v56  ;;  %v353_v56 = vld [vmem:[#allocation3 + $0x990] sm:$0xff] }
  0x84   :  { %5034 = vmatpush3.bf16.msra.mxu1 %v5033_v57  ;;  %5004 = vmatprep.subr.bf16.mxu0 %v5003_v58  ;;  %v354_v57 = vld [vmem:[#allocation3 + $0x998] sm:$0xff]  ;;  %v5953_v58 = vrot.slane %v1155_v43, %v5896_v13  ;;  %v361_v43 = vld [vmem:[#allocation3 + $0x9d0] sm:$0xff] }
  0x85   :  { %5036 = vmatprep.subr.bf16.mxu1 %v5035_v61  ;;  %v305_v61 = vld [vmem:[#allocation3 + $0x810] sm:$0xff]  ;;  %v5087_v0 = vpack.c.bf16 %v354_v57, %v353_v56  ;;  %v332_v56 = vld [vmem:[#allocation3 + $0x8e8] sm:$0xff]  ;;  %v363_v57 = vld [vmem:[#allocation3 + $0x9e0] sm:$0xff] }
  0x86   :  { %v1171_v6 = vcombine.high %v5953_v58, %v5953_v58  ;;  %v5057_v7 = vpack.c.bf16 %v306_v62, %v305_v61  ;;  %v5075_v61 = vpack.c.bf16 %v332_v56, %v331_v54  ;;  %v315_v62 = vld [vmem:[#allocation3 + $0x860] sm:$0xff]  ;;  %v372_v56 = vld [vmem:[#allocation3 + $0xa28] sm:$0xff] }
  0x87   :  { %5006 = vmatpush3.bf16.msra.mxu0 %v5005_v2  ;;  %v324_v2 = vld [vmem:[#allocation3 + $0x8a8] sm:$0xff]  ;;  %v371_v54 = vld [vmem:[#allocation3 + $0xa20] sm:$0xff] }
  0x88   :  { %5038 = vmatpush3.bf16.msra.mxu1 %v5037_v3  ;;  %5008 = vmatprep.subr.bf16.mxu0 %v5007_v4  ;;  %v1170_v3 = vcombine.high %v5950_v55, %v5950_v55  ;;  %v355_v4 = vld [vmem:[#allocation3 + $0x9a0] sm:$0xff]  ;;  %v5059_v9 = vpack.c.bf16 %v324_v2, %v323_v1  ;;  %v348_v1 = vld [vmem:[#allocation3 + $0x968] sm:$0xff]  ;;  %v333_v2 = vld [vmem:[#allocation3 + $0x8f0] sm:$0xff] }
  0x89   :  { %5040 = vmatprep.subr.bf16.mxu1 %v5039_v8  ;;  %v5089_v8 = vpack.c.bf16 %v338_v45, %v337_v63  ;;  %v5091_v16 = vpack.c.bf16 %v356_v5, %v355_v4  ;;  %v316_v63 = vld [vmem:[#allocation3 + $0x868] sm:$0xff]  ;;  %v365_v4 = vld [vmem:[#allocation3 + $0x9f0] sm:$0xff]  ;;  %v366_v5 = vld [vmem:[#allocation3 + $0x9f8] sm:$0xff] }
  0x8b   :  { %5010 = vmatpush3.bf16.msra.mxu0 %v5009_v17  ;;  %v340_v17 = vld [vmem:[#allocation3 + $0x928] sm:$0xff] }
  0x8c   :  { %5042 = vmatpush3.bf16.msra.mxu1 %v5041_v18  ;;  %5012 = vmatprep.subr.bf16.mxu0 %v5011_v19  ;;  %v326_v18 = vld [vmem:[#allocation3 + $0x8b8] sm:$0xff]  ;;  %v357_v19 = vld [vmem:[#allocation3 + $0x9b0] sm:$0xff] }
  0x8d   :  { %5044 = vmatprep.subr.bf16.mxu1 %v5043_v23  ;;  %v309_v23 = vld [vmem:[#allocation3 + $0x830] sm:$0xff]  ;;  %v5095_v26 = vpack.c.bf16 %v358_v20, %v357_v19  ;;  %v415_v19 = vld [vmem:[#allocation3 + $0xb80] sm:$0xff]  ;;  %v416_v20 = vld [vmem:[#allocation3 + $0xb88] sm:$0xff] }
  0x8e   :  { %v5147_v27 = vpack.c.bf16 %v416_v20, %v415_v19  ;;  %v393_v19 = vld [vmem:[#allocation3 + $0xad0] sm:$0xff]  ;;  %v394_v20 = vld [vmem:[#allocation3 + $0xad8] sm:$0xff] }
  0x8f   :  { %5014 = vmatpush3.bf16.msra.mxu0 %v5013_v29  ;;  %v328_v29 = vld [vmem:[#allocation3 + $0x8c8] sm:$0xff] }
  0x90   :  { %5046 = vmatpush3.bf16.msra.mxu1 %v5045_v31  ;;  %5016 = vmatprep.subr.bf16.mxu0 %v5015_v32  ;;  %v360_v31 = vld [vmem:[#allocation3 + $0x9c8] sm:$0xff]  ;;  %v5065_v32 = vpack.c.bf16 %v310_v24, %v309_v23  ;;  %v5067_v35 = vpack.c.bf16 %v328_v29, %v327_v28  ;;  %v367_v24 = vld [vmem:[#allocation3 + $0xa00] sm:$0xff]  ;;  %v385_v29 = vld [vmem:[#allocation3 + $0xa90] sm:$0xff] }
  0x91   :  { %5048 = vmatprep.subr.bf16.mxu1 %v5047_v37  ;;  %v312_v37 = vld [vmem:[#allocation3 + $0x848] sm:$0xff]  ;;  %v5099_v42 = vpack.c.bf16 %v360_v31, %v359_v30  ;;  %v386_v30 = vld [vmem:[#allocation3 + $0xa98] sm:$0xff] }
  0x92   :  { %v400_v28 = vld [vmem:[#allocation3 + $0xb08] sm:$0xff] }
  0x93   :  { %5018 = vmatpush3.bf16.msra.mxu0 %v5017_v52  ;;  %v362_v52 = vld [vmem:[#allocation3 + $0x9d8] sm:$0xff] }
  0x94   :  { %5050 = vmatpush3.bf16.msra.mxu1 %v5049_v44  ;;  %5052 = vmatprep.subr.bf16.mxu0 %v5051_v46  ;;  %v5069_v44 = vpack.c.bf16 %v312_v37, %v311_v36  ;;  %v5101_v46 = vpack.c.bf16 %v344_v39, %v343_v38  ;;  %v5103_v51 = vpack.c.bf16 %v362_v52, %v361_v43  ;;  %v370_v39 = vld [vmem:[#allocation3 + $0xa18] sm:$0xff]  ;;  %v387_v52 = vld [vmem:[#allocation3 + $0xaa0] sm:$0xff] }
  0x95   :  { %5084 = vmatprep.subr.bf16.mxu1 %v5083_v50  ;;  %v345_v50 = vld [vmem:[#allocation3 + $0x950] sm:$0xff]  ;;  %v5117_v36 = vpack.c.bf16 %v368_v25, %v367_v24  ;;  %v5119_v38 = vpack.c.bf16 %v386_v30, %v385_v29  ;;  %v402_v43 = vld [vmem:[#allocation3 + $0xb18] sm:$0xff]  ;;  %v5135_v24 = vpack.c.bf16 %v394_v20, %v393_v19  ;;  %v395_v30 = vld [vmem:[#allocation3 + $0xae0] sm:$0xff] }
  0x96   :  { %1908 = vmatmul.mubr.f32.vlgmr.msra.gmra.mrb[6].mxu0 %v5935_v11  ;;  %v325_v11 = vld [vmem:[#allocation3 + $0x8b0] sm:$0xff]  ;;  %v410_v29 = vld [vmem:[#allocation3 + $0xb58] sm:$0xff] }
  0x97   :  { %5054 = vmatpush3.bf16.msra.mxu0 %v5053_v33  ;;  %1978 = vmatmul.mubr.f32.vlgmr.msra.gmra.mrb[6].mxu1 %v5938_v15  ;;  %v5093_v15 = vpack.c.bf16 %v340_v17, %v339_v14  ;;  %v5063_v22 = vpack.c.bf16 %v326_v18, %v325_v11  ;;  %v364_v33 = vld [vmem:[#allocation3 + $0x9e8] sm:$0xff]  ;;  %v349_v14 = vld [vmem:[#allocation3 + $0x970] sm:$0xff]  ;;  %v350_v17 = vld [vmem:[#allocation3 + $0x978] sm:$0xff] }
  0x98   :  { %5086 = vmatpush3.bf16.msra.mxu1 %v5085_v59  ;;  %5056 = vmatprep.subr.bf16.mxu0 %v5055_v60  ;;  %v5073_v59 = vpack.c.bf16 %v314_v49, %v313_v48  ;;  %v5105_v60 = vpack.c.bf16 %v346_v53, %v345_v50  ;;  %v5107_v45 = vpack.c.bf16 %v364_v33, %v363_v57  ;;  %v383_v11 = vld [vmem:[#allocation3 + $0xa80] sm:$0xff]  ;;  %v384_v18 = vld [vmem:[#allocation3 + $0xa88] sm:$0xff]  ;;  %v377_v25 = vld [vmem:[#allocation3 + $0xa50] sm:$0xff] }
  0x99   :  { %5088 = vmatprep.subr.bf16.mxu1 %v5087_v0  ;;  %2047 = vmatprep.mubr.f32.mxu0 %v1170_v3  ;;  %v347_v0 = vld [vmem:[#allocation3 + $0x960] sm:$0xff]  ;;  %v334_v3 = vld [vmem:[#allocation3 + $0x8f8] sm:$0xff]  ;;  %v5115_v23 = vpack.c.bf16 %v384_v18, %v383_v11  ;;  %v420_v48 = vld [vmem:[#allocation3 + $0xba8] sm:$0xff] }
  0x9a   :  { %2117 = vmatprep.mubr.f32.mxu1 %v1171_v6  ;;  %v5077_v6 = vpack.c.bf16 %v316_v63, %v315_v62  ;;  %v403_v57 = vld [vmem:[#allocation3 + $0xb20] sm:$0xff]  ;;  %v422_v62 = vld [vmem:[#allocation3 + $0xbb8] sm:$0xff]  ;;  %v5125_v63 = vpack.c.bf16 %v372_v56, %v371_v54  ;;  %v408_v18 = vld [vmem:[#allocation3 + $0xb48] sm:$0xff] }
  0x9b   :  { %5058 = vmatpush3.bf16.msra.mxu0 %v5057_v7  ;;  %v36_v7 = vld [vmem:[%s6155_s0 + $0x28] sm:$0xff]  ;;  %v381_v54 = vld [vmem:[#allocation3 + $0xa70] sm:$0xff]  ;;  %v382_v56 = vld [vmem:[#allocation3 + $0xa78] sm:$0xff] }
  0x9c   :  { %5090 = vmatpush3.bf16.msra.mxu1 %v5089_v8  ;;  %5060 = vmatprep.subr.bf16.mxu0 %v5059_v9  ;;  %v5109_v8 = vpack.c.bf16 %v348_v1, %v347_v0  ;;  %v5079_v9 = vpack.c.bf16 %v334_v3, %v333_v2  ;;  %v5965_v31 = vrot.slane %v36_v7, %v5896_v13  ;;  %v374_v1 = vld [vmem:[#allocation3 + $0xa38] sm:$0xff]  ;;  %v405_v2 = vld [vmem:[#allocation3 + $0xb30] sm:$0xff] }
  0x9d   :  { %5092 = vmatprep.subr.bf16.mxu1 %v5091_v16  ;;  %v5111_v16 = vpack.c.bf16 %v366_v5, %v365_v4  ;;  %v406_v4 = vld [vmem:[#allocation3 + $0xb38] sm:$0xff]  ;;  %v391_v5 = vld [vmem:[#allocation3 + $0xac0] sm:$0xff]  ;;  %v465_v19 = vld [vmem:[#allocation3 + $0xd10] sm:$0xff] }
  0x9f   :  { %5062 = vmatpush3.bf16.msra.mxu0 %v5061_v21  ;;  %v1172_v21 = vcombine.high %v36_v7, %v36_v7  ;;  %v423_v7 = vld [vmem:[#allocation3 + $0xbc0] sm:$0xff] }
  0xa0   :  { %5094 = vmatpush3.bf16.msra.mxu1 %v5093_v15  ;;  %5064 = vmatprep.subr.bf16.mxu0 %v5063_v22  ;;  %v5081_v15 = vpack.c.bf16 %v318_v12, %v317_v10  ;;  %v5113_v22 = vpack.c.bf16 %v350_v17, %v349_v14  ;;  %v5161_v10 = vpack.c.bf16 %v406_v4, %v405_v2  ;;  %v375_v14 = vld [vmem:[#allocation3 + $0xa40] sm:$0xff]  ;;  %v432_v2 = vld [vmem:[#allocation3 + $0xc08] sm:$0xff] }
  0xa1   :  { %5096 = vmatprep.subr.bf16.mxu1 %v5095_v26  ;;  %v399_v26 = vld [vmem:[#allocation3 + $0xb00] sm:$0xff] }
  0xa2   :  { %v5149_v37 = vpack.c.bf16 %v400_v28, %v399_v26  ;;  %v407_v17 = vld [vmem:[#allocation3 + $0xb40] sm:$0xff]  ;;  %v378_v26 = vld [vmem:[#allocation3 + $0xa58] sm:$0xff] }
  0xa3   :  { %5066 = vmatpush3.bf16.msra.mxu0 %v5065_v32  ;;  %v417_v32 = vld [vmem:[#allocation3 + $0xb90] sm:$0xff] }
  0xa4   :  { %5098 = vmatpush3.bf16.msra.mxu1 %v5097_v34  ;;  %5068 = vmatprep.subr.bf16.mxu0 %v5067_v35  ;;  %v418_v34 = vld [vmem:[#allocation3 + $0xb98] sm:$0xff]  ;;  %v5968_v35 = vrot.slane %v1172_v21, %v5896_v13  ;;  %v425_v21 = vld [vmem:[#allocation3 + $0xbd0] sm:$0xff] }
  0xa5   :  { %5100 = vmatprep.subr.bf16.mxu1 %v5099_v42  ;;  %v369_v42 = vld [vmem:[#allocation3 + $0xa10] sm:$0xff]  ;;  %v5151_v41 = vpack.c.bf16 %v418_v34, %v417_v32  ;;  %v396_v32 = vld [vmem:[#allocation3 + $0xae8] sm:$0xff]  ;;  %v427_v34 = vld [vmem:[#allocation3 + $0xbe0] sm:$0xff] }
  0xa6   :  { %v1188_v49 = vcombine.high %v5968_v35, %v5968_v35  ;;  %v5121_v50 = vpack.c.bf16 %v370_v39, %v369_v42  ;;  %v5139_v42 = vpack.c.bf16 %v396_v32, %v395_v30  ;;  %v379_v39 = vld [vmem:[#allocation3 + $0xa60] sm:$0xff]  ;;  %v436_v32 = vld [vmem:[#allocation3 + $0xc28] sm:$0xff] }
  0xa7   :  { %5070 = vmatpush3.bf16.msra.mxu0 %v5069_v44  ;;  %v388_v44 = vld [vmem:[#allocation3 + $0xaa8] sm:$0xff]  ;;  %v435_v30 = vld [vmem:[#allocation3 + $0xc20] sm:$0xff] }
  0xa8   :  { %5102 = vmatpush3.bf16.msra.mxu1 %v5101_v46  ;;  %5072 = vmatprep.subr.bf16.mxu0 %v5071_v47  ;;  %v1187_v46 = vcombine.high %v5965_v31, %v5965_v31  ;;  %v419_v47 = vld [vmem:[#allocation3 + $0xba0] sm:$0xff]  ;;  %v5123_v53 = vpack.c.bf16 %v388_v44, %v387_v52  ;;  %v412_v52 = vld [vmem:[#allocation3 + $0xb68] sm:$0xff]  ;;  %v397_v44 = vld [vmem:[#allocation3 + $0xaf0] sm:$0xff] }
  0xa9   :  { %5104 = vmatprep.subr.bf16.mxu1 %v5103_v51  ;;  %v5153_v51 = vpack.c.bf16 %v402_v43, %v401_v40  ;;  %v5155_v33 = vpack.c.bf16 %v420_v48, %v419_v47  ;;  %v380_v40 = vld [vmem:[#allocation3 + $0xa68] sm:$0xff]  ;;  %v429_v47 = vld [vmem:[#allocation3 + $0xbf0] sm:$0xff]  ;;  %v430_v48 = vld [vmem:[#allocation3 + $0xbf8] sm:$0xff] }
  0xab   :  { %5074 = vmatpush3.bf16.msra.mxu0 %v5073_v59  ;;  %v404_v59 = vld [vmem:[#allocation3 + $0xb28] sm:$0xff] }
  0xac   :  { %5106 = vmatpush3.bf16.msra.mxu1 %v5105_v60  ;;  %5076 = vmatprep.subr.bf16.mxu0 %v5075_v61  ;;  %v390_v60 = vld [vmem:[#allocation3 + $0xab8] sm:$0xff]  ;;  %v421_v61 = vld [vmem:[#allocation3 + $0xbb0] sm:$0xff] }
  0xad   :  { %5108 = vmatprep.subr.bf16.mxu1 %v5107_v45  ;;  %v373_v45 = vld [vmem:[#allocation3 + $0xa30] sm:$0xff]  ;;  %v5159_v3 = vpack.c.bf16 %v422_v62, %v421_v61  ;;  %v479_v61 = vld [vmem:[#allocation3 + $0xd80] sm:$0xff]  ;;  %v480_v62 = vld [vmem:[#allocation3 + $0xd88] sm:$0xff] }
  0xae   :  { %v5211_v4 = vpack.c.bf16 %v480_v62, %v479_v61  ;;  %v457_v61 = vld [vmem:[#allocation3 + $0xcd0] sm:$0xff]  ;;  %v458_v62 = vld [vmem:[#allocation3 + $0xcd8] sm:$0xff] }
  0xaf   :  { %5078 = vmatpush3.bf16.msra.mxu0 %v5077_v6  ;;  %v392_v6 = vld [vmem:[#allocation3 + $0xac8] sm:$0xff] }
  0xb0   :  { %5110 = vmatpush3.bf16.msra.mxu1 %v5109_v8  ;;  %5080 = vmatprep.subr.bf16.mxu0 %v5079_v9  ;;  %v424_v8 = vld [vmem:[#allocation3 + $0xbc8] sm:$0xff]  ;;  %v5129_v9 = vpack.c.bf16 %v374_v1, %v373_v45  ;;  %v5131_v12 = vpack.c.bf16 %v392_v6, %v391_v5  ;;  %v431_v1 = vld [vmem:[#allocation3 + $0xc00] sm:$0xff]  ;;  %v449_v6 = vld [vmem:[#allocation3 + $0xc90] sm:$0xff] }
  0xb1   :  { %5112 = vmatprep.subr.bf16.mxu1 %v5111_v16  ;;  %v376_v16 = vld [vmem:[#allocation3 + $0xa48] sm:$0xff]  ;;  %v5163_v11 = vpack.c.bf16 %v424_v8, %v423_v7  ;;  %v450_v7 = vld [vmem:[#allocation3 + $0xc98] sm:$0xff] }
  0xb2   :  { %v464_v5 = vld [vmem:[#allocation3 + $0xd08] sm:$0xff] }
  0xb3   :  { %5082 = vmatpush3.bf16.msra.mxu0 %v5081_v15  ;;  %v426_v15 = vld [vmem:[#allocation3 + $0xbd8] sm:$0xff] }
  0xb4   :  { %5114 = vmatpush3.bf16.msra.mxu1 %v5113_v22  ;;  %5116 = vmatprep.subr.bf16.mxu0 %v5115_v23  ;;  %v5133_v22 = vpack.c.bf16 %v376_v16, %v375_v14  ;;  %v5165_v23 = vpack.c.bf16 %v408_v18, %v407_v17  ;;  %v5167_v28 = vpack.c.bf16 %v426_v15, %v425_v21  ;;  %v434_v18 = vld [vmem:[#allocation3 + $0xc18] sm:$0xff]  ;;  %v451_v15 = vld [vmem:[#allocation3 + $0xca0] sm:$0xff] }
  0xb5   :  { %5148 = vmatprep.subr.bf16.mxu1 %v5147_v27  ;;  %v409_v27 = vld [vmem:[#allocation3 + $0xb50] sm:$0xff]  ;;  %v5181_v14 = vpack.c.bf16 %v432_v2, %v431_v1  ;;  %v5183_v17 = vpack.c.bf16 %v450_v7, %v449_v6  ;;  %v466_v21 = vld [vmem:[#allocation3 + $0xd18] sm:$0xff]  ;;  %v5199_v1 = vpack.c.bf16 %v458_v62, %v457_v61  ;;  %v459_v7 = vld [vmem:[#allocation3 + $0xce0] sm:$0xff] }
  0xb6   :  { %2048 = vmatmul.mubr.f32.vlgmr.msra.gmra.mrb[8].mxu0 %v5950_v55  ;;  %v389_v55 = vld [vmem:[#allocation3 + $0xab0] sm:$0xff]  ;;  %v474_v6 = vld [vmem:[#allocation3 + $0xd58] sm:$0xff] }
  0xb7   :  { %5118 = vmatpush3.bf16.msra.mxu0 %v5117_v36  ;;  %2118 = vmatmul.mubr.f32.vlgmr.msra.gmra.mrb[8].mxu1 %v5953_v58  ;;  %v5157_v58 = vpack.c.bf16 %v404_v59, %v403_v57  ;;  %v5127_v0 = vpack.c.bf16 %v390_v60, %v389_v55  ;;  %v428_v36 = vld [vmem:[#allocation3 + $0xbe8] sm:$0xff]  ;;  %v413_v57 = vld [vmem:[#allocation3 + $0xb70] sm:$0xff]  ;;  %v414_v59 = vld [vmem:[#allocation3 + $0xb78] sm:$0xff] }
  0xb8   :  { %5150 = vmatpush3.bf16.msra.mxu1 %v5149_v37  ;;  %5120 = vmatprep.subr.bf16.mxu0 %v5119_v38  ;;  %v5137_v37 = vpack.c.bf16 %v378_v26, %v377_v25  ;;  %v5169_v38 = vpack.c.bf16 %v410_v29, %v409_v27  ;;  %v5171_v43 = vpack.c.bf16 %v428_v36, %v427_v34  ;;  %v447_v55 = vld [vmem:[#allocation3 + $0xc80] sm:$0xff]  ;;  %v448_v60 = vld [vmem:[#allocation3 + $0xc88] sm:$0xff]  ;;  %v441_v2 = vld [vmem:[#allocation3 + $0xc50] sm:$0xff] }
  0xb9   :  { %5152 = vmatprep.subr.bf16.mxu1 %v5151_v41  ;;  %2187 = vmatprep.mubr.f32.mxu0 %v1187_v46  ;;  %v411_v41 = vld [vmem:[#allocation3 + $0xb60] sm:$0xff]  ;;  %v398_v46 = vld [vmem:[#allocation3 + $0xaf8] sm:$0xff]  ;;  %v5179_v45 = vpack.c.bf16 %v448_v60, %v447_v55  ;;  %v484_v25 = vld [vmem:[#allocation3 + $0xda8] sm:$0xff] }
  0xba   :  { %2257 = vmatprep.mubr.f32.mxu1 %v1188_v49  ;;  %v5141_v49 = vpack.c.bf16 %v380_v40, %v379_v39  ;;  %v467_v34 = vld [vmem:[#allocation3 + $0xd20] sm:$0xff]  ;;  %v486_v39 = vld [vmem:[#allocation3 + $0xdb8] sm:$0xff]  ;;  %v5189_v40 = vpack.c.bf16 %v436_v32, %v435_v30  ;;  %v472_v60 = vld [vmem:[#allocation3 + $0xd48] sm:$0xff] }
  0xbb   :  { %5122 = vmatpush3.bf16.msra.mxu0 %v5121_v50  ;;  %v37_v50 = vld [vmem:[%s6155_s0 + $0x30] sm:$0xff]  ;;  %v446_v32 = vld [vmem:[#allocation3 + $0xc78] sm:$0xff] }
  0xbc   :  { %5154 = vmatpush3.bf16.msra.mxu1 %v5153_v51  ;;  %5124 = vmatprep.subr.bf16.mxu0 %v5123_v53  ;;  %v5173_v51 = vpack.c.bf16 %v412_v52, %v411_v41  ;;  %v5143_v53 = vpack.c.bf16 %v398_v46, %v397_v44  ;;  %v5980_v8 = vrot.slane %v37_v50, %v5896_v13  ;;  %v438_v52 = vld [vmem:[#allocation3 + $0xc38] sm:$0xff]  ;;  %v469_v44 = vld [vmem:[#allocation3 + $0xd30] sm:$0xff] }
  0xbd   :  { %5156 = vmatprep.subr.bf16.mxu1 %v5155_v33  ;;  %v5175_v33 = vpack.c.bf16 %v430_v48, %v429_v47  ;;  %v470_v47 = vld [vmem:[#allocation3 + $0xd38] sm:$0xff]  ;;  %v455_v48 = vld [vmem:[#allocation3 + $0xcc0] sm:$0xff]  ;;  %v445_v30 = vld [vmem:[#allocation3 + $0xc70] sm:$0xff] }
  0xbe   :  { %v529_v61 = vld [vmem:[#allocation3 + $0xf10] sm:$0xff] }
  0xbf   :  { %5126 = vmatpush3.bf16.msra.mxu0 %v5125_v63  ;;  %v1189_v63 = vcombine.high %v37_v50, %v37_v50  ;;  %v487_v50 = vld [vmem:[#allocation3 + $0xdc0] sm:$0xff] }
  0xc0   :  { %5158 = vmatpush3.bf16.msra.mxu1 %v5157_v58  ;;  %5128 = vmatprep.subr.bf16.mxu0 %v5127_v0  ;;  %v5145_v58 = vpack.c.bf16 %v382_v56, %v381_v54  ;;  %v5177_v0 = vpack.c.bf16 %v414_v59, %v413_v57  ;;  %v5225_v54 = vpack.c.bf16 %v470_v47, %v469_v44  ;;  %v439_v57 = vld [vmem:[#allocation3 + $0xc40] sm:$0xff]  ;;  %v496_v44 = vld [vmem:[#allocation3 + $0xe08] sm:$0xff] }
  0xc1   :  { %5160 = vmatprep.subr.bf16.mxu1 %v5159_v3  ;;  %v463_v3 = vld [vmem:[#allocation3 + $0xd00] sm:$0xff] }
  0xc2   :  { %v5213_v16 = vpack.c.bf16 %v464_v5, %v463_v3  ;;  %v471_v59 = vld [vmem:[#allocation3 + $0xd40] sm:$0xff]  ;;  %v442_v3 = vld [vmem:[#allocation3 + $0xc58] sm:$0xff] }
  0xc3   :  { %5130 = vmatpush3.bf16.msra.mxu0 %v5129_v9  ;;  %v481_v9 = vld [vmem:[#allocation3 + $0xd90] sm:$0xff] }
  0xc4   :  { %5162 = vmatpush3.bf16.msra.mxu1 %v5161_v10  ;;  %5132 = vmatprep.subr.bf16.mxu0 %v5131_v12  ;;  %v482_v10 = vld [vmem:[#allocation3 + $0xd98] sm:$0xff]  ;;  %v5983_v12 = vrot.slane %v1189_v63, %v5896_v13  ;;  %v489_v63 = vld [vmem:[#allocation3 + $0xdd0] sm:$0xff] }
  0xc5   :  { %5164 = vmatprep.subr.bf16.mxu1 %v5163_v11  ;;  %v433_v11 = vld [vmem:[#allocation3 + $0xc10] sm:$0xff]  ;;  %v5215_v20 = vpack.c.bf16 %v482_v10, %v481_v9  ;;  %v460_v9 = vld [vmem:[#allocation3 + $0xce8] sm:$0xff]  ;;  %v491_v10 = vld [vmem:[#allocation3 + $0xde0] sm:$0xff] }
  0xc6   :  { %v1205_v26 = vcombine.high %v5983_v12, %v5983_v12  ;;  %v5185_v27 = vpack.c.bf16 %v434_v18, %v433_v11  ;;  %v5203_v11 = vpack.c.bf16 %v460_v9, %v459_v7  ;;  %v443_v18 = vld [vmem:[#allocation3 + $0xc60] sm:$0xff]  ;;  %v500_v9 = vld [vmem:[#allocation3 + $0xe28] sm:$0xff] }
  0xc7   :  { %5134 = vmatpush3.bf16.msra.mxu0 %v5133_v22  ;;  %v452_v22 = vld [vmem:[#allocation3 + $0xca8] sm:$0xff]  ;;  %v499_v7 = vld [vmem:[#allocation3 + $0xe20] sm:$0xff] }
  0xc8   :  { %5166 = vmatpush3.bf16.msra.mxu1 %v5165_v23  ;;  %5136 = vmatprep.subr.bf16.mxu0 %v5135_v24  ;;  %v1204_v23 = vcombine.high %v5980_v8, %v5980_v8  ;;  %v483_v24 = vld [vmem:[#allocation3 + $0xda0] sm:$0xff]  ;;  %v5187_v29 = vpack.c.bf16 %v452_v22, %v451_v15  ;;  %v476_v15 = vld [vmem:[#allocation3 + $0xd68] sm:$0xff]  ;;  %v461_v22 = vld [vmem:[#allocation3 + $0xcf0] sm:$0xff] }
  0xc9   :  { %5168 = vmatprep.subr.bf16.mxu1 %v5167_v28  ;;  %v5217_v28 = vpack.c.bf16 %v466_v21, %v465_v19  ;;  %v5219_v36 = vpack.c.bf16 %v484_v25, %v483_v24  ;;  %v444_v19 = vld [vmem:[#allocation3 + $0xc68] sm:$0xff]  ;;  %v493_v24 = vld [vmem:[#allocation3 + $0xdf0] sm:$0xff]  ;;  %v494_v25 = vld [vmem:[#allocation3 + $0xdf8] sm:$0xff] }
  0xcb   :  { %5138 = vmatpush3.bf16.msra.mxu0 %v5137_v37  ;;  %v468_v37 = vld [vmem:[#allocation3 + $0xd28] sm:$0xff] }
  0xcc   :  { %5170 = vmatpush3.bf16.msra.mxu1 %v5169_v38  ;;  %5140 = vmatprep.subr.bf16.mxu0 %v5139_v42  ;;  %v454_v38 = vld [vmem:[#allocation3 + $0xcb8] sm:$0xff]  ;;  %v485_v42 = vld [vmem:[#allocation3 + $0xdb0] sm:$0xff] }
  0xcd   :  { %5172 = vmatprep.subr.bf16.mxu1 %v5171_v43  ;;  %v437_v43 = vld [vmem:[#allocation3 + $0xc30] sm:$0xff]  ;;  %v5223_v46 = vpack.c.bf16 %v486_v39, %v485_v42  ;;  %v543_v42 = vld [vmem:[#allocation3 + $0xf80] sm:$0xff]  ;;  %v544_v39 = vld [vmem:[#allocation3 + $0xf88] sm:$0xff] }
  0xce   :  { %v5275_v47 = vpack.c.bf16 %v544_v39, %v543_v42  ;;  %v521_v42 = vld [vmem:[#allocation3 + $0xed0] sm:$0xff]  ;;  %v522_v39 = vld [vmem:[#allocation3 + $0xed8] sm:$0xff] }
  0xcf   :  { %5142 = vmatpush3.bf16.msra.mxu0 %v5141_v49  ;;  %v456_v49 = vld [vmem:[#allocation3 + $0xcc8] sm:$0xff] }
  0xd0   :  { %5174 = vmatpush3.bf16.msra.mxu1 %v5173_v51  ;;  %5144 = vmatprep.subr.bf16.mxu0 %v5143_v53  ;;  %v488_v51 = vld [vmem:[#allocation3 + $0xdc8] sm:$0xff]  ;;  %v5193_v53 = vpack.c.bf16 %v438_v52, %v437_v43  ;;  %v5195_v56 = vpack.c.bf16 %v456_v49, %v455_v48  ;;  %v495_v52 = vld [vmem:[#allocation3 + $0xe00] sm:$0xff]  ;;  %v513_v49 = vld [vmem:[#allocation3 + $0xe90] sm:$0xff] }
  0xd1   :  { %5176 = vmatprep.subr.bf16.mxu1 %v5175_v33  ;;  %v440_v33 = vld [vmem:[#allocation3 + $0xc48] sm:$0xff]  ;;  %v5227_v55 = vpack.c.bf16 %v488_v51, %v487_v50  ;;  %v514_v50 = vld [vmem:[#allocation3 + $0xe98] sm:$0xff] }
  0xd2   :  { %v528_v48 = vld [vmem:[#allocation3 + $0xf08] sm:$0xff] }
  0xd3   :  { %5146 = vmatpush3.bf16.msra.mxu0 %v5145_v58  ;;  %v490_v58 = vld [vmem:[#allocation3 + $0xdd8] sm:$0xff] }
  0xd4   :  { %5178 = vmatpush3.bf16.msra.mxu1 %v5177_v0  ;;  %5180 = vmatprep.subr.bf16.mxu0 %v5179_v45  ;;  %v5197_v0 = vpack.c.bf16 %v440_v33, %v439_v57  ;;  %v5229_v45 = vpack.c.bf16 %v472_v60, %v471_v59  ;;  %v5231_v5 = vpack.c.bf16 %v490_v58, %v489_v63  ;;  %v498_v60 = vld [vmem:[#allocation3 + $0xe18] sm:$0xff]  ;;  %v515_v58 = vld [vmem:[#allocation3 + $0xea0] sm:$0xff] }
  0xd5   :  { %5212 = vmatprep.subr.bf16.mxu1 %v5211_v4  ;;  %v473_v4 = vld [vmem:[#allocation3 + $0xd50] sm:$0xff]  ;;  %v5245_v57 = vpack.c.bf16 %v496_v44, %v495_v52  ;;  %v5247_v59 = vpack.c.bf16 %v514_v50, %v513_v49  ;;  %v530_v63 = vld [vmem:[#allocation3 + $0xf18] sm:$0xff]  ;;  %v5263_v52 = vpack.c.bf16 %v522_v39, %v521_v42  ;;  %v523_v50 = vld [vmem:[#allocation3 + $0xee0] sm:$0xff] }
  0xd6   :  { %2188 = vmatmul.mubr.f32.vlgmr.msra.gmra.mrb[10].mxu0 %v5965_v31  ;;  %v453_v31 = vld [vmem:[#allocation3 + $0xcb0] sm:$0xff]  ;;  %v538_v49 = vld [vmem:[#allocation3 + $0xf58] sm:$0xff] }
  0xd7   :  { %5182 = vmatpush3.bf16.msra.mxu0 %v5181_v14  ;;  %2258 = vmatmul.mubr.f32.vlgmr.msra.gmra.mrb[10].mxu1 %v5968_v35  ;;  %v5221_v35 = vpack.c.bf16 %v468_v37, %v467_v34  ;;  %v5191_v41 = vpack.c.bf16 %v454_v38, %v453_v31  ;;  %v492_v14 = vld [vmem:[#allocation3 + $0xde8] sm:$0xff]  ;;  %v477_v34 = vld [vmem:[#allocation3 + $0xd70] sm:$0xff]  ;;  %v478_v37 = vld [vmem:[#allocation3 + $0xd78] sm:$0xff] }
  0xd8   :  { %5214 = vmatpush3.bf16.msra.mxu1 %v5213_v16  ;;  %5184 = vmatprep.subr.bf16.mxu0 %v5183_v17  ;;  %v5201_v16 = vpack.c.bf16 %v442_v3, %v441_v2  ;;  %v5233_v17 = vpack.c.bf16 %v474_v6, %v473_v4  ;;  %v5235_v21 = vpack.c.bf16 %v492_v14, %v491_v10  ;;  %v511_v31 = vld [vmem:[#allocation3 + $0xe80] sm:$0xff]  ;;  %v512_v38 = vld [vmem:[#allocation3 + $0xe88] sm:$0xff]  ;;  %v505_v44 = vld [vmem:[#allocation3 + $0xe50] sm:$0xff] }
  0xd9   :  { %5216 = vmatprep.subr.bf16.mxu1 %v5215_v20  ;;  %2327 = vmatprep.mubr.f32.mxu0 %v1204_v23  ;;  %v475_v20 = vld [vmem:[#allocation3 + $0xd60] sm:$0xff]  ;;  %v462_v23 = vld [vmem:[#allocation3 + $0xcf8] sm:$0xff]  ;;  %v5243_v43 = vpack.c.bf16 %v512_v38, %v511_v31  ;;  %v548_v2 = vld [vmem:[#allocation3 + $0xfa8] sm:$0xff] }
  0xda   :  { %2397 = vmatprep.mubr.f32.mxu1 %v1205_v26  ;;  %v5205_v26 = vpack.c.bf16 %v444_v19, %v443_v18  ;;  %v531_v10 = vld [vmem:[#allocation3 + $0xf20] sm:$0xff]  ;;  %v550_v18 = vld [vmem:[#allocation3 + $0xfb8] sm:$0xff]  ;;  %v5253_v19 = vpack.c.bf16 %v500_v9, %v499_v7  ;;  %v536_v38 = vld [vmem:[#allocation3 + $0xf48] sm:$0xff] }
  0xdb   :  { %5186 = vmatpush3.bf16.msra.mxu0 %v5185_v27  ;;  %v38_v27 = vld [vmem:[%s6155_s0 + $0x38] sm:$0xff] }
  0xdc   :  { %5218 = vmatpush3.bf16.msra.mxu1 %v5217_v28  ;;  %5188 = vmatprep.subr.bf16.mxu0 %v5187_v29  ;;  %v5237_v28 = vpack.c.bf16 %v476_v15, %v475_v20  ;;  %v5207_v29 = vpack.c.bf16 %v462_v23, %v461_v22  ;;  %v5995_v51 = vrot.slane %v38_v27, %v5896_v13  ;;  %v502_v15 = vld [vmem:[#allocation3 + $0xe38] sm:$0xff]  ;;  %v533_v22 = vld [vmem:[#allocation3 + $0xf30] sm:$0xff] }
  0xdd   :  { %5220 = vmatprep.subr.bf16.mxu1 %v5219_v36  ;;  %v5239_v36 = vpack.c.bf16 %v494_v25, %v493_v24  ;;  %v534_v24 = vld [vmem:[#allocation3 + $0xf38] sm:$0xff]  ;;  %v519_v25 = vld [vmem:[#allocation3 + $0xec0] sm:$0xff] }
  0xde   :  { %v610_v42 = vld [vmem:[#allocation3 + $0x1198] sm:$0xff] }
  0xdf   :  { %5190 = vmatpush3.bf16.msra.mxu0 %v5189_v40  ;;  %v1206_v40 = vcombine.high %v38_v27, %v38_v27  ;;  %v551_v27 = vld [vmem:[#allocation3 + $0xfc0] sm:$0xff] }
  0xe0   :  { %5222 = vmatpush3.bf16.msra.mxu1 %v5221_v35  ;;  %5192 = vmatprep.subr.bf16.mxu0 %v5191_v41  ;;  %v5209_v35 = vpack.c.bf16 %v446_v32, %v445_v30  ;;  %v5241_v41 = vpack.c.bf16 %v478_v37, %v477_v34  ;;  %v5289_v30 = vpack.c.bf16 %v534_v24, %v533_v22  ;;  %v503_v34 = vld [vmem:[#allocation3 + $0xe40] sm:$0xff] }
  0xe1   :  { %5224 = vmatprep.subr.bf16.mxu1 %v5223_v46  ;;  %v527_v46 = vld [vmem:[#allocation3 + $0xf00] sm:$0xff] }
  0xe2   :  { %v5277_v33 = vpack.c.bf16 %v528_v48, %v527_v46  ;;  %v535_v37 = vld [vmem:[#allocation3 + $0xf40] sm:$0xff]  ;;  %v506_v46 = vld [vmem:[#allocation3 + $0xe58] sm:$0xff] }
  0xe3   :  { %5194 = vmatpush3.bf16.msra.mxu0 %v5193_v53  ;;  %v545_v53 = vld [vmem:[#allocation3 + $0xf90] sm:$0xff]  ;;  %v607_v22 = vld [vmem:[#allocation3 + $0x1180] sm:$0xff] }
  0xe4   :  { %5226 = vmatpush3.bf16.msra.mxu1 %v5225_v54  ;;  %5196 = vmatprep.subr.bf16.mxu0 %v5195_v56  ;;  %v546_v54 = vld [vmem:[#allocation3 + $0xf98] sm:$0xff]  ;;  %v5998_v56 = vrot.slane %v1206_v40, %v5896_v13  ;;  %v553_v40 = vld [vmem:[#allocation3 + $0xfd0] sm:$0xff] }
  0xe5   :  { %5228 = vmatprep.subr.bf16.mxu1 %v5227_v55  ;;  %v497_v55 = vld [vmem:[#allocation3 + $0xe10] sm:$0xff]  ;;  %v5279_v62 = vpack.c.bf16 %v546_v54, %v545_v53  ;;  %v524_v53 = vld [vmem:[#allocation3 + $0xee8] sm:$0xff]  ;;  %v555_v54 = vld [vmem:[#allocation3 + $0xfe0] sm:$0xff] }
  0xe6   :  { %v1222_v3 = vcombine.high %v5998_v56, %v5998_v56  ;;  %v5249_v4 = vpack.c.bf16 %v498_v60, %v497_v55  ;;  %v5267_v55 = vpack.c.bf16 %v524_v53, %v523_v50  ;;  %v507_v60 = vld [vmem:[#allocation3 + $0xe60] sm:$0xff] }
  0xe7   :  { %5198 = vmatpush3.bf16.msra.mxu0 %v5197_v0  ;;  %v516_v0 = vld [vmem:[#allocation3 + $0xea8] sm:$0xff]  ;;  %v611_v53 = vld [vmem:[#allocation3 + $0x11a0] sm:$0xff] }
  0xe8   :  { %5230 = vmatpush3.bf16.msra.mxu1 %v5229_v45  ;;  %5200 = vmatprep.subr.bf16.mxu0 %v5199_v1  ;;  %v1221_v45 = vcombine.high %v5995_v51, %v5995_v51  ;;  %v547_v1 = vld [vmem:[#allocation3 + $0xfa0] sm:$0xff]  ;;  %v5251_v6 = vpack.c.bf16 %v516_v0, %v515_v58  ;;  %v540_v0 = vld [vmem:[#allocation3 + $0xf68] sm:$0xff] }
  0xe9   :  { %5232 = vmatprep.subr.bf16.mxu1 %v5231_v5  ;;  %v5281_v5 = vpack.c.bf16 %v530_v63, %v529_v61  ;;  %v5283_v14 = vpack.c.bf16 %v548_v2, %v547_v1  ;;  %v508_v61 = vld [vmem:[#allocation3 + $0xe68] sm:$0xff]  ;;  %v526_v1 = vld [vmem:[#allocation3 + $0xef8] sm:$0xff] }
  0xea   :  { %v5269_v9 = vpack.c.bf16 %v508_v61, %v507_v60  ;;  %v563_v60 = vld [vmem:[#allocation3 + $0x1020] sm:$0xff]  ;;  %v564_v61 = vld [vmem:[#allocation3 + $0x1028] sm:$0xff] }
  0xeb   :  { %5202 = vmatpush3.bf16.msra.mxu0 %v5201_v16  ;;  %v532_v16 = vld [vmem:[#allocation3 + $0xf28] sm:$0xff] }
  0xec   :  { %5234 = vmatpush3.bf16.msra.mxu1 %v5233_v17  ;;  %5204 = vmatprep.subr.bf16.mxu0 %v5203_v11  ;;  %v518_v17 = vld [vmem:[#allocation3 + $0xeb8] sm:$0xff]  ;;  %v549_v11 = vld [vmem:[#allocation3 + $0xfb0] sm:$0xff] }
  0xed   :  { %5236 = vmatprep.subr.bf16.mxu1 %v5235_v21  ;;  %v501_v21 = vld [vmem:[#allocation3 + $0xe30] sm:$0xff]  ;;  %v5287_v23 = vpack.c.bf16 %v550_v18, %v549_v11  ;;  %v510_v11 = vld [vmem:[#allocation3 + $0xe78] sm:$0xff] }
  0xee   :  { %v541_v18 = vld [vmem:[#allocation3 + $0xf70] sm:$0xff] }
  0xef   :  { %5206 = vmatpush3.bf16.msra.mxu0 %v5205_v26  ;;  %v520_v26 = vld [vmem:[#allocation3 + $0xec8] sm:$0xff] }
  0xf0   :  { %5238 = vmatpush3.bf16.msra.mxu1 %v5237_v28  ;;  %5208 = vmatprep.subr.bf16.mxu0 %v5207_v29  ;;  %v552_v28 = vld [vmem:[#allocation3 + $0xfc8] sm:$0xff]  ;;  %v5257_v29 = vpack.c.bf16 %v502_v15, %v501_v21  ;;  %v5259_v32 = vpack.c.bf16 %v520_v26, %v519_v25 }
  0xf1   :  { %5240 = vmatprep.subr.bf16.mxu1 %v5239_v36  ;;  %v504_v36 = vld [vmem:[#allocation3 + $0xe48] sm:$0xff]  ;;  %v5291_v31 = vpack.c.bf16 %v552_v28, %v551_v27  ;;  %v559_v28 = vld [vmem:[#allocation3 + $0x1000] sm:$0xff] }
  0xf2   :  { %v576_v21 = vld [vmem:[#allocation3 + $0x1088] sm:$0xff] }
  0xf3   :  { %5210 = vmatpush3.bf16.msra.mxu0 %v5209_v35  ;;  %v554_v35 = vld [vmem:[#allocation3 + $0xfd8] sm:$0xff] }
  0xf4   :  { %5242 = vmatpush3.bf16.msra.mxu1 %v5241_v41  ;;  %5244 = vmatprep.subr.bf16.mxu0 %v5243_v43  ;;  %v5261_v41 = vpack.c.bf16 %v504_v36, %v503_v34  ;;  %v5293_v43 = vpack.c.bf16 %v536_v38, %v535_v37  ;;  %v5295_v48 = vpack.c.bf16 %v554_v35, %v553_v40  ;;  %v592_v34 = vld [vmem:[#allocation3 + $0x1108] sm:$0xff]  ;;  %v577_v36 = vld [vmem:[#allocation3 + $0x1090] sm:$0xff]  ;;  %v578_v37 = vld [vmem:[#allocation3 + $0x1098] sm:$0xff] }
  0xf5   :  { %5276 = vmatprep.subr.bf16.mxu1 %v5275_v47  ;;  %v537_v47 = vld [vmem:[#allocation3 + $0xf50] sm:$0xff] }
  0xf6   :  { %2328 = vmatmul.mubr.f32.vlgmr.msra.gmra.mrb[12].mxu0 %v5980_v8  ;;  %v517_v8 = vld [vmem:[#allocation3 + $0xeb0] sm:$0xff] }
  0xf7   :  { %5246 = vmatpush3.bf16.msra.mxu0 %v5245_v57  ;;  %2398 = vmatmul.mubr.f32.vlgmr.msra.gmra.mrb[12].mxu1 %v5983_v12  ;;  %v5285_v12 = vpack.c.bf16 %v532_v16, %v531_v10  ;;  %v5255_v20 = vpack.c.bf16 %v518_v17, %v517_v8  ;;  %v556_v57 = vld [vmem:[#allocation3 + $0xfe8] sm:$0xff]  ;;  %v39_v10 = vld [vmem:[%s6155_s0 + $0x40] sm:$0xff]  ;;  %v509_v17 = vld [vmem:[#allocation3 + $0xe70] sm:$0xff] }
  0xf8   :  { %5278 = vmatpush3.bf16.msra.mxu1 %v5277_v33  ;;  %5248 = vmatprep.subr.bf16.mxu0 %v5247_v59  ;;  %v5265_v33 = vpack.c.bf16 %v506_v46, %v505_v44  ;;  %v5297_v59 = vpack.c.bf16 %v538_v49, %v537_v47  ;;  %v5299_v58 = vpack.c.bf16 %v556_v57, %v555_v54  ;;  %v609_v38 = vld [vmem:[#allocation3 + $0x1190] sm:$0xff]  ;;  %v594_v47 = vld [vmem:[#allocation3 + $0x1118] sm:$0xff]  ;;  %v580_v49 = vld [vmem:[#allocation3 + $0x10a8] sm:$0xff] }
  0xf9   :  { %5280 = vmatprep.subr.bf16.mxu1 %v5279_v62  ;;  %2467 = vmatprep.mubr.f32.mxu0 %v1221_v45  ;;  %v539_v62 = vld [vmem:[#allocation3 + $0xf60] sm:$0xff]  ;;  %v525_v45 = vld [vmem:[#allocation3 + $0xef0] sm:$0xff]  ;;  %v1223_v24 = vcombine.high %v39_v10, %v39_v10  ;;  %v5273_v25 = vpack.c.bf16 %v510_v11, %v509_v17  ;;  %v5343_v46 = vpack.c.bf16 %v610_v42, %v609_v38  ;;  %v612_v54 = vld [vmem:[#allocation3 + $0x11a8] sm:$0xff] }
  0xfa   :  { %2537 = vmatprep.mubr.f32.mxu1 %v1222_v3  ;;  %v5301_v16 = vpack.c.bf16 %v540_v0, %v539_v62  ;;  %v5271_v8 = vpack.c.bf16 %v526_v1, %v525_v45  ;;  %v593_v44 = vld [vmem:[#allocation3 + $0x1110] sm:$0xff]  ;;  %v595_v62 = vld [vmem:[#allocation3 + $0x1120] sm:$0xff]  ;;  %v582_v0 = vld [vmem:[#allocation3 + $0x10b8] sm:$0xff] }
  0xfb   :  { %5250 = vmatpush3.bf16.msra.mxu0 %v5249_v4  ;;  %v557_v4 = vld [vmem:[#allocation3 + $0xff0] sm:$0xff]  ;;  %v6015_v39 = vrot.slane %v1223_v24, %v5896_v13  ;;  %v614_v1 = vld [vmem:[#allocation3 + $0x11b8] sm:$0xff]  ;;  %v587_v38 = vld [vmem:[#allocation3 + $0x10e0] sm:$0xff] }
  0xfc   :  { %5282 = vmatpush3.bf16.msra.mxu1 %v5281_v5  ;;  %5252 = vmatprep.subr.bf16.mxu0 %v5251_v6  ;;  %v558_v5 = vld [vmem:[#allocation3 + $0xff8] sm:$0xff]  ;;  %v613_v45 = vld [vmem:[#allocation3 + $0x11b0] sm:$0xff]  ;;  %v588_v42 = vld [vmem:[#allocation3 + $0x10e8] sm:$0xff] }
  0xfd   :  { %5284 = vmatprep.subr.bf16.mxu1 %v5283_v14  ;;  %v1239_v57 = vcombine.high %v6015_v39, %v6015_v39  ;;  %v586_v24 = vld [vmem:[#allocation3 + $0x10d8] sm:$0xff] }
  0xff   :  { %5254 = vmatpush3.bf16.msra.mxu0 %v5253_v19  ;;  %v5303_v19 = vpack.c.bf16 %v558_v5, %v557_v4  ;;  %v565_v4 = vld [vmem:[#allocation3 + $0x1030] sm:$0xff]  ;;  %v566_v5 = vld [vmem:[#allocation3 + $0x1038] sm:$0xff] }
 0x100   :  { %5286 = vmatpush3.bf16.msra.mxu1 %v5285_v12  ;;  %5256 = vmatprep.subr.bf16.mxu0 %v5255_v20  ;;  %v542_v12 = vld [vmem:[#allocation3 + $0xf78] sm:$0xff]  ;;  %v575_v20 = vld [vmem:[#allocation3 + $0x1080] sm:$0xff]  ;;  %v5321_v17 = vpack.c.bf16 %v566_v5, %v565_v4 }
 0x101   :  { %5288 = vmatprep.subr.bf16.mxu1 %v5287_v23  ;;  %v608_v23 = vld [vmem:[#allocation3 + $0x1188] sm:$0xff]  ;;  %v5305_v26 = vpack.c.bf16 %v542_v12, %v541_v18  ;;  %v5307_v27 = vpack.c.bf16 %v576_v21, %v575_v20  ;;  %v599_v20 = vld [vmem:[#allocation3 + $0x1140] sm:$0xff]  ;;  %v606_v4 = vld [vmem:[#allocation3 + $0x1178] sm:$0xff] }
 0x102   :  { %v568_v12 = vld [vmem:[#allocation3 + $0x1048] sm:$0xff]  ;;  %v639_v5 = vld [vmem:[#allocation3 + $0x1280] sm:$0xff] }
 0x103   :  { %5258 = vmatpush3.bf16.msra.mxu0 %v5257_v29  ;;  %v560_v29 = vld [vmem:[#allocation3 + $0x1008] sm:$0xff] }
 0x104   :  { %5290 = vmatpush3.bf16.msra.mxu1 %v5289_v30  ;;  %5260 = vmatprep.subr.bf16.mxu0 %v5259_v32  ;;  %v591_v30 = vld [vmem:[#allocation3 + $0x1100] sm:$0xff]  ;;  %v5339_v32 = vpack.c.bf16 %v608_v23, %v607_v22  ;;  %v5309_v40 = vpack.c.bf16 %v560_v29, %v559_v28  ;;  %v600_v22 = vld [vmem:[#allocation3 + $0x1148] sm:$0xff]  ;;  %v585_v23 = vld [vmem:[#allocation3 + $0x10d0] sm:$0xff] }
 0x105   :  { %5292 = vmatprep.subr.bf16.mxu1 %v5291_v31  ;;  %v6012_v31 = vrot.slane %v39_v10, %v5896_v13  ;;  %v5341_v35 = vpack.c.bf16 %v592_v34, %v591_v30  ;;  %v583_v10 = vld [vmem:[#allocation3 + $0x10c0] sm:$0xff]  ;;  %v5357_v28 = vpack.c.bf16 %v600_v22, %v599_v20  ;;  %v5327_v29 = vpack.c.bf16 %v586_v24, %v585_v23  ;;  %v569_v30 = vld [vmem:[#allocation3 + $0x1050] sm:$0xff]  ;;  %v674_v24 = vld [vmem:[#allocation3 + $0x1398] sm:$0xff] }
 0x106   :  { %v601_v34 = vld [vmem:[#allocation3 + $0x1150] sm:$0xff] }
 0x107   :  { %5262 = vmatpush3.bf16.msra.mxu0 %v5261_v41  ;;  %v5311_v41 = vpack.c.bf16 %v578_v37, %v577_v36  ;;  %v1238_v50 = vcombine.high %v6012_v31, %v6012_v31  ;;  %v602_v37 = vld [vmem:[#allocation3 + $0x1158] sm:$0xff]  ;;  %v641_v20 = vld [vmem:[#allocation3 + $0x1290] sm:$0xff] }
 0x108   :  { %5294 = vmatpush3.bf16.msra.mxu1 %v5293_v43  ;;  %5264 = vmatprep.subr.bf16.mxu0 %v5263_v52  ;;  %v561_v43 = vld [vmem:[#allocation3 + $0x1010] sm:$0xff]  ;;  %v562_v52 = vld [vmem:[#allocation3 + $0x1018] sm:$0xff] }
 0x109   :  { %v3707_v63 = vpop.f32.mrb[0].mxu0  ;;  %5296 = vmatprep.subr.bf16.mxu1 %v5295_v48  ;;  %v579_v48 = vld [vmem:[#allocation3 + $0x10a0] sm:$0xff]  ;;  %v673_v23 = vld [vmem:[#allocation3 + $0x1390] sm:$0xff] }
 0x10a   :  { %v3742_v2 = vpop.f32.mrb[0].mxu1  ;;  %v3708_v3 = vpop.f32.mrb[1].mxu0 }
 0x10b   :  { %v3709_v6 = vadd.f32 %v3708_v3, %v3707_v63  ;;  %v3743_v7 = vpop.f32.mrb[1].mxu1  ;;  %5266 = vmatpush3.bf16.msra.mxu0 %v5265_v33  ;;  %v5313_v33 = vpack.c.bf16 %v562_v52, %v561_v43  ;;  %v5347_v63 = vpack.c.bf16 %v612_v54, %v611_v53  ;;  %v5361_v43 = vpack.c.bf16 %v602_v37, %v601_v34  ;;  %v589_v53 = vld [vmem:[#allocation3 + $0x10f0] sm:$0xff]  ;;  %v590_v54 = vld [vmem:[#allocation3 + $0x10f8] sm:$0xff]  ;;  %v643_v37 = vld [vmem:[#allocation3 + $0x12a0] sm:$0xff] }
 0x10c   :  { %v3744_v14 = vadd.f32 %v3743_v7, %v3742_v2  ;;  %5298 = vmatpush3.bf16.msra.mxu1 %v5297_v59  ;;  %5268 = vmatprep.subr.bf16.mxu0 %v5267_v55  ;;  %v5345_v59 = vpack.c.bf16 %v594_v47, %v593_v44  ;;  %v5315_v55 = vpack.c.bf16 %v580_v49, %v579_v48  ;;  %v571_v44 = vld [vmem:[#allocation3 + $0x1060] sm:$0xff] }
 0x10d   :  { %5300 = vmatprep.subr.bf16.mxu1 %v5299_v58  ;;  %v596_v58 = vld [vmem:[#allocation3 + $0x1128] sm:$0xff]  ;;  %v5317_v2 = vpack.c.bf16 %v564_v61, %v563_v60  ;;  %v5351_v7 = vpack.c.bf16 %v614_v1, %v613_v45  ;;  %v5331_v52 = vpack.c.bf16 %v588_v42, %v587_v38  ;;  %v603_v47 = vld [vmem:[#allocation3 + $0x1160] sm:$0xff]  ;;  %v573_v45 = vld [vmem:[#allocation3 + $0x1070] sm:$0xff]  ;;  %v5407_v34 = vpack.c.bf16 %v674_v24, %v673_v23 }
 0x10e   :  { %v6009_v15 = vadd.f32 %v3744_v14, %v3709_v6  ;;  %v597_v6 = vld [vmem:[#allocation3 + $0x1130] sm:$0xff]  ;;  %v584_v14 = vld [vmem:[#allocation3 + $0x10c8] sm:$0xff]  ;;  %v574_v1 = vld [vmem:[#allocation3 + $0x1078] sm:$0xff] }
 0x10f   :  { %5270 = vmatpush3.bf16.msra.mxu0 %v5269_v9  ;;  %v598_v9 = vld [vmem:[#allocation3 + $0x1138] sm:$0xff]  ;;  %v5323_v18 = vpack.c.bf16 %v584_v14, %v583_v10  ;;  %v644_v38 = vld [vmem:[#allocation3 + $0x12a8] sm:$0xff]  ;;  %v651_v23 = vld [vmem:[#allocation3 + $0x12e0] sm:$0xff] }
 0x110   :  { %5302 = vmatpush3.bf16.msra.mxu1 %v5301_v16  ;;  %5272 = vmatprep.subr.bf16.mxu0 %v5271_v8  ;;  %v615_v16 = vld [vmem:[#allocation3 + $0x11c0] sm:$0xff]  ;;  %v616_v8 = vld [vmem:[#allocation3 + $0x11c8] sm:$0xff]  ;;  %v5353_v11 = vpack.c.bf16 %v598_v9, %v597_v6 }
 0x111   :  { %5304 = vmatprep.subr.bf16.mxu1 %v5303_v19  ;;  %v567_v19 = vld [vmem:[#allocation3 + $0x1040] sm:$0xff]  ;;  %v5355_v21 = vpack.c.bf16 %v616_v8, %v615_v16  ;;  %v640_v6 = vld [vmem:[#allocation3 + $0x1288] sm:$0xff]  ;;  %v5337_v16 = vpack.c.bf16 %v574_v1, %v573_v45 }
 0x112   :  { %v672_v9 = vld [vmem:[#allocation3 + $0x1388] sm:$0xff] }
 0x113   :  { %5274 = vmatpush3.bf16.msra.mxu0 %v5273_v25  ;;  %v617_v25 = vld [vmem:[#allocation3 + $0x11d0] sm:$0xff]  ;;  %v680_v45 = vld [vmem:[#allocation3 + $0x13c8] sm:$0xff] }
 0x114   :  { %5306 = vmatpush3.bf16.msra.mxu1 %v5305_v26  ;;  %5308 = vmatprep.subr.bf16.mxu0 %v5307_v27  ;;  %v618_v26 = vld [vmem:[#allocation3 + $0x11d8] sm:$0xff]  ;;  %v5325_v27 = vpack.c.bf16 %v568_v12, %v567_v19  ;;  %v655_v19 = vld [vmem:[#allocation3 + $0x1300] sm:$0xff]  ;;  %v656_v12 = vld [vmem:[#allocation3 + $0x1308] sm:$0xff] }
 0x115   :  { %5340 = vmatprep.subr.bf16.mxu1 %v5339_v32  ;;  %v570_v32 = vld [vmem:[#allocation3 + $0x1058] sm:$0xff]  ;;  %v5359_v36 = vpack.c.bf16 %v618_v26, %v617_v25  ;;  %v652_v24 = vld [vmem:[#allocation3 + $0x12e8] sm:$0xff] }
 0x116   :  { %2468 = vmatmul.mubr.f32.vlgmr.msra.gmra.mrb[14].mxu0 %v5995_v51  ;;  %v581_v51 = vld [vmem:[#allocation3 + $0x10b0] sm:$0xff] }
 0x117   :  { %5310 = vmatpush3.bf16.msra.mxu0 %v5309_v40  ;;  %2538 = vmatmul.mubr.f32.vlgmr.msra.gmra.mrb[14].mxu1 %v5998_v56  ;;  %v5349_v56 = vpack.c.bf16 %v596_v58, %v595_v62  ;;  %v5319_v3 = vpack.c.bf16 %v582_v0, %v581_v51  ;;  %v619_v40 = vld [vmem:[#allocation3 + $0x11e0] sm:$0xff]  ;;  %v5335_v0 = vpack.c.bf16 %v590_v54, %v589_v53  ;;  %v646_v53 = vld [vmem:[#allocation3 + $0x12b8] sm:$0xff]  ;;  %v677_v54 = vld [vmem:[#allocation3 + $0x13b0] sm:$0xff] }
 0x118   :  { %5342 = vmatpush3.bf16.msra.mxu1 %v5341_v35  ;;  %5312 = vmatprep.subr.bf16.mxu0 %v5311_v41  ;;  %v620_v35 = vld [vmem:[#allocation3 + $0x11e8] sm:$0xff]  ;;  %v5329_v41 = vpack.c.bf16 %v570_v32, %v569_v30  ;;  %v626_v30 = vld [vmem:[#allocation3 + $0x1218] sm:$0xff]  ;;  %v657_v32 = vld [vmem:[#allocation3 + $0x1310] sm:$0xff] }
 0x119   :  { %5344 = vmatprep.subr.bf16.mxu1 %v5343_v46  ;;  %2607 = vmatprep.mubr.f32.mxu0 %v1238_v50  ;;  %v572_v46 = vld [vmem:[#allocation3 + $0x1068] sm:$0xff]  ;;  %v5363_v49 = vpack.c.bf16 %v620_v35, %v619_v40  ;;  %v675_v40 = vld [vmem:[#allocation3 + $0x13a0] sm:$0xff] }
 0x11a   :  { %2677 = vmatprep.mubr.f32.mxu1 %v1239_v57  ;;  %v604_v50 = vld [vmem:[#allocation3 + $0x1168] sm:$0xff]  ;;  %v5333_v62 = vpack.c.bf16 %v572_v46, %v571_v44  ;;  %v5379_v44 = vpack.c.bf16 %v644_v38, %v643_v37  ;;  %v627_v46 = vld [vmem:[#allocation3 + $0x1220] sm:$0xff] }
 0x11b   :  { %5314 = vmatpush3.bf16.msra.mxu0 %v5313_v33  ;;  %v5365_v51 = vpack.c.bf16 %v604_v50, %v603_v47  ;;  %v676_v35 = vld [vmem:[#allocation3 + $0x13a8] sm:$0xff] }
 0x11c   :  { %5346 = vmatpush3.bf16.msra.mxu1 %v5345_v59  ;;  %5316 = vmatprep.subr.bf16.mxu0 %v5315_v55  ;;  %v621_v59 = vld [vmem:[#allocation3 + $0x11f0] sm:$0xff]  ;;  %v622_v55 = vld [vmem:[#allocation3 + $0x11f8] sm:$0xff]  ;;  %v628_v47 = vld [vmem:[#allocation3 + $0x1228] sm:$0xff] }
 0x11d   :  { %5348 = vmatprep.subr.bf16.mxu1 %v5347_v63  ;;  %v40_v63 = vld [vmem:[%s6155_s0 + $0x48] sm:$0xff] }
 0x11e   :  { %v1240_v10 = vcombine.high %v40_v63, %v40_v63  ;;  %v6030_v22 = vrot.slane %v40_v63, %v5896_v13  ;;  %v660_v50 = vld [vmem:[#allocation3 + $0x1328] sm:$0xff]  ;;  %v662_v63 = vld [vmem:[#allocation3 + $0x1338] sm:$0xff] }
 0x11f   :  { %5318 = vmatpush3.bf16.msra.mxu0 %v5317_v2  ;;  %v605_v2 = vld [vmem:[#allocation3 + $0x1170] sm:$0xff] }
 0x120   :  { %5350 = vmatpush3.bf16.msra.mxu1 %v5349_v56  ;;  %5320 = vmatprep.subr.bf16.mxu0 %v5319_v3  ;;  %v5367_v3 = vpack.c.bf16 %v622_v55, %v621_v59  ;;  %v5369_v8 = vpack.c.bf16 %v606_v4, %v605_v2  ;;  %v6033_v25 = vrot.slane %v1240_v10, %v5896_v13  ;;  %v629_v55 = vld [vmem:[#allocation3 + $0x1230] sm:$0xff]  ;;  %v632_v4 = vld [vmem:[#allocation3 + $0x1248] sm:$0xff]  ;;  %v650_v10 = vld [vmem:[#allocation3 + $0x12d8] sm:$0xff] }
 0x121   :  { %5352 = vmatprep.subr.bf16.mxu1 %v5351_v7  ;;  %v671_v7 = vld [vmem:[#allocation3 + $0x1380] sm:$0xff]  ;;  %v1255_v42 = vcombine.high %v6030_v22, %v6030_v22 }
 0x123   :  { %5322 = vmatpush3.bf16.msra.mxu0 %v5321_v17  ;;  %v5371_v17 = vpack.c.bf16 %v640_v6, %v639_v5  ;;  %v663_v5 = vld [vmem:[#allocation3 + $0x1340] sm:$0xff] }
 0x124   :  { %5354 = vmatpush3.bf16.msra.mxu1 %v5353_v11  ;;  %5324 = vmatprep.subr.bf16.mxu0 %v5323_v18  ;;  %v623_v11 = vld [vmem:[#allocation3 + $0x1200] sm:$0xff]  ;;  %v624_v18 = vld [vmem:[#allocation3 + $0x1208] sm:$0xff] }
 0x125   :  { %5356 = vmatprep.subr.bf16.mxu1 %v5355_v21  ;;  %v642_v21 = vld [vmem:[#allocation3 + $0x1298] sm:$0xff]  ;;  %v5373_v26 = vpack.c.bf16 %v624_v18, %v623_v11 }
 0x127   :  { %5326 = vmatpush3.bf16.msra.mxu0 %v5325_v27  ;;  %v5405_v27 = vpack.c.bf16 %v656_v12, %v655_v19  ;;  %v633_v19 = vld [vmem:[#allocation3 + $0x1250] sm:$0xff] }
 0x128   :  { %5358 = vmatpush3.bf16.msra.mxu1 %v5357_v28  ;;  %5328 = vmatprep.subr.bf16.mxu0 %v5327_v29  ;;  %v5375_v28 = vpack.c.bf16 %v642_v21, %v641_v20  ;;  %v625_v29 = vld [vmem:[#allocation3 + $0x1210] sm:$0xff]  ;;  %v666_v21 = vld [vmem:[#allocation3 + $0x1358] sm:$0xff] }
 0x129   :  { %v3777_v48 = vpop.f32.mrb[2].mxu0  ;;  %5360 = vmatprep.subr.bf16.mxu1 %v5359_v36  ;;  %v658_v36 = vld [vmem:[#allocation3 + $0x1318] sm:$0xff]  ;;  %v665_v12 = vld [vmem:[#allocation3 + $0x1350] sm:$0xff] }
 0x12a   :  { %v3778_v57 = vpop.f32.mrb[3].mxu0  ;;  %v3812_v33 = vpop.f32.mrb[2].mxu1 }
 0x12b   :  { %v3779_v60 = vadd.f32 %v3778_v57, %v3777_v48  ;;  %5330 = vmatpush3.bf16.msra.mxu0 %v5329_v41  ;;  %v3813_v61 = vpop.f32.mrb[3].mxu1  ;;  %v1256_v41 = vcombine.high %v6033_v25, %v6033_v25  ;;  %v659_v48 = vld [vmem:[#allocation3 + $0x1320] sm:$0xff]  ;;  %v678_v57 = vld [vmem:[#allocation3 + $0x13b8] sm:$0xff] }
 0x12c   :  { %v3814_v58 = vadd.f32 %v3813_v61, %v3812_v33  ;;  %5362 = vmatpush3.bf16.msra.mxu1 %v5361_v43  ;;  %5332 = vmatprep.subr.bf16.mxu0 %v5331_v52  ;;  %v5377_v43 = vpack.c.bf16 %v626_v30, %v625_v29  ;;  %v5409_v52 = vpack.c.bf16 %v658_v36, %v657_v32  ;;  %v661_v61 = vld [vmem:[#allocation3 + $0x1330] sm:$0xff]  ;;  %v635_v32 = vld [vmem:[#allocation3 + $0x1260] sm:$0xff] }
 0x12d   :  { %v1630_v56 = vadd.f32 %v3779_v60, %v6009_v15  ;;  %5364 = vmatprep.subr.bf16.mxu1 %v5363_v49  ;;  %v5403_v15 = vpack.c.bf16 %v672_v9, %v671_v7  ;;  %v5411_v49 = vpack.c.bf16 %v676_v35, %v675_v40  ;;  %v5381_v33 = vpack.c.bf16 %v628_v47, %v627_v46  ;;  %v630_v60 = vld [vmem:[#allocation3 + $0x1238] sm:$0xff]  ;;  %v664_v7 = vld [vmem:[#allocation3 + $0x1348] sm:$0xff]  ;;  %v649_v9 = vld [vmem:[#allocation3 + $0x12d0] sm:$0xff] }
 0x12e   :  { %v5385_v1 = vpack.c.bf16 %v630_v60, %v629_v55  ;;  %v5417_v2 = vpack.c.bf16 %v662_v63, %v661_v61  ;;  %v5421_v11 = vpack.c.bf16 %v664_v7, %v663_v5  ;;  %v5391_v18 = vpack.c.bf16 %v650_v10, %v649_v9  ;;  %v667_v36 = vld [vmem:[#allocation3 + $0x1360] sm:$0xff]  ;;  %v653_v40 = vld [vmem:[#allocation3 + $0x12f0] sm:$0xff]  ;;  %v654_v35 = vld [vmem:[#allocation3 + $0x12f8] sm:$0xff] }
 0x12f   :  { %v6027_v14 = vadd.f32 %v3814_v58, %v1630_v56  ;;  %5334 = vmatpush3.bf16.msra.mxu0 %v5333_v62  ;;  %v5415_v62 = vpack.c.bf16 %v678_v57, %v677_v54  ;;  %v647_v58 = vld [vmem:[#allocation3 + $0x12c0] sm:$0xff]  ;;  %v5425_v29 = vpack.c.bf16 %v666_v21, %v665_v12  ;;  %v5395_v30 = vpack.c.bf16 %v652_v24, %v651_v23  ;;  %v637_v54 = vld [vmem:[#allocation3 + $0x1270] sm:$0xff]  ;;  %v638_v57 = vld [vmem:[#allocation3 + $0x1278] sm:$0xff] }
 0x130   :  { %5366 = vmatpush3.bf16.msra.mxu1 %v5365_v51  ;;  %5336 = vmatprep.subr.bf16.mxu0 %v5335_v0  ;;  %v648_v51 = vld [vmem:[#allocation3 + $0x12c8] sm:$0xff]  ;;  %v679_v0 = vld [vmem:[#allocation3 + $0x13c0] sm:$0xff]  ;;  %v670_v55 = vld [vmem:[#allocation3 + $0x1378] sm:$0xff] }
 0x131   :  { %5368 = vmatprep.subr.bf16.mxu1 %v5367_v3  ;;  %v5387_v56 = vpack.c.bf16 %v648_v51, %v647_v58  ;;  %v631_v3 = vld [vmem:[#allocation3 + $0x1240] sm:$0xff]  ;;  %v5419_v6 = vpack.c.bf16 %v680_v45, %v679_v0  ;;  %v704_v61 = vld [vmem:[#allocation3 + $0x1488] sm:$0xff]  ;;  %v5401_v0 = vpack.c.bf16 %v638_v57, %v637_v54  ;;  %v705_v5 = vld [vmem:[#allocation3 + $0x1490] sm:$0xff] }
 0x132   :  { %v703_v60 = vld [vmem:[#allocation3 + $0x1480] sm:$0xff]  ;;  %v736_v63 = vld [vmem:[#allocation3 + $0x1588] sm:$0xff]  ;;  %v737_v9 = vld [vmem:[#allocation3 + $0x1590] sm:$0xff] }
 0x133   :  { %5338 = vmatpush3.bf16.msra.mxu0 %v5337_v16  ;;  %v681_v16 = vld [vmem:[#allocation3 + $0x13d0] sm:$0xff]  ;;  %v738_v10 = vld [vmem:[#allocation3 + $0x1598] sm:$0xff]  ;;  %v707_v21 = vld [vmem:[#allocation3 + $0x14a0] sm:$0xff] }
 0x134   :  { %5370 = vmatpush3.bf16.msra.mxu1 %v5369_v8  ;;  %5372 = vmatprep.subr.bf16.mxu0 %v5371_v17  ;;  %v682_v8 = vld [vmem:[#allocation3 + $0x13d8] sm:$0xff]  ;;  %v5389_v17 = vpack.c.bf16 %v632_v4, %v631_v3  ;;  %v719_v3 = vld [vmem:[#allocation3 + $0x1500] sm:$0xff]  ;;  %v720_v4 = vld [vmem:[#allocation3 + $0x1508] sm:$0xff]  ;;  %v5471_v12 = vpack.c.bf16 %v738_v10, %v737_v9 }
 0x135   :  { %5404 = vmatprep.subr.bf16.mxu1 %v5403_v15  ;;  %v634_v15 = vld [vmem:[#allocation3 + $0x1258] sm:$0xff]  ;;  %v5423_v20 = vpack.c.bf16 %v682_v8, %v681_v16  ;;  %v708_v23 = vld [vmem:[#allocation3 + $0x14a8] sm:$0xff]  ;;  %v715_v9 = vld [vmem:[#allocation3 + $0x14e0] sm:$0xff] }
 0x136   :  { %2608 = vmatmul.mubr.f32.vlgmr.msra.gmra.mrb[16].mxu0 %v6012_v31  ;;  %v645_v31 = vld [vmem:[#allocation3 + $0x12b0] sm:$0xff]  ;;  %v744_v54 = vld [vmem:[#allocation3 + $0x15c8] sm:$0xff] }
 0x137   :  { %5374 = vmatpush3.bf16.msra.mxu0 %v5373_v26  ;;  %2678 = vmatmul.mubr.f32.vlgmr.msra.gmra.mrb[16].mxu1 %v6015_v39  ;;  %v5413_v39 = vpack.c.bf16 %v660_v50, %v659_v48  ;;  %v5383_v59 = vpack.c.bf16 %v646_v53, %v645_v31  ;;  %v683_v26 = vld [vmem:[#allocation3 + $0x13e0] sm:$0xff]  ;;  %v5399_v53 = vpack.c.bf16 %v654_v35, %v653_v40  ;;  %v710_v40 = vld [vmem:[#allocation3 + $0x14b8] sm:$0xff]  ;;  %v741_v35 = vld [vmem:[#allocation3 + $0x15b0] sm:$0xff] }
 0x138   :  { %5406 = vmatpush3.bf16.msra.mxu1 %v5405_v27  ;;  %5376 = vmatprep.subr.bf16.mxu0 %v5375_v28  ;;  %v684_v27 = vld [vmem:[#allocation3 + $0x13e8] sm:$0xff]  ;;  %v5393_v28 = vpack.c.bf16 %v634_v15, %v633_v19  ;;  %v690_v19 = vld [vmem:[#allocation3 + $0x1418] sm:$0xff]  ;;  %v721_v15 = vld [vmem:[#allocation3 + $0x1510] sm:$0xff] }
 0x139   :  { %5408 = vmatprep.subr.bf16.mxu1 %v5407_v34  ;;  %2747 = vmatprep.mubr.f32.mxu0 %v1255_v42  ;;  %v636_v34 = vld [vmem:[#allocation3 + $0x1268] sm:$0xff]  ;;  %v5427_v38 = vpack.c.bf16 %v684_v27, %v683_v26  ;;  %v739_v26 = vld [vmem:[#allocation3 + $0x15a0] sm:$0xff] }
 0x13a   :  { %2817 = vmatprep.mubr.f32.mxu1 %v1256_v41  ;;  %v668_v42 = vld [vmem:[#allocation3 + $0x1368] sm:$0xff]  ;;  %v5397_v48 = vpack.c.bf16 %v636_v34, %v635_v32  ;;  %v5443_v32 = vpack.c.bf16 %v708_v23, %v707_v21  ;;  %v691_v34 = vld [vmem:[#allocation3 + $0x1420] sm:$0xff] }
 0x13b   :  { %5378 = vmatpush3.bf16.msra.mxu0 %v5377_v43  ;;  %v5429_v31 = vpack.c.bf16 %v668_v42, %v667_v36  ;;  %v740_v27 = vld [vmem:[#allocation3 + $0x15a8] sm:$0xff] }
 0x13c   :  { %5410 = vmatpush3.bf16.msra.mxu1 %v5409_v52  ;;  %5380 = vmatprep.subr.bf16.mxu0 %v5379_v44  ;;  %v685_v52 = vld [vmem:[#allocation3 + $0x13f0] sm:$0xff]  ;;  %v686_v44 = vld [vmem:[#allocation3 + $0x13f8] sm:$0xff]  ;;  %v692_v36 = vld [vmem:[#allocation3 + $0x1428] sm:$0xff] }
 0x13d   :  { %5412 = vmatprep.subr.bf16.mxu1 %v5411_v49  ;;  %v41_v49 = vld [vmem:[%s6155_s0 + $0x50] sm:$0xff] }
 0x13e   :  { %v1257_v58 = vcombine.high %v41_v49, %v41_v49  ;;  %v6048_v7 = vrot.slane %v41_v49, %v5896_v13  ;;  %v724_v42 = vld [vmem:[#allocation3 + $0x1528] sm:$0xff]  ;;  %v726_v49 = vld [vmem:[#allocation3 + $0x1538] sm:$0xff] }
 0x13f   :  { %5382 = vmatpush3.bf16.msra.mxu0 %v5381_v33  ;;  %v669_v33 = vld [vmem:[#allocation3 + $0x1370] sm:$0xff]  ;;  %v716_v10 = vld [vmem:[#allocation3 + $0x14e8] sm:$0xff] }
 0x140   :  { %5414 = vmatpush3.bf16.msra.mxu1 %v5413_v39  ;;  %5384 = vmatprep.subr.bf16.mxu0 %v5383_v59  ;;  %v5431_v59 = vpack.c.bf16 %v686_v44, %v685_v52  ;;  %v5433_v45 = vpack.c.bf16 %v670_v55, %v669_v33  ;;  %v6051_v16 = vrot.slane %v1257_v58, %v5896_v13  ;;  %v693_v44 = vld [vmem:[#allocation3 + $0x1430] sm:$0xff]  ;;  %v696_v55 = vld [vmem:[#allocation3 + $0x1448] sm:$0xff]  ;;  %v714_v58 = vld [vmem:[#allocation3 + $0x14d8] sm:$0xff] }
 0x141   :  { %5416 = vmatprep.subr.bf16.mxu1 %v5415_v62  ;;  %v735_v62 = vld [vmem:[#allocation3 + $0x1580] sm:$0xff]  ;;  %v1272_v24 = vcombine.high %v6048_v7, %v6048_v7 }
 0x143   :  { %5386 = vmatpush3.bf16.msra.mxu0 %v5385_v1  ;;  %v5435_v1 = vpack.c.bf16 %v704_v61, %v703_v60  ;;  %v727_v60 = vld [vmem:[#allocation3 + $0x1540] sm:$0xff] }
 0x144   :  { %5418 = vmatpush3.bf16.msra.mxu1 %v5417_v2  ;;  %5388 = vmatprep.subr.bf16.mxu0 %v5387_v56  ;;  %v687_v2 = vld [vmem:[#allocation3 + $0x1400] sm:$0xff]  ;;  %v688_v56 = vld [vmem:[#allocation3 + $0x1408] sm:$0xff] }
 0x145   :  { %5420 = vmatprep.subr.bf16.mxu1 %v5419_v6  ;;  %v706_v6 = vld [vmem:[#allocation3 + $0x1498] sm:$0xff]  ;;  %v5437_v8 = vpack.c.bf16 %v688_v56, %v687_v2 }
 0x147   :  { %5390 = vmatpush3.bf16.msra.mxu0 %v5389_v17  ;;  %v5469_v17 = vpack.c.bf16 %v720_v4, %v719_v3  ;;  %v697_v3 = vld [vmem:[#allocation3 + $0x1450] sm:$0xff] }
 0x148   :  { %5422 = vmatpush3.bf16.msra.mxu1 %v5421_v11  ;;  %5392 = vmatprep.subr.bf16.mxu0 %v5391_v18  ;;  %v5439_v11 = vpack.c.bf16 %v706_v6, %v705_v5  ;;  %v689_v18 = vld [vmem:[#allocation3 + $0x1410] sm:$0xff]  ;;  %v730_v6 = vld [vmem:[#allocation3 + $0x1558] sm:$0xff] }
 0x149   :  { %v3847_v37 = vpop.f32.mrb[4].mxu0  ;;  %5424 = vmatprep.subr.bf16.mxu1 %v5423_v20  ;;  %v722_v20 = vld [vmem:[#allocation3 + $0x1518] sm:$0xff]  ;;  %v729_v4 = vld [vmem:[#allocation3 + $0x1550] sm:$0xff] }
 0x14a   :  { %v3848_v41 = vpop.f32.mrb[5].mxu0  ;;  %v3882_v43 = vpop.f32.mrb[4].mxu1 }
 0x14b   :  { %v3849_v46 = vadd.f32 %v3848_v41, %v3847_v37  ;;  %5394 = vmatpush3.bf16.msra.mxu0 %v5393_v28  ;;  %v3883_v47 = vpop.f32.mrb[5].mxu1  ;;  %v1273_v28 = vcombine.high %v6051_v16, %v6051_v16  ;;  %v723_v37 = vld [vmem:[#allocation3 + $0x1520] sm:$0xff]  ;;  %v742_v41 = vld [vmem:[#allocation3 + $0x15b8] sm:$0xff] }
 0x14c   :  { %v3884_v50 = vadd.f32 %v3883_v47, %v3882_v43  ;;  %5426 = vmatpush3.bf16.msra.mxu1 %v5425_v29  ;;  %5396 = vmatprep.subr.bf16.mxu0 %v5395_v30  ;;  %v5441_v29 = vpack.c.bf16 %v690_v19, %v689_v18  ;;  %v5473_v30 = vpack.c.bf16 %v722_v20, %v721_v15  ;;  %v725_v47 = vld [vmem:[#allocation3 + $0x1530] sm:$0xff]  ;;  %v699_v15 = vld [vmem:[#allocation3 + $0x1460] sm:$0xff] }
 0x14d   :  { %v1770_v39 = vadd.f32 %v3849_v46, %v6027_v14  ;;  %5428 = vmatprep.subr.bf16.mxu1 %v5427_v38  ;;  %v5467_v14 = vpack.c.bf16 %v736_v63, %v735_v62  ;;  %v5475_v38 = vpack.c.bf16 %v740_v27, %v739_v26  ;;  %v5445_v43 = vpack.c.bf16 %v692_v36, %v691_v34  ;;  %v694_v46 = vld [vmem:[#allocation3 + $0x1438] sm:$0xff]  ;;  %v728_v62 = vld [vmem:[#allocation3 + $0x1548] sm:$0xff]  ;;  %v713_v63 = vld [vmem:[#allocation3 + $0x14d0] sm:$0xff] }
 0x14e   :  { %v5449_v57 = vpack.c.bf16 %v694_v46, %v693_v44  ;;  %v5481_v33 = vpack.c.bf16 %v726_v49, %v725_v47  ;;  %v5485_v2 = vpack.c.bf16 %v728_v62, %v727_v60  ;;  %v5455_v56 = vpack.c.bf16 %v714_v58, %v713_v63  ;;  %v731_v20 = vld [vmem:[#allocation3 + $0x1560] sm:$0xff]  ;;  %v717_v26 = vld [vmem:[#allocation3 + $0x14f0] sm:$0xff]  ;;  %v718_v27 = vld [vmem:[#allocation3 + $0x14f8] sm:$0xff] }
 0x14f   :  { %v6045_v51 = vadd.f32 %v3884_v50, %v1770_v39  ;;  %5398 = vmatpush3.bf16.msra.mxu0 %v5397_v48  ;;  %v5479_v48 = vpack.c.bf16 %v742_v41, %v741_v35  ;;  %v711_v50 = vld [vmem:[#allocation3 + $0x14c0] sm:$0xff]  ;;  %v5489_v18 = vpack.c.bf16 %v730_v6, %v729_v4  ;;  %v5459_v19 = vpack.c.bf16 %v716_v10, %v715_v9  ;;  %v701_v35 = vld [vmem:[#allocation3 + $0x1470] sm:$0xff]  ;;  %v702_v41 = vld [vmem:[#allocation3 + $0x1478] sm:$0xff] }
 0x150   :  { %5430 = vmatpush3.bf16.msra.mxu1 %v5429_v31  ;;  %5400 = vmatprep.subr.bf16.mxu0 %v5399_v53  ;;  %v712_v31 = vld [vmem:[#allocation3 + $0x14c8] sm:$0xff]  ;;  %v743_v53 = vld [vmem:[#allocation3 + $0x15c0] sm:$0xff]  ;;  %v734_v44 = vld [vmem:[#allocation3 + $0x1578] sm:$0xff] }
 0x151   :  { %5432 = vmatprep.subr.bf16.mxu1 %v5431_v59  ;;  %v5451_v39 = vpack.c.bf16 %v712_v31, %v711_v50  ;;  %v695_v59 = vld [vmem:[#allocation3 + $0x1440] sm:$0xff]  ;;  %v5483_v61 = vpack.c.bf16 %v744_v54, %v743_v53  ;;  %v768_v47 = vld [vmem:[#allocation3 + $0x1688] sm:$0xff]  ;;  %v5465_v53 = vpack.c.bf16 %v702_v41, %v701_v35  ;;  %v769_v60 = vld [vmem:[#allocation3 + $0x1690] sm:$0xff] }
 0x152   :  { %v767_v46 = vld [vmem:[#allocation3 + $0x1680] sm:$0xff]  ;;  %v800_v49 = vld [vmem:[#allocation3 + $0x1788] sm:$0xff]  ;;  %v801_v63 = vld [vmem:[#allocation3 + $0x1790] sm:$0xff] }
 0x153   :  { %5402 = vmatpush3.bf16.msra.mxu0 %v5401_v0  ;;  %v745_v0 = vld [vmem:[#allocation3 + $0x15d0] sm:$0xff]  ;;  %v802_v58 = vld [vmem:[#allocation3 + $0x1798] sm:$0xff]  ;;  %v771_v6 = vld [vmem:[#allocation3 + $0x16a0] sm:$0xff] }
 0x154   :  { %5434 = vmatpush3.bf16.msra.mxu1 %v5433_v45  ;;  %5436 = vmatprep.subr.bf16.mxu0 %v5435_v1  ;;  %v746_v45 = vld [vmem:[#allocation3 + $0x15d8] sm:$0xff]  ;;  %v5453_v1 = vpack.c.bf16 %v696_v55, %v695_v59  ;;  %v783_v59 = vld [vmem:[#allocation3 + $0x1700] sm:$0xff]  ;;  %v784_v55 = vld [vmem:[#allocation3 + $0x1708] sm:$0xff]  ;;  %v5535_v4 = vpack.c.bf16 %v802_v58, %v801_v63 }
 0x155   :  { %5468 = vmatprep.subr.bf16.mxu1 %v5467_v14  ;;  %v698_v14 = vld [vmem:[#allocation3 + $0x1458] sm:$0xff]  ;;  %v5487_v5 = vpack.c.bf16 %v746_v45, %v745_v0  ;;  %v772_v9 = vld [vmem:[#allocation3 + $0x16a8] sm:$0xff]  ;;  %v779_v63 = vld [vmem:[#allocation3 + $0x16e0] sm:$0xff] }
 0x156   :  { %2748 = vmatmul.mubr.f32.vlgmr.msra.gmra.mrb[18].mxu0 %v6030_v22  ;;  %v709_v22 = vld [vmem:[#allocation3 + $0x14b0] sm:$0xff]  ;;  %v808_v35 = vld [vmem:[#allocation3 + $0x17c8] sm:$0xff] }
 0x157   :  { %5438 = vmatpush3.bf16.msra.mxu0 %v5437_v8  ;;  %2818 = vmatmul.mubr.f32.vlgmr.msra.gmra.mrb[18].mxu1 %v6033_v25  ;;  %v5477_v25 = vpack.c.bf16 %v724_v42, %v723_v37  ;;  %v5447_v52 = vpack.c.bf16 %v710_v40, %v709_v22  ;;  %v747_v8 = vld [vmem:[#allocation3 + $0x15e0] sm:$0xff]  ;;  %v5463_v40 = vpack.c.bf16 %v718_v27, %v717_v26  ;;  %v774_v26 = vld [vmem:[#allocation3 + $0x16b8] sm:$0xff]  ;;  %v805_v27 = vld [vmem:[#allocation3 + $0x17b0] sm:$0xff] }
 0x158   :  { %5470 = vmatpush3.bf16.msra.mxu1 %v5469_v17  ;;  %5440 = vmatprep.subr.bf16.mxu0 %v5439_v11  ;;  %v748_v17 = vld [vmem:[#allocation3 + $0x15e8] sm:$0xff]  ;;  %v5457_v11 = vpack.c.bf16 %v698_v14, %v697_v3  ;;  %v754_v3 = vld [vmem:[#allocation3 + $0x1618] sm:$0xff]  ;;  %v785_v14 = vld [vmem:[#allocation3 + $0x1710] sm:$0xff] }
 0x159   :  { %5472 = vmatprep.subr.bf16.mxu1 %v5471_v12  ;;  %2887 = vmatprep.mubr.f32.mxu0 %v1272_v24  ;;  %v700_v12 = vld [vmem:[#allocation3 + $0x1468] sm:$0xff]  ;;  %v5491_v23 = vpack.c.bf16 %v748_v17, %v747_v8  ;;  %v803_v8 = vld [vmem:[#allocation3 + $0x17a0] sm:$0xff] }
 0x15a   :  { %2957 = vmatprep.mubr.f32.mxu1 %v1273_v28  ;;  %v732_v24 = vld [vmem:[#allocation3 + $0x1568] sm:$0xff]  ;;  %v5461_v37 = vpack.c.bf16 %v700_v12, %v699_v15  ;;  %v5507_v15 = vpack.c.bf16 %v772_v9, %v771_v6  ;;  %v755_v12 = vld [vmem:[#allocation3 + $0x1620] sm:$0xff] }
 0x15b   :  { %5442 = vmatpush3.bf16.msra.mxu0 %v5441_v29  ;;  %v5493_v22 = vpack.c.bf16 %v732_v24, %v731_v20  ;;  %v804_v17 = vld [vmem:[#allocation3 + $0x17a8] sm:$0xff] }
 0x15c   :  { %5474 = vmatpush3.bf16.msra.mxu1 %v5473_v30  ;;  %5444 = vmatprep.subr.bf16.mxu0 %v5443_v32  ;;  %v749_v30 = vld [vmem:[#allocation3 + $0x15f0] sm:$0xff]  ;;  %v750_v32 = vld [vmem:[#allocation3 + $0x15f8] sm:$0xff]  ;;  %v756_v20 = vld [vmem:[#allocation3 + $0x1628] sm:$0xff] }
 0x15d   :  { %5476 = vmatprep.subr.bf16.mxu1 %v5475_v38  ;;  %v42_v38 = vld [vmem:[%s6155_s0 + $0x58] sm:$0xff]  ;;  %v788_v24 = vld [vmem:[#allocation3 + $0x1728] sm:$0xff] }
 0x15e   :  { %v1274_v50 = vcombine.high %v42_v38, %v42_v38  ;;  %v6066_v62 = vrot.slane %v42_v38, %v5896_v13  ;;  %v790_v38 = vld [vmem:[#allocation3 + $0x1738] sm:$0xff]  ;;  %v780_v58 = vld [vmem:[#allocation3 + $0x16e8] sm:$0xff] }
 0x15f   :  { %5446 = vmatpush3.bf16.msra.mxu0 %v5445_v43  ;;  %v733_v43 = vld [vmem:[#allocation3 + $0x1570] sm:$0xff] }
 0x160   :  { %5478 = vmatpush3.bf16.msra.mxu1 %v5477_v25  ;;  %5448 = vmatprep.subr.bf16.mxu0 %v5447_v52  ;;  %v5495_v52 = vpack.c.bf16 %v750_v32, %v749_v30  ;;  %v5497_v54 = vpack.c.bf16 %v734_v44, %v733_v43  ;;  %v6069_v0 = vrot.slane %v1274_v50, %v5896_v13  ;;  %v757_v32 = vld [vmem:[#allocation3 + $0x1630] sm:$0xff]  ;;  %v760_v44 = vld [vmem:[#allocation3 + $0x1648] sm:$0xff]  ;;  %v778_v50 = vld [vmem:[#allocation3 + $0x16d8] sm:$0xff] }
 0x161   :  { %5480 = vmatprep.subr.bf16.mxu1 %v5479_v48  ;;  %v799_v48 = vld [vmem:[#allocation3 + $0x1780] sm:$0xff]  ;;  %v1289_v10 = vcombine.high %v6066_v62, %v6066_v62 }
 0x163   :  { %5450 = vmatpush3.bf16.msra.mxu0 %v5449_v57  ;;  %v5499_v57 = vpack.c.bf16 %v768_v47, %v767_v46  ;;  %v791_v46 = vld [vmem:[#allocation3 + $0x1740] sm:$0xff] }
 0x164   :  { %5482 = vmatpush3.bf16.msra.mxu1 %v5481_v33  ;;  %5452 = vmatprep.subr.bf16.mxu0 %v5451_v39  ;;  %v751_v33 = vld [vmem:[#allocation3 + $0x1600] sm:$0xff]  ;;  %v752_v39 = vld [vmem:[#allocation3 + $0x1608] sm:$0xff] }
 0x165   :  { %5484 = vmatprep.subr.bf16.mxu1 %v5483_v61  ;;  %v770_v61 = vld [vmem:[#allocation3 + $0x1698] sm:$0xff]  ;;  %v5501_v45 = vpack.c.bf16 %v752_v39, %v751_v33 }
 0x167   :  { %5454 = vmatpush3.bf16.msra.mxu0 %v5453_v1  ;;  %v5533_v1 = vpack.c.bf16 %v784_v55, %v783_v59  ;;  %v761_v59 = vld [vmem:[#allocation3 + $0x1650] sm:$0xff] }
 0x168   :  { %5486 = vmatpush3.bf16.msra.mxu1 %v5485_v2  ;;  %5456 = vmatprep.subr.bf16.mxu0 %v5455_v56  ;;  %v5503_v2 = vpack.c.bf16 %v770_v61, %v769_v60  ;;  %v753_v56 = vld [vmem:[#allocation3 + $0x1610] sm:$0xff]  ;;  %v794_v61 = vld [vmem:[#allocation3 + $0x1758] sm:$0xff] }
 0x169   :  { %v3917_v21 = vpop.f32.mrb[6].mxu0  ;;  %5488 = vmatprep.subr.bf16.mxu1 %v5487_v5  ;;  %v786_v5 = vld [vmem:[#allocation3 + $0x1718] sm:$0xff]  ;;  %v793_v55 = vld [vmem:[#allocation3 + $0x1750] sm:$0xff] }
 0x16a   :  { %v3918_v28 = vpop.f32.mrb[7].mxu0  ;;  %v3952_v29 = vpop.f32.mrb[6].mxu1 }
 0x16b   :  { %v3919_v34 = vadd.f32 %v3918_v28, %v3917_v21  ;;  %5458 = vmatpush3.bf16.msra.mxu0 %v5457_v11  ;;  %v3953_v36 = vpop.f32.mrb[7].mxu1  ;;  %v1290_v11 = vcombine.high %v6069_v0, %v6069_v0  ;;  %v787_v21 = vld [vmem:[#allocation3 + $0x1720] sm:$0xff]  ;;  %v806_v28 = vld [vmem:[#allocation3 + $0x17b8] sm:$0xff] }
 0x16c   :  { %v3954_v42 = vadd.f32 %v3953_v36, %v3952_v29  ;;  %5490 = vmatpush3.bf16.msra.mxu1 %v5489_v18  ;;  %5460 = vmatprep.subr.bf16.mxu0 %v5459_v19  ;;  %v5505_v18 = vpack.c.bf16 %v754_v3, %v753_v56  ;;  %v5537_v19 = vpack.c.bf16 %v786_v5, %v785_v14  ;;  %v789_v36 = vld [vmem:[#allocation3 + $0x1730] sm:$0xff]  ;;  %v763_v14 = vld [vmem:[#allocation3 + $0x1660] sm:$0xff] }
 0x16d   :  { %v1910_v25 = vadd.f32 %v3919_v34, %v6045_v51  ;;  %5492 = vmatprep.subr.bf16.mxu1 %v5491_v23  ;;  %v5531_v51 = vpack.c.bf16 %v800_v49, %v799_v48  ;;  %v5539_v23 = vpack.c.bf16 %v804_v17, %v803_v8  ;;  %v5509_v29 = vpack.c.bf16 %v756_v20, %v755_v12  ;;  %v758_v34 = vld [vmem:[#allocation3 + $0x1638] sm:$0xff]  ;;  %v792_v48 = vld [vmem:[#allocation3 + $0x1748] sm:$0xff]  ;;  %v777_v49 = vld [vmem:[#allocation3 + $0x16d0] sm:$0xff] }
 0x16e   :  { %v5513_v41 = vpack.c.bf16 %v758_v34, %v757_v32  ;;  %v5545_v43 = vpack.c.bf16 %v790_v38, %v789_v36  ;;  %v5549_v33 = vpack.c.bf16 %v792_v48, %v791_v46  ;;  %v5519_v39 = vpack.c.bf16 %v778_v50, %v777_v49  ;;  %v795_v5 = vld [vmem:[#allocation3 + $0x1760] sm:$0xff]  ;;  %v781_v8 = vld [vmem:[#allocation3 + $0x16f0] sm:$0xff]  ;;  %v782_v17 = vld [vmem:[#allocation3 + $0x16f8] sm:$0xff] }
 0x16f   :  { %v6063_v31 = vadd.f32 %v3954_v42, %v1910_v25  ;;  %5462 = vmatpush3.bf16.msra.mxu0 %v5461_v37  ;;  %v5543_v37 = vpack.c.bf16 %v806_v28, %v805_v27  ;;  %v775_v42 = vld [vmem:[#allocation3 + $0x16c0] sm:$0xff]  ;;  %v5553_v56 = vpack.c.bf16 %v794_v61, %v793_v55  ;;  %v5523_v3 = vpack.c.bf16 %v780_v58, %v779_v63  ;;  %v765_v27 = vld [vmem:[#allocation3 + $0x1670] sm:$0xff]  ;;  %v766_v28 = vld [vmem:[#allocation3 + $0x1678] sm:$0xff] }
 0x170   :  { %5494 = vmatpush3.bf16.msra.mxu1 %v5493_v22  ;;  %5464 = vmatprep.subr.bf16.mxu0 %v5463_v40  ;;  %v776_v22 = vld [vmem:[#allocation3 + $0x16c8] sm:$0xff]  ;;  %v807_v40 = vld [vmem:[#allocation3 + $0x17c0] sm:$0xff]  ;;  %v798_v32 = vld [vmem:[#allocation3 + $0x1778] sm:$0xff] }
 0x171   :  { %5496 = vmatprep.subr.bf16.mxu1 %v5495_v52  ;;  %v5515_v25 = vpack.c.bf16 %v776_v22, %v775_v42  ;;  %v759_v52 = vld [vmem:[#allocation3 + $0x1640] sm:$0xff]  ;;  %v5547_v47 = vpack.c.bf16 %v808_v35, %v807_v40  ;;  %v832_v36 = vld [vmem:[#allocation3 + $0x1888] sm:$0xff]  ;;  %v5529_v40 = vpack.c.bf16 %v766_v28, %v765_v27  ;;  %v833_v46 = vld [vmem:[#allocation3 + $0x1890] sm:$0xff] }
 0x172   :  { %v831_v34 = vld [vmem:[#allocation3 + $0x1880] sm:$0xff]  ;;  %v864_v38 = vld [vmem:[#allocation3 + $0x1988] sm:$0xff]  ;;  %v865_v49 = vld [vmem:[#allocation3 + $0x1990] sm:$0xff] }
 0x173   :  { %5466 = vmatpush3.bf16.msra.mxu0 %v5465_v53  ;;  %v809_v53 = vld [vmem:[#allocation3 + $0x17d0] sm:$0xff]  ;;  %v866_v50 = vld [vmem:[#allocation3 + $0x1998] sm:$0xff]  ;;  %v835_v61 = vld [vmem:[#allocation3 + $0x18a0] sm:$0xff] }
 0x174   :  { %5498 = vmatpush3.bf16.msra.mxu1 %v5497_v54  ;;  %5500 = vmatprep.subr.bf16.mxu0 %v5499_v57  ;;  %v810_v54 = vld [vmem:[#allocation3 + $0x17d8] sm:$0xff]  ;;  %v5517_v57 = vpack.c.bf16 %v760_v44, %v759_v52  ;;  %v847_v52 = vld [vmem:[#allocation3 + $0x1900] sm:$0xff]  ;;  %v848_v44 = vld [vmem:[#allocation3 + $0x1908] sm:$0xff]  ;;  %v5599_v55 = vpack.c.bf16 %v866_v50, %v865_v49 }
 0x175   :  { %5532 = vmatprep.subr.bf16.mxu1 %v5531_v51  ;;  %v762_v51 = vld [vmem:[#allocation3 + $0x1658] sm:$0xff]  ;;  %v5551_v60 = vpack.c.bf16 %v810_v54, %v809_v53  ;;  %v836_v63 = vld [vmem:[#allocation3 + $0x18a8] sm:$0xff]  ;;  %v843_v49 = vld [vmem:[#allocation3 + $0x18e0] sm:$0xff] }
 0x176   :  { %2888 = vmatmul.mubr.f32.vlgmr.msra.gmra.mrb[20].mxu0 %v6048_v7  ;;  %v773_v7 = vld [vmem:[#allocation3 + $0x16b0] sm:$0xff]  ;;  %v872_v27 = vld [vmem:[#allocation3 + $0x19c8] sm:$0xff] }
 0x177   :  { %5502 = vmatpush3.bf16.msra.mxu0 %v5501_v45  ;;  %2958 = vmatmul.mubr.f32.vlgmr.msra.gmra.mrb[20].mxu1 %v6051_v16  ;;  %v5541_v16 = vpack.c.bf16 %v788_v24, %v787_v21  ;;  %v5511_v30 = vpack.c.bf16 %v774_v26, %v773_v7  ;;  %v811_v45 = vld [vmem:[#allocation3 + $0x17e0] sm:$0xff]  ;;  %v5527_v26 = vpack.c.bf16 %v782_v17, %v781_v8  ;;  %v838_v8 = vld [vmem:[#allocation3 + $0x18b8] sm:$0xff]  ;;  %v869_v17 = vld [vmem:[#allocation3 + $0x19b0] sm:$0xff] }
 0x178   :  { %5534 = vmatpush3.bf16.msra.mxu1 %v5533_v1  ;;  %5504 = vmatprep.subr.bf16.mxu0 %v5503_v2  ;;  %v812_v1 = vld [vmem:[#allocation3 + $0x17e8] sm:$0xff]  ;;  %v5521_v2 = vpack.c.bf16 %v762_v51, %v761_v59  ;;  %v818_v59 = vld [vmem:[#allocation3 + $0x1818] sm:$0xff]  ;;  %v849_v51 = vld [vmem:[#allocation3 + $0x1910] sm:$0xff] }
 0x179   :  { %5536 = vmatprep.subr.bf16.mxu1 %v5535_v4  ;;  %3027 = vmatprep.mubr.f32.mxu0 %v1289_v10  ;;  %v764_v4 = vld [vmem:[#allocation3 + $0x1668] sm:$0xff]  ;;  %v5555_v9 = vpack.c.bf16 %v812_v1, %v811_v45  ;;  %v867_v45 = vld [vmem:[#allocation3 + $0x19a0] sm:$0xff] }
 0x17a   :  { %3097 = vmatprep.mubr.f32.mxu1 %v1290_v11  ;;  %v796_v10 = vld [vmem:[#allocation3 + $0x1768] sm:$0xff]  ;;  %v5525_v21 = vpack.c.bf16 %v764_v4, %v763_v14  ;;  %v5571_v14 = vpack.c.bf16 %v836_v63, %v835_v61  ;;  %v819_v4 = vld [vmem:[#allocation3 + $0x1820] sm:$0xff] }
 0x17b   :  { %5506 = vmatpush3.bf16.msra.mxu0 %v5505_v18  ;;  %v5557_v7 = vpack.c.bf16 %v796_v10, %v795_v5  ;;  %v868_v1 = vld [vmem:[#allocation3 + $0x19a8] sm:$0xff] }
 0x17c   :  { %5538 = vmatpush3.bf16.msra.mxu1 %v5537_v19  ;;  %5508 = vmatprep.subr.bf16.mxu0 %v5507_v15  ;;  %v813_v19 = vld [vmem:[#allocation3 + $0x17f0] sm:$0xff]  ;;  %v814_v15 = vld [vmem:[#allocation3 + $0x17f8] sm:$0xff]  ;;  %v820_v5 = vld [vmem:[#allocation3 + $0x1828] sm:$0xff] }
 0x17d   :  { %5540 = vmatprep.subr.bf16.mxu1 %v5539_v23  ;;  %v43_v23 = vld [vmem:[%s6155_s0 + $0x60] sm:$0xff]  ;;  %v852_v10 = vld [vmem:[#allocation3 + $0x1928] sm:$0xff] }
 0x17e   :  { %v1291_v42 = vcombine.high %v43_v23, %v43_v23  ;;  %v6084_v48 = vrot.slane %v43_v23, %v5896_v13  ;;  %v854_v23 = vld [vmem:[#allocation3 + $0x1938] sm:$0xff]  ;;  %v844_v50 = vld [vmem:[#allocation3 + $0x18e8] sm:$0xff] }
 0x17f   :  { %5510 = vmatpush3.bf16.msra.mxu0 %v5509_v29  ;;  %v797_v29 = vld [vmem:[#allocation3 + $0x1770] sm:$0xff] }
 0x180   :  { %5542 = vmatpush3.bf16.msra.mxu1 %v5541_v16  ;;  %5512 = vmatprep.subr.bf16.mxu0 %v5511_v30  ;;  %v5559_v30 = vpack.c.bf16 %v814_v15, %v813_v19  ;;  %v5561_v35 = vpack.c.bf16 %v798_v32, %v797_v29  ;;  %v6087_v53 = vrot.slane %v1291_v42, %v5896_v13  ;;  %v821_v15 = vld [vmem:[#allocation3 + $0x1830] sm:$0xff]  ;;  %v824_v32 = vld [vmem:[#allocation3 + $0x1848] sm:$0xff]  ;;  %v842_v42 = vld [vmem:[#allocation3 + $0x18d8] sm:$0xff] }
 0x181   :  { %5544 = vmatprep.subr.bf16.mxu1 %v5543_v37  ;;  %v863_v37 = vld [vmem:[#allocation3 + $0x1980] sm:$0xff]  ;;  %v1306_v58 = vcombine.high %v6084_v48, %v6084_v48 }
 0x183   :  { %5514 = vmatpush3.bf16.msra.mxu0 %v5513_v41  ;;  %v5563_v41 = vpack.c.bf16 %v832_v36, %v831_v34  ;;  %v855_v34 = vld [vmem:[#allocation3 + $0x1940] sm:$0xff] }
 0x184   :  { %5546 = vmatpush3.bf16.msra.mxu1 %v5545_v43  ;;  %5516 = vmatprep.subr.bf16.mxu0 %v5515_v25  ;;  %v815_v43 = vld [vmem:[#allocation3 + $0x1800] sm:$0xff]  ;;  %v816_v25 = vld [vmem:[#allocation3 + $0x1808] sm:$0xff] }
 0x185   :  { %5548 = vmatprep.subr.bf16.mxu1 %v5547_v47  ;;  %v834_v47 = vld [vmem:[#allocation3 + $0x1898] sm:$0xff]  ;;  %v5565_v54 = vpack.c.bf16 %v816_v25, %v815_v43 }
 0x187   :  { %5518 = vmatpush3.bf16.msra.mxu0 %v5517_v57  ;;  %v5597_v57 = vpack.c.bf16 %v848_v44, %v847_v52  ;;  %v825_v52 = vld [vmem:[#allocation3 + $0x1850] sm:$0xff] }
 0x188   :  { %5550 = vmatpush3.bf16.msra.mxu1 %v5549_v33  ;;  %5520 = vmatprep.subr.bf16.mxu0 %v5519_v39  ;;  %v5567_v33 = vpack.c.bf16 %v834_v47, %v833_v46  ;;  %v817_v39 = vld [vmem:[#allocation3 + $0x1810] sm:$0xff]  ;;  %v858_v47 = vld [vmem:[#allocation3 + $0x1958] sm:$0xff] }
 0x189   :  { %v3987_v6 = vpop.f32.mrb[8].mxu0  ;;  %5552 = vmatprep.subr.bf16.mxu1 %v5551_v60  ;;  %v850_v60 = vld [vmem:[#allocation3 + $0x1918] sm:$0xff]  ;;  %v857_v44 = vld [vmem:[#allocation3 + $0x1950] sm:$0xff] }
 0x18a   :  { %v3988_v11 = vpop.f32.mrb[9].mxu0  ;;  %v4022_v18 = vpop.f32.mrb[8].mxu1 }
 0x18b   :  { %v3989_v12 = vadd.f32 %v3988_v11, %v3987_v6  ;;  %5522 = vmatpush3.bf16.msra.mxu0 %v5521_v2  ;;  %v4023_v20 = vpop.f32.mrb[9].mxu1  ;;  %v1307_v2 = vcombine.high %v6087_v53, %v6087_v53  ;;  %v851_v6 = vld [vmem:[#allocation3 + $0x1920] sm:$0xff]  ;;  %v870_v11 = vld [vmem:[#allocation3 + $0x19b8] sm:$0xff] }
 0x18c   :  { %v4024_v24 = vadd.f32 %v4023_v20, %v4022_v18  ;;  %5554 = vmatpush3.bf16.msra.mxu1 %v5553_v56  ;;  %5524 = vmatprep.subr.bf16.mxu0 %v5523_v3  ;;  %v5569_v56 = vpack.c.bf16 %v818_v59, %v817_v39  ;;  %v5601_v3 = vpack.c.bf16 %v850_v60, %v849_v51  ;;  %v853_v20 = vld [vmem:[#allocation3 + $0x1930] sm:$0xff]  ;;  %v827_v51 = vld [vmem:[#allocation3 + $0x1860] sm:$0xff] }
 0x18d   :  { %v2050_v16 = vadd.f32 %v3989_v12, %v6063_v31  ;;  %5556 = vmatprep.subr.bf16.mxu1 %v5555_v9  ;;  %v5595_v31 = vpack.c.bf16 %v864_v38, %v863_v37  ;;  %v5603_v9 = vpack.c.bf16 %v868_v1, %v867_v45  ;;  %v5573_v18 = vpack.c.bf16 %v820_v5, %v819_v4  ;;  %v822_v12 = vld [vmem:[#allocation3 + $0x1838] sm:$0xff]  ;;  %v856_v37 = vld [vmem:[#allocation3 + $0x1948] sm:$0xff]  ;;  %v841_v38 = vld [vmem:[#allocation3 + $0x18d0] sm:$0xff] }
 0x18e   :  { %v5577_v28 = vpack.c.bf16 %v822_v12, %v821_v15  ;;  %v5609_v29 = vpack.c.bf16 %v854_v23, %v853_v20  ;;  %v5613_v43 = vpack.c.bf16 %v856_v37, %v855_v34  ;;  %v5583_v25 = vpack.c.bf16 %v842_v42, %v841_v38  ;;  %v859_v60 = vld [vmem:[#allocation3 + $0x1960] sm:$0xff]  ;;  %v845_v45 = vld [vmem:[#allocation3 + $0x18f0] sm:$0xff]  ;;  %v846_v1 = vld [vmem:[#allocation3 + $0x18f8] sm:$0xff] }
 0x18f   :  { %v6081_v22 = vadd.f32 %v4024_v24, %v2050_v16  ;;  %5526 = vmatpush3.bf16.msra.mxu0 %v5525_v21  ;;  %v5607_v21 = vpack.c.bf16 %v870_v11, %v869_v17  ;;  %v839_v24 = vld [vmem:[#allocation3 + $0x18c0] sm:$0xff]  ;;  %v5617_v39 = vpack.c.bf16 %v858_v47, %v857_v44  ;;  %v5587_v59 = vpack.c.bf16 %v844_v50, %v843_v49  ;;  %v829_v17 = vld [vmem:[#allocation3 + $0x1870] sm:$0xff]  ;;  %v830_v11 = vld [vmem:[#allocation3 + $0x1878] sm:$0xff] }
 0x190   :  { %5558 = vmatpush3.bf16.msra.mxu1 %v5557_v7  ;;  %5528 = vmatprep.subr.bf16.mxu0 %v5527_v26  ;;  %v840_v7 = vld [vmem:[#allocation3 + $0x18c8] sm:$0xff]  ;;  %v871_v26 = vld [vmem:[#allocation3 + $0x19c0] sm:$0xff]  ;;  %v862_v15 = vld [vmem:[#allocation3 + $0x1978] sm:$0xff] }
 0x191   :  { %5560 = vmatprep.subr.bf16.mxu1 %v5559_v30  ;;  %v5579_v16 = vpack.c.bf16 %v840_v7, %v839_v24  ;;  %v823_v30 = vld [vmem:[#allocation3 + $0x1840] sm:$0xff]  ;;  %v5611_v36 = vpack.c.bf16 %v872_v27, %v871_v26  ;;  %v896_v20 = vld [vmem:[#allocation3 + $0x1a88] sm:$0xff]  ;;  %v5593_v26 = vpack.c.bf16 %v830_v11, %v829_v17  ;;  %v897_v34 = vld [vmem:[#allocation3 + $0x1a90] sm:$0xff] }
 0x192   :  { %v895_v12 = vld [vmem:[#allocation3 + $0x1a80] sm:$0xff]  ;;  %v928_v23 = vld [vmem:[#allocation3 + $0x1b88] sm:$0xff]  ;;  %v929_v38 = vld [vmem:[#allocation3 + $0x1b90] sm:$0xff] }
 0x193   :  { %5530 = vmatpush3.bf16.msra.mxu0 %v5529_v40  ;;  %v873_v40 = vld [vmem:[#allocation3 + $0x19d0] sm:$0xff]  ;;  %v930_v42 = vld [vmem:[#allocation3 + $0x1b98] sm:$0xff]  ;;  %v899_v47 = vld [vmem:[#allocation3 + $0x1aa0] sm:$0xff] }
 0x194   :  { %5562 = vmatpush3.bf16.msra.mxu1 %v5561_v35  ;;  %5564 = vmatprep.subr.bf16.mxu0 %v5563_v41  ;;  %v874_v35 = vld [vmem:[#allocation3 + $0x19d8] sm:$0xff]  ;;  %v5581_v41 = vpack.c.bf16 %v824_v32, %v823_v30  ;;  %v911_v30 = vld [vmem:[#allocation3 + $0x1b00] sm:$0xff]  ;;  %v912_v32 = vld [vmem:[#allocation3 + $0x1b08] sm:$0xff]  ;;  %v5663_v44 = vpack.c.bf16 %v930_v42, %v929_v38 }
 0x195   :  { %5596 = vmatprep.subr.bf16.mxu1 %v5595_v31  ;;  %v826_v31 = vld [vmem:[#allocation3 + $0x1858] sm:$0xff]  ;;  %v5615_v46 = vpack.c.bf16 %v874_v35, %v873_v40  ;;  %v900_v49 = vld [vmem:[#allocation3 + $0x1aa8] sm:$0xff]  ;;  %v907_v38 = vld [vmem:[#allocation3 + $0x1ae0] sm:$0xff] }
 0x196   :  { %3028 = vmatmul.mubr.f32.vlgmr.msra.gmra.mrb[22].mxu0 %v6066_v62  ;;  %v837_v62 = vld [vmem:[#allocation3 + $0x18b0] sm:$0xff]  ;;  %v936_v17 = vld [vmem:[#allocation3 + $0x1bc8] sm:$0xff] }
 0x197   :  { %5566 = vmatpush3.bf16.msra.mxu0 %v5565_v54  ;;  %3098 = vmatmul.mubr.f32.vlgmr.msra.gmra.mrb[22].mxu1 %v6069_v0  ;;  %v5605_v0 = vpack.c.bf16 %v852_v10, %v851_v6  ;;  %v5575_v19 = vpack.c.bf16 %v838_v8, %v837_v62  ;;  %v875_v54 = vld [vmem:[#allocation3 + $0x19e0] sm:$0xff]  ;;  %v5591_v8 = vpack.c.bf16 %v846_v1, %v845_v45  ;;  %v902_v45 = vld [vmem:[#allocation3 + $0x1ab8] sm:$0xff]  ;;  %v933_v1 = vld [vmem:[#allocation3 + $0x1bb0] sm:$0xff] }
 0x198   :  { %5598 = vmatpush3.bf16.msra.mxu1 %v5597_v57  ;;  %5568 = vmatprep.subr.bf16.mxu0 %v5567_v33  ;;  %v876_v57 = vld [vmem:[#allocation3 + $0x19e8] sm:$0xff]  ;;  %v5585_v33 = vpack.c.bf16 %v826_v31, %v825_v52  ;;  %v882_v52 = vld [vmem:[#allocation3 + $0x1a18] sm:$0xff]  ;;  %v913_v31 = vld [vmem:[#allocation3 + $0x1b10] sm:$0xff] }
 0x199   :  { %5600 = vmatprep.subr.bf16.mxu1 %v5599_v55  ;;  %3167 = vmatprep.mubr.f32.mxu0 %v1306_v58  ;;  %v828_v55 = vld [vmem:[#allocation3 + $0x1868] sm:$0xff]  ;;  %v5619_v63 = vpack.c.bf16 %v876_v57, %v875_v54  ;;  %v931_v54 = vld [vmem:[#allocation3 + $0x1ba0] sm:$0xff] }
 0x19a   :  { %3237 = vmatprep.mubr.f32.mxu1 %v1307_v2  ;;  %v860_v58 = vld [vmem:[#allocation3 + $0x1968] sm:$0xff]  ;;  %v5589_v6 = vpack.c.bf16 %v828_v55, %v827_v51  ;;  %v5635_v51 = vpack.c.bf16 %v900_v49, %v899_v47  ;;  %v883_v55 = vld [vmem:[#allocation3 + $0x1a20] sm:$0xff] }
 0x19b   :  { %5570 = vmatpush3.bf16.msra.mxu0 %v5569_v56  ;;  %v5621_v62 = vpack.c.bf16 %v860_v58, %v859_v60  ;;  %v932_v57 = vld [vmem:[#allocation3 + $0x1ba8] sm:$0xff] }
 0x19c   :  { %5602 = vmatpush3.bf16.msra.mxu1 %v5601_v3  ;;  %5572 = vmatprep.subr.bf16.mxu0 %v5571_v14  ;;  %v877_v3 = vld [vmem:[#allocation3 + $0x19f0] sm:$0xff]  ;;  %v878_v14 = vld [vmem:[#allocation3 + $0x19f8] sm:$0xff]  ;;  %v884_v60 = vld [vmem:[#allocation3 + $0x1a28] sm:$0xff] }
 0x19d   :  { %5604 = vmatprep.subr.bf16.mxu1 %v5603_v9  ;;  %v44_v9 = vld [vmem:[%s6155_s0 + $0x68] sm:$0xff] }
 0x19e   :  { %v1308_v24 = vcombine.high %v44_v9, %v44_v9  ;;  %v6102_v37 = vrot.slane %v44_v9, %v5896_v13  ;;  %v916_v58 = vld [vmem:[#allocation3 + $0x1b28] sm:$0xff]  ;;  %v918_v9 = vld [vmem:[#allocation3 + $0x1b38] sm:$0xff] }
 0x19f   :  { %5574 = vmatpush3.bf16.msra.mxu0 %v5573_v18  ;;  %v861_v18 = vld [vmem:[#allocation3 + $0x1970] sm:$0xff]  ;;  %v908_v42 = vld [vmem:[#allocation3 + $0x1ae8] sm:$0xff] }
 0x1a0   :  { %5606 = vmatpush3.bf16.msra.mxu1 %v5605_v0  ;;  %5576 = vmatprep.subr.bf16.mxu0 %v5575_v19  ;;  %v5623_v19 = vpack.c.bf16 %v878_v14, %v877_v3  ;;  %v5625_v27 = vpack.c.bf16 %v862_v15, %v861_v18  ;;  %v6105_v40 = vrot.slane %v1308_v24, %v5896_v13  ;;  %v885_v14 = vld [vmem:[#allocation3 + $0x1a30] sm:$0xff]  ;;  %v888_v15 = vld [vmem:[#allocation3 + $0x1a48] sm:$0xff]  ;;  %v906_v24 = vld [vmem:[#allocation3 + $0x1ad8] sm:$0xff] }
 0x1a1   :  { %5608 = vmatprep.subr.bf16.mxu1 %v5607_v21  ;;  %v927_v21 = vld [vmem:[#allocation3 + $0x1b80] sm:$0xff]  ;;  %v1323_v50 = vcombine.high %v6102_v37, %v6102_v37 }
 0x1a3   :  { %5578 = vmatpush3.bf16.msra.mxu0 %v5577_v28  ;;  %v5627_v28 = vpack.c.bf16 %v896_v20, %v895_v12  ;;  %v919_v12 = vld [vmem:[#allocation3 + $0x1b40] sm:$0xff] }
 0x1a4   :  { %5610 = vmatpush3.bf16.msra.mxu1 %v5609_v29  ;;  %5580 = vmatprep.subr.bf16.mxu0 %v5579_v16  ;;  %v879_v29 = vld [vmem:[#allocation3 + $0x1a00] sm:$0xff]  ;;  %v880_v16 = vld [vmem:[#allocation3 + $0x1a08] sm:$0xff] }
 0x1a5   :  { %5612 = vmatprep.subr.bf16.mxu1 %v5611_v36  ;;  %v898_v36 = vld [vmem:[#allocation3 + $0x1a98] sm:$0xff]  ;;  %v5629_v35 = vpack.c.bf16 %v880_v16, %v879_v29 }
 0x1a7   :  { %5582 = vmatpush3.bf16.msra.mxu0 %v5581_v41  ;;  %v5661_v41 = vpack.c.bf16 %v912_v32, %v911_v30  ;;  %v889_v30 = vld [vmem:[#allocation3 + $0x1a50] sm:$0xff] }
 0x1a8   :  { %5614 = vmatpush3.bf16.msra.mxu1 %v5613_v43  ;;  %5584 = vmatprep.subr.bf16.mxu0 %v5583_v25  ;;  %v5631_v43 = vpack.c.bf16 %v898_v36, %v897_v34  ;;  %v881_v25 = vld [vmem:[#allocation3 + $0x1a10] sm:$0xff]  ;;  %v922_v36 = vld [vmem:[#allocation3 + $0x1b58] sm:$0xff] }
 0x1a9   :  { %v4057_v61 = vpop.f32.mrb[10].mxu0  ;;  %5616 = vmatprep.subr.bf16.mxu1 %v5615_v46  ;;  %v914_v46 = vld [vmem:[#allocation3 + $0x1b18] sm:$0xff]  ;;  %v921_v32 = vld [vmem:[#allocation3 + $0x1b50] sm:$0xff] }
 0x1aa   :  { %v4058_v2 = vpop.f32.mrb[11].mxu0  ;;  %v4092_v56 = vpop.f32.mrb[10].mxu1 }
 0x1ab   :  { %v4059_v4 = vadd.f32 %v4058_v2, %v4057_v61  ;;  %5586 = vmatpush3.bf16.msra.mxu0 %v5585_v33  ;;  %v4093_v5 = vpop.f32.mrb[11].mxu1  ;;  %v1324_v33 = vcombine.high %v6105_v40, %v6105_v40  ;;  %v915_v61 = vld [vmem:[#allocation3 + $0x1b20] sm:$0xff]  ;;  %v934_v2 = vld [vmem:[#allocation3 + $0x1bb8] sm:$0xff] }
 0x1ac   :  { %v4094_v10 = vadd.f32 %v4093_v5, %v4092_v56  ;;  %5618 = vmatpush3.bf16.msra.mxu1 %v5617_v39  ;;  %5588 = vmatprep.subr.bf16.mxu0 %v5587_v59  ;;  %v5633_v39 = vpack.c.bf16 %v882_v52, %v881_v25  ;;  %v5665_v59 = vpack.c.bf16 %v914_v46, %v913_v31  ;;  %v917_v5 = vld [vmem:[#allocation3 + $0x1b30] sm:$0xff]  ;;  %v891_v31 = vld [vmem:[#allocation3 + $0x1a60] sm:$0xff] }
 0x1ad   :  { %v2190_v0 = vadd.f32 %v4059_v4, %v6081_v22  ;;  %5620 = vmatprep.subr.bf16.mxu1 %v5619_v63  ;;  %v5659_v22 = vpack.c.bf16 %v928_v23, %v927_v21  ;;  %v5667_v63 = vpack.c.bf16 %v932_v57, %v931_v54  ;;  %v5637_v56 = vpack.c.bf16 %v884_v60, %v883_v55  ;;  %v886_v4 = vld [vmem:[#allocation3 + $0x1a38] sm:$0xff]  ;;  %v920_v21 = vld [vmem:[#allocation3 + $0x1b48] sm:$0xff]  ;;  %v905_v23 = vld [vmem:[#allocation3 + $0x1ad0] sm:$0xff] }
 0x1ae   :  { %v5641_v11 = vpack.c.bf16 %v886_v4, %v885_v14  ;;  %v5673_v18 = vpack.c.bf16 %v918_v9, %v917_v5  ;;  %v5677_v29 = vpack.c.bf16 %v920_v21, %v919_v12  ;;  %v5647_v16 = vpack.c.bf16 %v906_v24, %v905_v23  ;;  %v923_v46 = vld [vmem:[#allocation3 + $0x1b60] sm:$0xff]  ;;  %v909_v54 = vld [vmem:[#allocation3 + $0x1af0] sm:$0xff]  ;;  %v910_v57 = vld [vmem:[#allocation3 + $0x1af8] sm:$0xff] }
 0x1af   :  { %v6099_v7 = vadd.f32 %v4094_v10, %v2190_v0  ;;  %5590 = vmatpush3.bf16.msra.mxu0 %v5589_v6  ;;  %v5671_v6 = vpack.c.bf16 %v934_v2, %v933_v1  ;;  %v903_v10 = vld [vmem:[#allocation3 + $0x1ac0] sm:$0xff]  ;;  %v5681_v25 = vpack.c.bf16 %v922_v36, %v921_v32  ;;  %v5651_v52 = vpack.c.bf16 %v908_v42, %v907_v38  ;;  %v893_v1 = vld [vmem:[#allocation3 + $0x1a70] sm:$0xff]  ;;  %v894_v2 = vld [vmem:[#allocation3 + $0x1a78] sm:$0xff] }
 0x1b0   :  { %5622 = vmatpush3.bf16.msra.mxu1 %v5621_v62  ;;  %5592 = vmatprep.subr.bf16.mxu0 %v5591_v8  ;;  %v904_v62 = vld [vmem:[#allocation3 + $0x1ac8] sm:$0xff]  ;;  %v935_v8 = vld [vmem:[#allocation3 + $0x1bc0] sm:$0xff]  ;;  %v926_v14 = vld [vmem:[#allocation3 + $0x1b78] sm:$0xff] }
 0x1b1   :  { %5624 = vmatprep.subr.bf16.mxu1 %v5623_v19  ;;  %v5643_v0 = vpack.c.bf16 %v904_v62, %v903_v10  ;;  %v887_v19 = vld [vmem:[#allocation3 + $0x1a40] sm:$0xff]  ;;  %v5675_v20 = vpack.c.bf16 %v936_v17, %v935_v8  ;;  %v960_v5 = vld [vmem:[#allocation3 + $0x1c88] sm:$0xff]  ;;  %v5657_v8 = vpack.c.bf16 %v894_v2, %v893_v1  ;;  %v961_v12 = vld [vmem:[#allocation3 + $0x1c90] sm:$0xff] }
 0x1b2   :  { %v959_v4 = vld [vmem:[#allocation3 + $0x1c80] sm:$0xff]  ;;  %v992_v9 = vld [vmem:[#allocation3 + $0x1d88] sm:$0xff]  ;;  %v993_v23 = vld [vmem:[#allocation3 + $0x1d90] sm:$0xff] }
 0x1b3   :  { %5594 = vmatpush3.bf16.msra.mxu0 %v5593_v26  ;;  %v937_v26 = vld [vmem:[#allocation3 + $0x1bd0] sm:$0xff]  ;;  %v994_v24 = vld [vmem:[#allocation3 + $0x1d98] sm:$0xff]  ;;  %v963_v36 = vld [vmem:[#allocation3 + $0x1ca0] sm:$0xff] }
 0x1b4   :  { %5626 = vmatpush3.bf16.msra.mxu1 %v5625_v27  ;;  %5628 = vmatprep.subr.bf16.mxu0 %v5627_v28  ;;  %v938_v27 = vld [vmem:[#allocation3 + $0x1bd8] sm:$0xff]  ;;  %v5645_v28 = vpack.c.bf16 %v888_v15, %v887_v19  ;;  %v975_v19 = vld [vmem:[#allocation3 + $0x1d00] sm:$0xff]  ;;  %v976_v15 = vld [vmem:[#allocation3 + $0x1d08] sm:$0xff]  ;;  %v5727_v32 = vpack.c.bf16 %v994_v24, %v993_v23 }
 0x1b5   :  { %5660 = vmatprep.subr.bf16.mxu1 %v5659_v22  ;;  %v890_v22 = vld [vmem:[#allocation3 + $0x1a58] sm:$0xff]  ;;  %v5679_v34 = vpack.c.bf16 %v938_v27, %v937_v26  ;;  %v964_v38 = vld [vmem:[#allocation3 + $0x1ca8] sm:$0xff]  ;;  %v971_v23 = vld [vmem:[#allocation3 + $0x1ce0] sm:$0xff] }
 0x1b6   :  { %3168 = vmatmul.mubr.f32.vlgmr.msra.gmra.mrb[24].mxu0 %v6084_v48  ;;  %v901_v48 = vld [vmem:[#allocation3 + $0x1ab0] sm:$0xff]  ;;  %v1000_v1 = vld [vmem:[#allocation3 + $0x1dc8] sm:$0xff] }
 0x1b7   :  { %5630 = vmatpush3.bf16.msra.mxu0 %v5629_v35  ;;  %3238 = vmatmul.mubr.f32.vlgmr.msra.gmra.mrb[24].mxu1 %v6087_v53  ;;  %v5669_v53 = vpack.c.bf16 %v916_v58, %v915_v61  ;;  %v5639_v3 = vpack.c.bf16 %v902_v45, %v901_v48  ;;  %v939_v35 = vld [vmem:[#allocation3 + $0x1be0] sm:$0xff]  ;;  %v5655_v45 = vpack.c.bf16 %v910_v57, %v909_v54  ;;  %v966_v54 = vld [vmem:[#allocation3 + $0x1cb8] sm:$0xff]  ;;  %v997_v57 = vld [vmem:[#allocation3 + $0x1db0] sm:$0xff] }
 0x1b8   :  { %5662 = vmatpush3.bf16.msra.mxu1 %v5661_v41  ;;  %5632 = vmatprep.subr.bf16.mxu0 %v5631_v43  ;;  %v940_v41 = vld [vmem:[#allocation3 + $0x1be8] sm:$0xff]  ;;  %v5649_v43 = vpack.c.bf16 %v890_v22, %v889_v30  ;;  %v946_v30 = vld [vmem:[#allocation3 + $0x1c18] sm:$0xff]  ;;  %v977_v22 = vld [vmem:[#allocation3 + $0x1d10] sm:$0xff] }
 0x1b9   :  { %5664 = vmatprep.subr.bf16.mxu1 %v5663_v44  ;;  %3307 = vmatprep.mubr.f32.mxu0 %v1323_v50  ;;  %v892_v44 = vld [vmem:[#allocation3 + $0x1a68] sm:$0xff]  ;;  %v5683_v49 = vpack.c.bf16 %v940_v41, %v939_v35  ;;  %v995_v35 = vld [vmem:[#allocation3 + $0x1da0] sm:$0xff] }
 0x1ba   :  { %3377 = vmatprep.mubr.f32.mxu1 %v1324_v33  ;;  %v924_v50 = vld [vmem:[#allocation3 + $0x1b68] sm:$0xff]  ;;  %v5653_v61 = vpack.c.bf16 %v892_v44, %v891_v31  ;;  %v5699_v31 = vpack.c.bf16 %v964_v38, %v963_v36  ;;  %v947_v44 = vld [vmem:[#allocation3 + $0x1c20] sm:$0xff] }
 0x1bb   :  { %5634 = vmatpush3.bf16.msra.mxu0 %v5633_v39  ;;  %v5685_v48 = vpack.c.bf16 %v924_v50, %v923_v46  ;;  %v996_v41 = vld [vmem:[#allocation3 + $0x1da8] sm:$0xff] }
 0x1bc   :  { %5666 = vmatpush3.bf16.msra.mxu1 %v5665_v59  ;;  %5636 = vmatprep.subr.bf16.mxu0 %v5635_v51  ;;  %v941_v59 = vld [vmem:[#allocation3 + $0x1bf0] sm:$0xff]  ;;  %v942_v51 = vld [vmem:[#allocation3 + $0x1bf8] sm:$0xff]  ;;  %v948_v46 = vld [vmem:[#allocation3 + $0x1c28] sm:$0xff] }
 0x1bd   :  { %5668 = vmatprep.subr.bf16.mxu1 %v5667_v63  ;;  %v45_v63 = vld [vmem:[%s6155_s0 + $0x70] sm:$0xff] }
 0x1be   :  { %v1325_v10 = vcombine.high %v45_v63, %v45_v63  ;;  %v6120_v21 = vrot.slane %v45_v63, %v5896_v13  ;;  %v980_v50 = vld [vmem:[#allocation3 + $0x1d28] sm:$0xff]  ;;  %v982_v63 = vld [vmem:[#allocation3 + $0x1d38] sm:$0xff] }
 0x1bf   :  { %5638 = vmatpush3.bf16.msra.mxu0 %v5637_v56  ;;  %v925_v56 = vld [vmem:[#allocation3 + $0x1b70] sm:$0xff]  ;;  %v972_v24 = vld [vmem:[#allocation3 + $0x1ce8] sm:$0xff] }
 0x1c0   :  { %5670 = vmatpush3.bf16.msra.mxu1 %v5669_v53  ;;  %5640 = vmatprep.subr.bf16.mxu0 %v5639_v3  ;;  %v5687_v3 = vpack.c.bf16 %v942_v51, %v941_v59  ;;  %v5689_v17 = vpack.c.bf16 %v926_v14, %v925_v56  ;;  %v6123_v26 = vrot.slane %v1325_v10, %v5896_v13  ;;  %v949_v51 = vld [vmem:[#allocation3 + $0x1c30] sm:$0xff]  ;;  %v952_v14 = vld [vmem:[#allocation3 + $0x1c48] sm:$0xff]  ;;  %v970_v10 = vld [vmem:[#allocation3 + $0x1cd8] sm:$0xff] }
 0x1c1   :  { %5672 = vmatprep.subr.bf16.mxu1 %v5671_v6  ;;  %v991_v6 = vld [vmem:[#allocation3 + $0x1d80] sm:$0xff]  ;;  %v1340_v42 = vcombine.high %v6120_v21, %v6120_v21 }
 0x1c3   :  { %5642 = vmatpush3.bf16.msra.mxu0 %v5641_v11  ;;  %v5691_v11 = vpack.c.bf16 %v960_v5, %v959_v4  ;;  %v983_v4 = vld [vmem:[#allocation3 + $0x1d40] sm:$0xff] }
 0x1c4   :  { %5674 = vmatpush3.bf16.msra.mxu1 %v5673_v18  ;;  %5644 = vmatprep.subr.bf16.mxu0 %v5643_v0  ;;  %v943_v18 = vld [vmem:[#allocation3 + $0x1c00] sm:$0xff]  ;;  %v944_v0 = vld [vmem:[#allocation3 + $0x1c08] sm:$0xff] }
 0x1c5   :  { %5676 = vmatprep.subr.bf16.mxu1 %v5675_v20  ;;  %v962_v20 = vld [vmem:[#allocation3 + $0x1c98] sm:$0xff]  ;;  %v5693_v27 = vpack.c.bf16 %v944_v0, %v943_v18 }
 0x1c7   :  { %5646 = vmatpush3.bf16.msra.mxu0 %v5645_v28  ;;  %v5725_v28 = vpack.c.bf16 %v976_v15, %v975_v19  ;;  %v953_v19 = vld [vmem:[#allocation3 + $0x1c50] sm:$0xff] }
 0x1c8   :  { %5678 = vmatpush3.bf16.msra.mxu1 %v5677_v29  ;;  %5648 = vmatprep.subr.bf16.mxu0 %v5647_v16  ;;  %v5695_v29 = vpack.c.bf16 %v962_v20, %v961_v12  ;;  %v945_v16 = vld [vmem:[#allocation3 + $0x1c10] sm:$0xff]  ;;  %v986_v20 = vld [vmem:[#allocation3 + $0x1d58] sm:$0xff] }
 0x1c9   :  { %v4127_v47 = vpop.f32.mrb[12].mxu0  ;;  %5680 = vmatprep.subr.bf16.mxu1 %v5679_v34  ;;  %v978_v34 = vld [vmem:[#allocation3 + $0x1d18] sm:$0xff]  ;;  %v985_v15 = vld [vmem:[#allocation3 + $0x1d50] sm:$0xff] }
 0x1ca   :  { %v4128_v33 = vpop.f32.mrb[13].mxu0  ;;  %v4162_v39 = vpop.f32.mrb[12].mxu1 }
 0x1cb   :  { %v4129_v55 = vadd.f32 %v4128_v33, %v4127_v47  ;;  %5650 = vmatpush3.bf16.msra.mxu0 %v5649_v43  ;;  %v4163_v60 = vpop.f32.mrb[13].mxu1  ;;  %v1341_v43 = vcombine.high %v6123_v26, %v6123_v26  ;;  %v979_v47 = vld [vmem:[#allocation3 + $0x1d20] sm:$0xff]  ;;  %v998_v33 = vld [vmem:[#allocation3 + $0x1db8] sm:$0xff] }
 0x1cc   :  { %v4164_v58 = vadd.f32 %v4163_v60, %v4162_v39  ;;  %5682 = vmatpush3.bf16.msra.mxu1 %v5681_v25  ;;  %5652 = vmatprep.subr.bf16.mxu0 %v5651_v52  ;;  %v5697_v25 = vpack.c.bf16 %v946_v30, %v945_v16  ;;  %v5729_v52 = vpack.c.bf16 %v978_v34, %v977_v22  ;;  %v981_v60 = vld [vmem:[#allocation3 + $0x1d30] sm:$0xff]  ;;  %v955_v22 = vld [vmem:[#allocation3 + $0x1c60] sm:$0xff] }
 0x1cd   :  { %v2330_v53 = vadd.f32 %v4129_v55, %v6099_v7  ;;  %5684 = vmatprep.subr.bf16.mxu1 %v5683_v49  ;;  %v5723_v7 = vpack.c.bf16 %v992_v9, %v991_v6  ;;  %v5731_v49 = vpack.c.bf16 %v996_v41, %v995_v35  ;;  %v5701_v39 = vpack.c.bf16 %v948_v46, %v947_v44  ;;  %v950_v55 = vld [vmem:[#allocation3 + $0x1c38] sm:$0xff]  ;;  %v984_v6 = vld [vmem:[#allocation3 + $0x1d48] sm:$0xff]  ;;  %v969_v9 = vld [vmem:[#allocation3 + $0x1cd0] sm:$0xff] }
 0x1ce   :  { %v5705_v2 = vpack.c.bf16 %v950_v55, %v949_v51  ;;  %v5737_v56 = vpack.c.bf16 %v982_v63, %v981_v60  ;;  %v5741_v18 = vpack.c.bf16 %v984_v6, %v983_v4  ;;  %v5711_v0 = vpack.c.bf16 %v970_v10, %v969_v9  ;;  %v987_v34 = vld [vmem:[#allocation3 + $0x1d60] sm:$0xff]  ;;  %v973_v35 = vld [vmem:[#allocation3 + $0x1cf0] sm:$0xff]  ;;  %v974_v41 = vld [vmem:[#allocation3 + $0x1cf8] sm:$0xff] }
 0x1cf   :  { %v6117_v62 = vadd.f32 %v4164_v58, %v2330_v53  ;;  %5654 = vmatpush3.bf16.msra.mxu0 %v5653_v61  ;;  %v5735_v61 = vpack.c.bf16 %v998_v33, %v997_v57  ;;  %v967_v58 = vld [vmem:[#allocation3 + $0x1cc0] sm:$0xff]  ;;  %v5745_v16 = vpack.c.bf16 %v986_v20, %v985_v15  ;;  %v5715_v30 = vpack.c.bf16 %v972_v24, %v971_v23  ;;  %v957_v57 = vld [vmem:[#allocation3 + $0x1c70] sm:$0xff]  ;;  %v958_v33 = vld [vmem:[#allocation3 + $0x1c78] sm:$0xff] }
 0x1d0   :  { %5686 = vmatpush3.bf16.msra.mxu1 %v5685_v48  ;;  %5656 = vmatprep.subr.bf16.mxu0 %v5655_v45  ;;  %v968_v48 = vld [vmem:[#allocation3 + $0x1cc8] sm:$0xff]  ;;  %v999_v45 = vld [vmem:[#allocation3 + $0x1dc0] sm:$0xff]  ;;  %v990_v51 = vld [vmem:[#allocation3 + $0x1d78] sm:$0xff] }
 0x1d1   :  { %5688 = vmatprep.subr.bf16.mxu1 %v5687_v3  ;;  %v5707_v53 = vpack.c.bf16 %v968_v48, %v967_v58  ;;  %v951_v3 = vld [vmem:[#allocation3 + $0x1c40] sm:$0xff]  ;;  %v5739_v5 = vpack.c.bf16 %v1000_v1, %v999_v45  ;;  %v1024_v60 = vld [vmem:[#allocation3 + $0x1e88] sm:$0xff]  ;;  %v5721_v45 = vpack.c.bf16 %v958_v33, %v957_v57  ;;  %v1025_v4 = vld [vmem:[#allocation3 + $0x1e90] sm:$0xff] }
 0x1d2   :  { %v1023_v55 = vld [vmem:[#allocation3 + $0x1e80] sm:$0xff]  ;;  %v1056_v63 = vld [vmem:[#allocation3 + $0x1f88] sm:$0xff]  ;;  %v1057_v9 = vld [vmem:[#allocation3 + $0x1f90] sm:$0xff] }
 0x1d3   :  { %5658 = vmatpush3.bf16.msra.mxu0 %v5657_v8  ;;  %v1001_v8 = vld [vmem:[#allocation3 + $0x1dd0] sm:$0xff]  ;;  %v1058_v10 = vld [vmem:[#allocation3 + $0x1f98] sm:$0xff]  ;;  %v1027_v20 = vld [vmem:[#allocation3 + $0x1ea0] sm:$0xff] }
 0x1d4   :  { %5690 = vmatpush3.bf16.msra.mxu1 %v5689_v17  ;;  %5692 = vmatprep.subr.bf16.mxu0 %v5691_v11  ;;  %v1002_v17 = vld [vmem:[#allocation3 + $0x1dd8] sm:$0xff]  ;;  %v5709_v11 = vpack.c.bf16 %v952_v14, %v951_v3  ;;  %v1039_v3 = vld [vmem:[#allocation3 + $0x1f00] sm:$0xff]  ;;  %v1040_v14 = vld [vmem:[#allocation3 + $0x1f08] sm:$0xff]  ;;  %v5791_v15 = vpack.c.bf16 %v1058_v10, %v1057_v9 }
 0x1d5   :  { %5724 = vmatprep.subr.bf16.mxu1 %v5723_v7  ;;  %v954_v7 = vld [vmem:[#allocation3 + $0x1c58] sm:$0xff]  ;;  %v5743_v12 = vpack.c.bf16 %v1002_v17, %v1001_v8  ;;  %v1028_v23 = vld [vmem:[#allocation3 + $0x1ea8] sm:$0xff]  ;;  %v1067_v10 = vld [vmem:[#allocation3 + $0x1fe0] sm:$0xff] }
 0x1d6   :  { %3308 = vmatmul.mubr.f32.vlgmr.msra.gmra.mrb[26].mxu0 %v6102_v37  ;;  %v965_v37 = vld [vmem:[#allocation3 + $0x1cb0] sm:$0xff]  ;;  %v1036_v9 = vld [vmem:[#allocation3 + $0x1ee8] sm:$0xff] }
 0x1d7   :  { %5694 = vmatpush3.bf16.msra.mxu0 %v5693_v27  ;;  %3378 = vmatmul.mubr.f32.vlgmr.msra.gmra.mrb[26].mxu1 %v6105_v40  ;;  %v5733_v40 = vpack.c.bf16 %v980_v50, %v979_v47  ;;  %v5703_v59 = vpack.c.bf16 %v966_v54, %v965_v37  ;;  %v1003_v27 = vld [vmem:[#allocation3 + $0x1de0] sm:$0xff]  ;;  %v5719_v54 = vpack.c.bf16 %v974_v41, %v973_v35  ;;  %v1061_v35 = vld [vmem:[#allocation3 + $0x1fb0] sm:$0xff]  ;;  %v1062_v41 = vld [vmem:[#allocation3 + $0x1fb8] sm:$0xff] }
 0x1d8   :  { %5726 = vmatpush3.bf16.msra.mxu1 %v5725_v28  ;;  %5696 = vmatprep.subr.bf16.mxu0 %v5695_v29  ;;  %v1004_v28 = vld [vmem:[#allocation3 + $0x1de8] sm:$0xff]  ;;  %v5713_v29 = vpack.c.bf16 %v954_v7, %v953_v19  ;;  %v1010_v19 = vld [vmem:[#allocation3 + $0x1e18] sm:$0xff]  ;;  %v1041_v7 = vld [vmem:[#allocation3 + $0x1f10] sm:$0xff] }
 0x1d9   :  { %5728 = vmatprep.subr.bf16.mxu1 %v5727_v32  ;;  %3447 = vmatprep.mubr.f32.mxu0 %v1340_v42  ;;  %v956_v32 = vld [vmem:[#allocation3 + $0x1c68] sm:$0xff]  ;;  %v5747_v38 = vpack.c.bf16 %v1004_v28, %v1003_v27 }
 0x1da   :  { %3517 = vmatprep.mubr.f32.mxu1 %v1341_v43  ;;  %v988_v42 = vld [vmem:[#allocation3 + $0x1d68] sm:$0xff]  ;;  %v5717_v47 = vpack.c.bf16 %v956_v32, %v955_v22  ;;  %v1011_v22 = vld [vmem:[#allocation3 + $0x1e20] sm:$0xff] }
 0x1db   :  { %5698 = vmatpush3.bf16.msra.mxu0 %v5697_v25  ;;  %v5749_v37 = vpack.c.bf16 %v988_v42, %v987_v34  ;;  %v1060_v27 = vld [vmem:[#allocation3 + $0x1fa8] sm:$0xff]  ;;  %v1043_v34 = vld [vmem:[#allocation3 + $0x1f20] sm:$0xff]  ;;  %v1030_v42 = vld [vmem:[#allocation3 + $0x1eb8] sm:$0xff] }
 0x1dc   :  { %5730 = vmatpush3.bf16.msra.mxu1 %v5729_v52  ;;  %5700 = vmatprep.subr.bf16.mxu0 %v5699_v31  ;;  %v1005_v52 = vld [vmem:[#allocation3 + $0x1df0] sm:$0xff]  ;;  %v1006_v31 = vld [vmem:[#allocation3 + $0x1df8] sm:$0xff]  ;;  %v1012_v32 = vld [vmem:[#allocation3 + $0x1e28] sm:$0xff] }
 0x1dd   :  { %5732 = vmatprep.subr.bf16.mxu1 %v5731_v49  ;;  %v46_v49 = vld [vmem:[%s6155_s0 + $0x78] sm:$0xff] }
 0x1de   :  { %v1342_v58 = vcombine.high %v46_v49, %v46_v49  ;;  %v6138_v6 = vrot.slane %v46_v49, %v5896_v13  ;;  %v1031_v49 = vld [vmem:[#allocation3 + $0x1ec0] sm:$0xff] }
 0x1df   :  { %5702 = vmatpush3.bf16.msra.mxu0 %v5701_v39  ;;  %v989_v39 = vld [vmem:[#allocation3 + $0x1d70] sm:$0xff] }
 0x1e0   :  { %5734 = vmatpush3.bf16.msra.mxu1 %v5733_v40  ;;  %5704 = vmatprep.subr.bf16.mxu0 %v5703_v59  ;;  %v5751_v59 = vpack.c.bf16 %v1006_v31, %v1005_v52  ;;  %v5753_v1 = vpack.c.bf16 %v990_v51, %v989_v39  ;;  %v6141_v8 = vrot.slane %v1342_v58, %v5896_v13  ;;  %v1059_v13 = vld [vmem:[#allocation3 + $0x1fa0] sm:$0xff]  ;;  %v1013_v52 = vld [vmem:[#allocation3 + $0x1e30] sm:$0xff]  ;;  %v1014_v31 = vld [vmem:[#allocation3 + $0x1e38] sm:$0xff] }
 0x1e1   :  { %5736 = vmatprep.subr.bf16.mxu1 %v5735_v61  ;;  %v1055_v61 = vld [vmem:[#allocation3 + $0x1f80] sm:$0xff]  ;;  %v1357_v24 = vcombine.high %v6138_v6, %v6138_v6  ;;  %v5769_v57 = vpack.c.bf16 %v1014_v31, %v1013_v52  ;;  %v1065_v58 = vld [vmem:[#allocation3 + $0x1fd0] sm:$0xff] }
 0x1e2   :  { %v1358_v28 = vcombine.high %v6141_v8, %v6141_v8  ;;  %v1047_v51 = vld [vmem:[#allocation3 + $0x1f40] sm:$0xff] }
 0x1e3   :  { %5706 = vmatpush3.bf16.msra.mxu0 %v5705_v2  ;;  %v5755_v2 = vpack.c.bf16 %v1024_v60, %v1023_v55  ;;  %v1048_v60 = vld [vmem:[#allocation3 + $0x1f48] sm:$0xff] }
 0x1e4   :  { %5738 = vmatpush3.bf16.msra.mxu1 %v5737_v56  ;;  %5708 = vmatprep.subr.bf16.mxu0 %v5707_v53  ;;  %v1007_v56 = vld [vmem:[#allocation3 + $0x1e00] sm:$0xff]  ;;  %v1008_v53 = vld [vmem:[#allocation3 + $0x1e08] sm:$0xff] }
 0x1e5   :  { %5740 = vmatprep.subr.bf16.mxu1 %v5739_v5  ;;  %v1026_v5 = vld [vmem:[#allocation3 + $0x1e98] sm:$0xff]  ;;  %v5757_v17 = vpack.c.bf16 %v1008_v53, %v1007_v56  ;;  %v1017_v53 = vld [vmem:[#allocation3 + $0x1e50] sm:$0xff] }
 0x1e7   :  { %5710 = vmatpush3.bf16.msra.mxu0 %v5709_v11  ;;  %v5789_v11 = vpack.c.bf16 %v1040_v14, %v1039_v3  ;;  %v1018_v3 = vld [vmem:[#allocation3 + $0x1e58] sm:$0xff] }
 0x1e8   :  { %5742 = vmatpush3.bf16.msra.mxu1 %v5741_v18  ;;  %5712 = vmatprep.subr.bf16.mxu0 %v5711_v0  ;;  %v5759_v18 = vpack.c.bf16 %v1026_v5, %v1025_v4  ;;  %v1009_v0 = vld [vmem:[#allocation3 + $0x1e10] sm:$0xff]  ;;  %v1050_v4 = vld [vmem:[#allocation3 + $0x1f58] sm:$0xff]  ;;  %v1035_v5 = vld [vmem:[#allocation3 + $0x1ee0] sm:$0xff] }
 0x1e9   :  { %v4197_v36 = vpop.f32.mrb[14].mxu0  ;;  %5744 = vmatprep.subr.bf16.mxu1 %v5743_v12  ;;  %v1042_v12 = vld [vmem:[#allocation3 + $0x1f18] sm:$0xff] }
 0x1ea   :  { %v4198_v43 = vpop.f32.mrb[15].mxu0  ;;  %v4232_v25 = vpop.f32.mrb[14].mxu1 }
 0x1eb   :  { %v4199_v44 = vadd.f32 %v4198_v43, %v4197_v36  ;;  %5714 = vmatpush3.bf16.msra.mxu0 %v5713_v29  ;;  %v4233_v46 = vpop.f32.mrb[15].mxu1  ;;  %v5761_v29 = vpack.c.bf16 %v1010_v19, %v1009_v0  ;;  %v5795_v36 = vpack.c.bf16 %v1060_v27, %v1059_v13  ;;  %v5765_v43 = vpack.c.bf16 %v1012_v32, %v1011_v22  ;;  %v1019_v19 = vld [vmem:[#allocation3 + $0x1e60] sm:$0xff]  ;;  %v1038_v13 = vld [vmem:[#allocation3 + $0x1ef8] sm:$0xff] }
 0x1ec   :  { %v4234_v50 = vadd.f32 %v4233_v46, %v4232_v25  ;;  %5746 = vmatpush3.bf16.msra.mxu1 %v5745_v16  ;;  %5716 = vmatprep.subr.bf16.mxu0 %v5715_v30  ;;  %v5793_v16 = vpack.c.bf16 %v1042_v12, %v1041_v7  ;;  %v5763_v30 = vpack.c.bf16 %v1028_v23, %v1027_v20  ;;  %v1020_v7 = vld [vmem:[#allocation3 + $0x1e68] sm:$0xff] }
 0x1ed   :  { %v2470_v40 = vadd.f32 %v4199_v44, %v6117_v62  ;;  %5748 = vmatprep.subr.bf16.mxu1 %v5747_v38  ;;  %v5787_v62 = vpack.c.bf16 %v1056_v63, %v1055_v61  ;;  %v1044_v38 = vld [vmem:[#allocation3 + $0x1f28] sm:$0xff]  ;;  %v1045_v44 = vld [vmem:[#allocation3 + $0x1f30] sm:$0xff]  ;;  %v5799_v46 = vpack.c.bf16 %v1062_v41, %v1061_v35  ;;  %v1034_v63 = vld [vmem:[#allocation3 + $0x1ed8] sm:$0xff]  ;;  %v5779_v0 = vpack.c.bf16 %v1036_v9, %v1035_v5 }
 0x1ee   :  { %v1033_v61 = vld [vmem:[#allocation3 + $0x1ed0] sm:$0xff]  ;;  %v1052_v23 = vld [vmem:[#allocation3 + $0x1f68] sm:$0xff]  ;;  %v5781_v32 = vpack.c.bf16 %v1020_v7, %v1019_v19 }
 0x1ef   :  { %v6135_v48 = vadd.f32 %v4234_v50, %v2470_v40  ;;  %5718 = vmatpush3.bf16.msra.mxu0 %v5717_v47  ;;  %v1046_v47 = vld [vmem:[#allocation3 + $0x1f38] sm:$0xff]  ;;  %v1032_v50 = vld [vmem:[#allocation3 + $0x1ec8] sm:$0xff]  ;;  %v1015_v40 = vld [vmem:[#allocation3 + $0x1e40] sm:$0xff]  ;;  %v5775_v56 = vpack.c.bf16 %v1034_v63, %v1033_v61 }
 0x1f0   :  { %5750 = vmatpush3.bf16.msra.mxu1 %v5749_v37  ;;  %5720 = vmatprep.subr.bf16.mxu0 %v5719_v54  ;;  %v1063_v37 = vld [vmem:[#allocation3 + $0x1fc0] sm:$0xff]  ;;  %v1064_v54 = vld [vmem:[#allocation3 + $0x1fc8] sm:$0xff]  ;;  %v5801_v33 = vpack.c.bf16 %v1046_v47, %v1045_v44  ;;  %v5771_v39 = vpack.c.bf16 %v1032_v50, %v1031_v49 }
 0x1f1   :  { %5752 = vmatprep.subr.bf16.mxu1 %v5751_v59  ;;  %v1016_v59 = vld [vmem:[#allocation3 + $0x1e48] sm:$0xff]  ;;  %v5803_v55 = vpack.c.bf16 %v1064_v54, %v1063_v37 }
 0x1f3   :  { %5722 = vmatpush3.bf16.msra.mxu0 %v5721_v45  ;;  %v1066_v45 = vld [vmem:[#allocation3 + $0x1fd8] sm:$0xff] }
 0x1f4   :  { %5754 = vmatpush3.bf16.msra.mxu1 %v5753_v1  ;;  %5756 = vmatprep.subr.bf16.mxu0 %v5755_v2  ;;  %v5773_v1 = vpack.c.bf16 %v1016_v59, %v1015_v40  ;;  %v5805_v2 = vpack.c.bf16 %v1048_v60, %v1047_v51  ;;  %v5807_v14 = vpack.c.bf16 %v1066_v45, %v1065_v58 }
 0x1f5   :  { %5788 = vmatprep.subr.bf16.mxu1 %v5787_v62  ;;  %v1049_v62 = vld [vmem:[#allocation3 + $0x1f50] sm:$0xff] }
 0x1f6   :  { %3448 = vmatmul.mubr.f32.vlgmr.msra.gmra.mrb[28].mxu0 %v6120_v21  ;;  %v1029_v21 = vld [vmem:[#allocation3 + $0x1eb0] sm:$0xff] }
 0x1f7   :  { %5758 = vmatpush3.bf16.msra.mxu0 %v5757_v17  ;;  %3518 = vmatmul.mubr.f32.vlgmr.msra.gmra.mrb[28].mxu1 %v6123_v26  ;;  %v5797_v26 = vpack.c.bf16 %v1044_v38, %v1043_v34  ;;  %v5767_v25 = vpack.c.bf16 %v1030_v42, %v1029_v21  ;;  %v1068_v17 = vld [vmem:[#allocation3 + $0x1fe8] sm:$0xff]  ;;  %v1021_v21 = vld [vmem:[#allocation3 + $0x1e70] sm:$0xff]  ;;  %v1022_v42 = vld [vmem:[#allocation3 + $0x1e78] sm:$0xff] }
 0x1f8   :  { %5790 = vmatpush3.bf16.msra.mxu1 %v5789_v11  ;;  %5760 = vmatprep.subr.bf16.mxu0 %v5759_v18  ;;  %v5777_v11 = vpack.c.bf16 %v1018_v3, %v1017_v53  ;;  %v5809_v18 = vpack.c.bf16 %v1050_v4, %v1049_v62  ;;  %v5811_v20 = vpack.c.bf16 %v1068_v17, %v1067_v10 }
 0x1f9   :  { %5792 = vmatprep.subr.bf16.mxu1 %v5791_v15  ;;  %3587 = vmatprep.mubr.f32.mxu0 %v1357_v24  ;;  %v1051_v15 = vld [vmem:[#allocation3 + $0x1f60] sm:$0xff]  ;;  %v1037_v24 = vld [vmem:[#allocation3 + $0x1ef0] sm:$0xff]  ;;  %v5785_v52 = vpack.c.bf16 %v1022_v42, %v1021_v21 }
 0x1fa   :  { %3657 = vmatprep.mubr.f32.mxu1 %v1358_v28  ;;  %v5783_v38 = vpack.c.bf16 %v1038_v13, %v1037_v24 }
 0x1fb   :  { %5762 = vmatpush3.bf16.msra.mxu0 %v5761_v29  ;;  %v1069_v29 = vld [vmem:[#allocation3 + $0x1ff0] sm:$0xff] }
 0x1fc   :  { %5794 = vmatpush3.bf16.msra.mxu1 %v5793_v16  ;;  %5764 = vmatprep.subr.bf16.mxu0 %v5763_v30  ;;  %v1070_v16 = vld [vmem:[#allocation3 + $0x1ff8] sm:$0xff] }
 0x1fd   :  { %5796 = vmatprep.subr.bf16.mxu1 %v5795_v36  ;;  %v5813_v36 = vpack.c.bf16 %v1052_v23, %v1051_v15  ;;  %v5815_v41 = vpack.c.bf16 %v1070_v16, %v1069_v29 }
 0x1ff   :  { %5766 = vmatpush3.bf16.msra.mxu0 %v5765_v43  ;;  %v1053_v43 = vld [vmem:[#allocation3 + $0x1f70] sm:$0xff] }
 0x200   :  { %5798 = vmatpush3.bf16.msra.mxu1 %v5797_v26  ;;  %5768 = vmatprep.subr.bf16.mxu0 %v5767_v25  ;;  %v1054_v26 = vld [vmem:[#allocation3 + $0x1f78] sm:$0xff] }
 0x201   :  { %5800 = vmatprep.subr.bf16.mxu1 %v5799_v46  ;;  %v5817_v31 = vpack.c.bf16 %v1054_v26, %v1053_v43 }
 0x203   :  { %5770 = vmatpush3.bf16.msra.mxu0 %v5769_v57 }
 0x204   :  { %5802 = vmatpush3.bf16.msra.mxu1 %v5801_v33  ;;  %5772 = vmatprep.subr.bf16.mxu0 %v5771_v39 }
 0x205   :  { %5804 = vmatprep.subr.bf16.mxu1 %v5803_v55 }
 0x207   :  { %5774 = vmatpush3.bf16.msra.mxu0 %v5773_v1 }
 0x208   :  { %5806 = vmatpush3.bf16.msra.mxu1 %v5805_v2  ;;  %5776 = vmatprep.subr.bf16.mxu0 %v5775_v56 }
 0x209   :  { %v4267_v12 = vpop.f32.mrb[16].mxu0  ;;  %5808 = vmatprep.subr.bf16.mxu1 %v5807_v14 }
 0x20a   :  { %v4268_v27 = vpop.f32.mrb[17].mxu0  ;;  %v4302_v28 = vpop.f32.mrb[16].mxu1 }
 0x20b   :  { %v4269_v30 = vadd.f32 %v4268_v27, %v4267_v12  ;;  %5778 = vmatpush3.bf16.msra.mxu0 %v5777_v11  ;;  %v4303_v22 = vpop.f32.mrb[17].mxu1 }
 0x20c   :  { %v4304_v34 = vadd.f32 %v4303_v22, %v4302_v28  ;;  %5810 = vmatpush3.bf16.msra.mxu1 %v5809_v18  ;;  %5780 = vmatprep.subr.bf16.mxu0 %v5779_v0 }
 0x20d   :  { %v2610_v35 = vadd.f32 %v4269_v30, %v6135_v48  ;;  %5812 = vmatprep.subr.bf16.mxu1 %v5811_v20 }
 0x20f   :  { %v2680_v25 = vadd.f32 %v4304_v34, %v2610_v35  ;;  %5782 = vmatpush3.bf16.msra.mxu0 %v5781_v32 }
 0x210   :  { %5814 = vmatpush3.bf16.msra.mxu1 %v5813_v36  ;;  %5784 = vmatprep.subr.bf16.mxu0 %v5783_v38 }
 0x211   :  { %5816 = vmatprep.subr.bf16.mxu1 %v5815_v41 }
 0x213   :  { %5786 = vmatpush3.bf16.msra.mxu0 %v5785_v52 }
 0x214   :  { %5818 = vmatpush3.bf16.msra.mxu1 %v5817_v31 }
 0x216   :  { %3588 = vmatmul.mubr.f32.vlgmr.msra.gmra.mrb[30].mxu0 %v6138_v6 }
 0x217   :  { %3658 = vmatmul.mubr.f32.vlgmr.msra.gmra.mrb[30].mxu1 %v6141_v8  ;;  %v5868_v8 = vmov 0.0  }
 0x218   :  { %29 = vst [vmem:[#allocation2] sm:$0x3] %v5868_v8 }
 0x21f   :  { %v30_v42 = vld [vmem:[#allocation2] sm:$0x3] }
 0x229   :  { %v4337_v44 = vpop.f32.mrb[18].mxu0 }
 0x22a   :  { %v4338_v46 = vpop.f32.mrb[19].mxu0  ;;  %v4372_v48 = vpop.f32.mrb[18].mxu1 }
 0x22b   :  { %v4339_v47 = vadd.f32 %v4338_v46, %v4337_v44  ;;  %v4373_v49 = vpop.f32.mrb[19].mxu1 }
 0x22c   :  { %v4374_v50 = vadd.f32 %v4373_v49, %v4372_v48 }
 0x22d   :  { %v2750_v37 = vadd.f32 %v4339_v47, %v2680_v25 }
 0x22f   :  { %v2820_v54 = vadd.f32 %v4374_v50, %v2750_v37 }
 0x249   :  { %v4407_v57 = vpop.f32.mrb[20].mxu0 }
 0x24a   :  { %v4408_v33 = vpop.f32.mrb[21].mxu0  ;;  %v4442_v39 = vpop.f32.mrb[20].mxu1 }
 0x24b   :  { %v4409_v40 = vadd.f32 %v4408_v33, %v4407_v57  ;;  %v4443_v59 = vpop.f32.mrb[21].mxu1 }
 0x24c   :  { %v4444_v51 = vadd.f32 %v4443_v59, %v4442_v39 }
 0x24d   :  { %v2890_v55 = vadd.f32 %v4409_v40, %v2820_v54 }
 0x24f   :  { %v2960_v60 = vadd.f32 %v4444_v51, %v2890_v55 }
 0x269   :  { %v4477_v61 = vpop.f32.mrb[22].mxu0 }
 0x26a   :  { %v4478_v6 = vpop.f32.mrb[23].mxu0  ;;  %v4512_v63 = vpop.f32.mrb[22].mxu1 }
 0x26b   :  { %v4479_v58 = vadd.f32 %v4478_v6, %v4477_v61  ;;  %v4513_v45 = vpop.f32.mrb[23].mxu1 }
 0x26c   :  { %v4514_v1 = vadd.f32 %v4513_v45, %v4512_v63 }
 0x26d   :  { %v3030_v2 = vadd.f32 %v4479_v58, %v2960_v60 }
 0x26f   :  { %v3100_v56 = vadd.f32 %v4514_v1, %v3030_v2 }
 0x289   :  { %v4547_v53 = vpop.f32.mrb[24].mxu0 }
 0x28a   :  { %v4548_v3 = vpop.f32.mrb[25].mxu0  ;;  %v4582_v62 = vpop.f32.mrb[24].mxu1 }
 0x28b   :  { %v4549_v14 = vadd.f32 %v4548_v3, %v4547_v53  ;;  %v4583_v4 = vpop.f32.mrb[25].mxu1 }
 0x28c   :  { %v4584_v5 = vadd.f32 %v4583_v4, %v4582_v62 }
 0x28d   :  { %v3170_v9 = vadd.f32 %v4549_v14, %v3100_v56 }
 0x28f   :  { %v3240_v10 = vadd.f32 %v4584_v5, %v3170_v9 }
 0x2a9   :  { %v4617_v17 = vpop.f32.mrb[26].mxu0 }
 0x2aa   :  { %v4618_v11 = vpop.f32.mrb[27].mxu0  ;;  %v4652_v18 = vpop.f32.mrb[26].mxu1 }
 0x2ab   :  { %v4619_v0 = vadd.f32 %v4618_v11, %v4617_v17  ;;  %v4653_v19 = vpop.f32.mrb[27].mxu1 }
 0x2ac   :  { %v4654_v7 = vadd.f32 %v4653_v19, %v4652_v18 }
 0x2ad   :  { %v3310_v15 = vadd.f32 %v4619_v0, %v3240_v10 }
 0x2af   :  { %v3380_v12 = vadd.f32 %v4654_v7, %v3310_v15 }
 0x2c9   :  { %v4687_v20 = vpop.f32.mrb[28].mxu0 }
 0x2ca   :  { %v4688_v23 = vpop.f32.mrb[29].mxu0  ;;  %v4722_v24 = vpop.f32.mrb[28].mxu1 }
 0x2cb   :  { %v4689_v13 = vadd.f32 %v4688_v23, %v4687_v20  ;;  %v4723_v27 = vpop.f32.mrb[29].mxu1 }
 0x2cc   :  { %v4724_v28 = vadd.f32 %v4723_v27, %v4722_v24 }
 0x2cd   :  { %v3450_v29 = vadd.f32 %v4689_v13, %v3380_v12 }
 0x2cf   :  { %v3520_v16 = vadd.f32 %v4724_v28, %v3450_v29 }
 0x2e9   :  { %v4757_v30 = vpop.f32.mrb[30].mxu0 }
 0x2ea   :  { %v4758_v22 = vpop.f32.mrb[31].mxu0  ;;  %v4792_v32 = vpop.f32.mrb[30].mxu1 }
 0x2eb   :  { %v4759_v34 = vadd.f32 %v4758_v22, %v4757_v30  ;;  %v4793_v36 = vpop.f32.mrb[31].mxu1 }
 0x2ec   :  { %v4794_v38 = vadd.f32 %v4793_v36, %v4792_v32 }
 0x2ed   :  { %v3590_v21 = vadd.f32 %v4759_v34, %v3520_v16 }
 0x2ef   :  { %v3660_v35 = vadd.f32 %v4794_v38, %v3590_v21 }
 0x2f1   :  { %v3663_v41 = vadd.f32 %v3660_v35, %v30_v42 }
 0x2f3   :  { %3664 = vst [vmem:[#allocation2] sm:$0x3] %v3663_v41 }
 0x2fa   :  { %v3668_v43 = vld [vmem:[#allocation2] sm:$0x3] }
 0x2fb   :  { %3669 = vst [vmem:[%s6157_s2] sm:$0x3] %v3668_v43 }
 0x2fc   :  { %3674 = vsyncpa [#allocation4], 1 }

</bundles_post_ra>
